<compile_context>
chip_gen: v7x
topology: tpu7x:2x2x1
jax: 0.10.0
libtpu: 0.0.40
codegen_flags: <defaults>
</compile_context>

<pallas_src>
import functools

import jax
import jax.numpy as jnp
from jax.experimental import pallas as pl
from jax.experimental.pallas import tpu as pltpu

_EPS = 1e-5
_LANE = 128
_VMEM_LIMIT = 48 * 1024 * 1024  # below v7x's 64 MiB physical VMEM, above defaults


# ----------------------------------------------------------------------------
# small helpers
# ----------------------------------------------------------------------------
def _round_up(a, b):
    return (a + b - 1) // b * b


def _pad_to(arr, size, axis):
    pad = size - arr.shape[axis]
    if pad == 0:
        return arr
    widths = [(0, 0)] * arr.ndim
    widths[axis] = (0, pad)
    return jnp.pad(arr, widths)


def _tiling(m):
    """Deterministic M-tiling: big lane-dense tiles, multiple of 8 sublanes."""
    tile = min(512, _round_up(m, 8))
    return tile, _round_up(m, tile)


def _compiler_params(n_axes):
    return pltpu.CompilerParams(
        dimension_semantics=("parallel",) * n_axes,
        vmem_limit_bytes=_VMEM_LIMIT,
    )


# ----------------------------------------------------------------------------
# Kernel 1: tiled 1x1-conv matmul (+optional fused input BN+ReLU) + BN partial
#           statistics (per-tile per-channel sum / sum-of-squares)
# ----------------------------------------------------------------------------
def _mm_stats_kernel(x_ref, w_ref, scale_ref, shift_ref, y_ref, stats_ref, *,
                     tile_m, m_true, fuse_input_bn):
    x = x_ref[...]
    if fuse_input_bn:
        # BN (+ReLU) of the *previous* stage, fused into this stage's input read.
        x = jnp.maximum(x.astype(jnp.float32) * scale_ref[...] + shift_ref[...], 0.0)
    y = jnp.dot(x.astype(w_ref.dtype), w_ref[...],
                preferred_element_type=jnp.float32)

    if m_true % tile_m != 0:
        # Mask rows that only exist because M was padded up to the tile size so
        # they do not pollute the batch statistics.
        i = pl.program_id(0)
        rows = i * tile_m + jax.lax.broadcasted_iota(jnp.int32, (tile_m, 1), 0)
        y = jnp.where(rows < m_true, y, 0.0)

    y_ref[...] = y.astype(y_ref.dtype)
    stats_ref[0, 0:1, :] = jnp.sum(y, axis=0, keepdims=True)
    stats_ref[0, 1:2, :] = jnp.sum(y * y, axis=0, keepdims=True)


def _matmul_stats(x2d, w, scale, shift, *, m_true, fuse_input_bn, compute_dtype):
    k = x2d.shape[1]
    c = w.shape[1]
    tile, m_pad = _tiling(m_true)
    if x2d.shape[0] != m_pad:
        x2d = jnp.pad(x2d, ((0, m_pad - x2d.shape[0]), (0, 0)))
    grid = m_pad // tile

    kern = functools.partial(_mm_stats_kernel, tile_m=tile, m_true=m_true,
                             fuse_input_bn=fuse_input_bn)
    y, stats = pl.pallas_call(
        kern,
        grid=(grid,),
        in_specs=[
            pl.BlockSpec((tile, k), lambda i: (i, 0)),   # streamed activations
            pl.BlockSpec((k, c), lambda i: (0, 0)),      # resident weight
            pl.BlockSpec((1, k), lambda i: (0, 0)),      # resident BN scale
            pl.BlockSpec((1, k), lambda i: (0, 0)),      # resident BN shift
        ],
        out_specs=[
            pl.BlockSpec((tile, c), lambda i: (i, 0)),
            pl.BlockSpec((1, 2, c), lambda i: (i, 0, 0)),
        ],
        out_shape=[
            jax.ShapeDtypeStruct((m_pad, c), compute_dtype),
            jax.ShapeDtypeStruct((grid, 2, c), jnp.float32),
        ],
        compiler_params=_compiler_params(1),
    )(x2d, w, scale, shift)
    return y, stats


def _finalize_bn(stats, count, gamma, beta):
    """Tiny cross-tile stat reduction -> per-channel (scale, shift) in f32."""
    s = jnp.sum(stats, axis=0)                       # (2, C)
    mean = s[0] / count
    var = jnp.maximum(s[1] / count - mean * mean, 0.0)   # biased var (BN train fwd)
    inv = jax.lax.rsqrt(var + _EPS)
    scale = gamma.astype(jnp.float32) * inv
    shift = beta.astype(jnp.float32) - mean * scale
    return scale.reshape(1, -1), shift.reshape(1, -1)


# ----------------------------------------------------------------------------
# Kernel 2: fused BN1 + ReLU + zero spatial padding (per-sample block)
# ----------------------------------------------------------------------------
def _bn_relu_pad_kernel(y_ref, scale_ref, shift_ref, o_ref, *, h, w):
    o_ref[...] = jnp.zeros_like(o_ref)
    act = jnp.maximum(y_ref[0].astype(jnp.float32) * scale_ref[...] + shift_ref[...], 0.0)
    o_ref[0, 1:h + 1, 1:w + 1, :] = act.astype(o_ref.dtype)


def _bn_relu_pad(y_img, scale, shift, *, hp, wp, compute_dtype):
    n, h, w, c = y_img.shape
    kern = functools.partial(_bn_relu_pad_kernel, h=h, w=w)
    return pl.pallas_call(
        kern,
        grid=(n,),
        in_specs=[
            pl.BlockSpec((1, h, w, c), lambda i: (i, 0, 0, 0)),
            pl.BlockSpec((1, c), lambda i: (0, 0)),
            pl.BlockSpec((1, c), lambda i: (0, 0)),
        ],
        out_specs=pl.BlockSpec((1, hp, wp, c), lambda i: (i, 0, 0, 0)),
        out_shape=jax.ShapeDtypeStruct((n, hp, wp, c), compute_dtype),
        compiler_params=_compiler_params(1),
    )(y_img, scale, shift)


# ----------------------------------------------------------------------------
# Kernel 3: 3x3 conv (stride 1 or 2, pad 1) via in-VMEM 9-tap accumulation.
# Input is the padded feature map with W stride-phases packed into lanes, so
# every tap is an *unstrided* shifted slice of a single per-sample VMEM block.
# Also emits BN2 partial statistics.  No im2col, no 9x HBM blow-up.
# ----------------------------------------------------------------------------
def _conv2_kernel(xp_ref, w_ref, y_ref, stats_ref, *, stride, ho, wo, cin_p):
    s = stride
    v = xp_ref[0]                                   # (hp, wc, s*cin_p)
    cout = w_ref.shape[-1]
    acc = jnp.zeros((ho * wo, cout), jnp.float32)
    for dy in range(3):
        rows = v[dy:dy + s * ho]                    # (s*ho, wc, s*cin_p)
        if s > 1:
            # keep only the stride-phase rows dy, dy+s, ... (leading-dim regroup)
            rows = rows.reshape(ho, s, rows.shape[1], rows.shape[2])[:, 0]
        for dx in range(3):
            c0 = dx // s                            # packed column cell offset
            l0 = (dx % s) * cin_p                   # packed lane-phase offset
            tap = rows[:, c0:c0 + wo, l0:l0 + cin_p]        # (ho, wo, cin_p)
            lhs = tap.reshape(ho * wo, cin_p).astype(w_ref.dtype)
            acc = acc + jnp.dot(lhs, w_ref[3 * dy + dx],
                                preferred_element_type=jnp.float32)
    y_ref[...] = acc.reshape(1, ho, wo, cout).astype(y_ref.dtype)
    stats_ref[0, 0:1, :] = jnp.sum(acc, axis=0, keepdims=True)
    stats_ref[0, 1:2, :] = jnp.sum(acc * acc, axis=0, keepdims=True)


def _conv2_3x3(xpk, w2, *, stride, ho, wo, cin_p, compute_dtype):
    n, hp, wc, cpk = xpk.shape
    cout = w2.shape[-1]
    kern = functools.partial(_conv2_kernel, stride=stride, ho=ho, wo=wo, cin_p=cin_p)
    return pl.pallas_call(
        kern,
        grid=(n,),
        in_specs=[
            pl.BlockSpec((1, hp, wc, cpk), lambda i: (i, 0, 0, 0)),
            pl.BlockSpec((9, cin_p, cout), lambda i: (0, 0, 0)),   # resident weights
        ],
        out_specs=[
            pl.BlockSpec((1, ho, wo, cout), lambda i: (i, 0, 0, 0)),
            pl.BlockSpec((1, 2, cout), lambda i: (i, 0, 0)),
        ],
        out_shape=[
            jax.ShapeDtypeStruct((n, ho, wo, cout), compute_dtype),
            jax.ShapeDtypeStruct((n, 2, cout), jnp.float32),
        ],
        compiler_params=_compiler_params(1),
    )(xpk, w2)


# ----------------------------------------------------------------------------
# Kernel 4: final fused epilogue  relu( BN3(y3) + [BNs(y_sc) | identity] )
# ----------------------------------------------------------------------------
def _bn_add_relu_kernel(y3_ref, sc_ref, s3_ref, b3_ref, ss_ref, bs_ref, o_ref, *,
                        project):
    y3 = y3_ref[...].astype(jnp.float32) * s3_ref[...] + b3_ref[...]
    sc = sc_ref[...].astype(jnp.float32)
    if project:
        sc = sc * ss_ref[...] + bs_ref[...]
    o_ref[...] = jnp.maximum(y3 + sc, 0.0).astype(o_ref.dtype)


def _bn_add_relu(y3, sc, scale3, shift3, scale_s, shift_s, *, m_true, project):
    m_pad, c = y3.shape
    tile, _ = _tiling(m_true)
    grid = m_pad // tile
    kern = functools.partial(_bn_add_relu_kernel, project=project)
    return pl.pallas_call(
        kern,
        grid=(grid,),
        in_specs=[
            pl.BlockSpec((tile, c), lambda i: (i, 0)),
            pl.BlockSpec((tile, c), lambda i: (i, 0)),
            pl.BlockSpec((1, c), lambda i: (0, 0)),
            pl.BlockSpec((1, c), lambda i: (0, 0)),
            pl.BlockSpec((1, c), lambda i: (0, 0)),
            pl.BlockSpec((1, c), lambda i: (0, 0)),
        ],
        out_specs=pl.BlockSpec((tile, c), lambda i: (i, 0)),
        out_shape=jax.ShapeDtypeStruct((m_pad, c), jnp.float32),
        compiler_params=_compiler_params(1),
    )(y3, sc, scale3, shift3, scale_s, shift_s)


# ----------------------------------------------------------------------------
# BottleneckResidualBlock forward
# ----------------------------------------------------------------------------
def bottleneck_block(x_nchw, params, *, stride, compute_dtype=jnp.bfloat16):
    """params: w1 (Cin,Cb), w2 (3,3,Cb,Cb) [HWIO], w3 (Cb,Cout), optional
    ws (Cin,Cout), plus g*/b* BatchNorm affine vectors."""
    n, cin, h, w = x_nchw.shape
    cb = params["w1"].shape[1]
    cout = params["w3"].shape[1]
    project = (stride != 1) or (cin != cout)

    cin_p = _round_up(cin, _LANE)
    cb_p = _round_up(cb, _LANE)
    cout_p = _round_up(cout, _LANE)

    # NHWC + channel padding to lane multiples (free at real ResNet widths).
    x = jnp.transpose(x_nchw, (0, 2, 3, 1)).astype(jnp.float32)
    x = _pad_to(x, cin_p, 3).astype(compute_dtype)

    w1 = _pad_to(_pad_to(params["w1"], cin_p, 0), cb_p, 1).astype(compute_dtype)
    w3 = _pad_to(_pad_to(params["w3"], cb_p, 0), cout_p, 1).astype(compute_dtype)
    w2 = _pad_to(_pad_to(params["w2"], cb_p, 2), cb_p, 3)
    w2 = w2.reshape(9, cb_p, cb_p).astype(compute_dtype)
    g1, b1 = _pad_to(params["g1"], cb_p, 0), _pad_to(params["b1"], cb_p, 0)
    g2, b2 = _pad_to(params["g2"], cb_p, 0), _pad_to(params["b2"], cb_p, 0)
    g3, b3 = _pad_to(params["g3"], cout_p, 0), _pad_to(params["b3"], cout_p, 0)

    ho = (h - 1) // stride + 1
    wo = (w - 1) // stride + 1
    m1 = n * h * w
    m2 = n * ho * wo

    one_k = jnp.ones((1, cin_p), jnp.float32)
    zero_k = jnp.zeros((1, cin_p), jnp.float32)

    # ---- conv1 (1x1): raw result + BN1 batch statistics (pass 1) ----
    y1, s1 = _matmul_stats(x.reshape(m1, cin_p), w1, one_k, zero_k,
                           m_true=m1, fuse_input_bn=False, compute_dtype=compute_dtype)
    scale1, shift1 = _finalize_bn(s1, m1, g1, b1)

    # ---- BN1 + ReLU + zero spatial padding, fused (pass 2) ----
    hp = stride * ho + 2
    wp = stride * wo + 2
    x1p = _bn_relu_pad(y1[:m1].reshape(n, h, w, cb_p), scale1, shift1,
                       hp=hp, wp=wp, compute_dtype=compute_dtype)

    # Pack W stride-phases into lanes (free row-major reshape) so conv2 reads
    # every tap as an unstrided slice of one per-sample VMEM block.
    x1pk = x1p.reshape(n, hp, wp // stride, stride * cb_p) if stride > 1 else x1p

    # ---- conv2 (3x3, stride, pad 1): 9-tap in-VMEM accumulation + BN2 stats ----
    y2, s2 = _conv2_3x3(x1pk, w2, stride=stride, ho=ho, wo=wo, cin_p=cb_p,
                        compute_dtype=compute_dtype)
    scale2, shift2 = _finalize_bn(s2, m2, g2, b2)

    # ---- conv3 (1x1) with BN2+ReLU fused into its input read + BN3 stats ----
    y3, s3 = _matmul_stats(y2.reshape(m2, cb_p), w3, scale2, shift2,
                           m_true=m2, fuse_input_bn=True, compute_dtype=compute_dtype)
    scale3, shift3 = _finalize_bn(s3, m2, g3, b3)

    tile2, m2_pad = _tiling(m2)

    # ---- shortcut branch ----
    if project:
        ws = _pad_to(_pad_to(params["ws"], cin_p, 0), cout_p, 1).astype(compute_dtype)
        gs, bs = _pad_to(params["gs"], cout_p, 0), _pad_to(params["bs"], cout_p, 0)
        # TODO(synk): fold the stride into the shortcut matmul's in-kernel phase
        # read instead of materialising this strided slice in the wrapper.
        xs = x[:, ::stride, ::stride, :]
        sc, ss = _matmul_stats(xs.reshape(m2, cin_p), ws, one_k, zero_k,
                               m_true=m2, fuse_input_bn=False,
                               compute_dtype=compute_dtype)
        scale_s, shift_s = _finalize_bn(ss, m2, gs, bs)
    else:
        sc = x.reshape(m2, cin_p)                       # cin_p == cout_p here
        if sc.shape[0] != m2_pad:
            sc = jnp.pad(sc, ((0, m2_pad - m2), (0, 0)))
        scale_s = jnp.ones((1, cout_p), jnp.float32)
        shift_s = jnp.zeros((1, cout_p), jnp.float32)

    # ---- fused final epilogue: relu(BN3(y3) + shortcut) ----
    out = _bn_add_relu(y3, sc, scale3, shift3, scale_s, shift_s,
                       m_true=m2, project=project)
    out = out[:m2].reshape(n, ho, wo, cout_p)[..., :cout]
    return jnp.transpose(out, (0, 3, 1, 2))             # back to NCHW, f32


# ----------------------------------------------------------------------------
# Pure-JAX reference (training-mode BatchNorm, NCHW convs) for verification
# ----------------------------------------------------------------------------
def _ref_block(x_nchw, params, *, stride):
    def conv(x, w_oihw, s, pad):
        return jax.lax.conv_general_dilated(
            x, w_oihw, (s, s), pad, dimension_numbers=("NCHW", "OIHW", "NCHW"))

    def bn(x, gamma, beta):
        mean = x.mean(axis=(0, 2, 3), keepdims=True)
        var = ((x - mean) ** 2).mean(axis=(0, 2, 3), keepdims=True)
        xh = (x - mean) * jax.lax.rsqrt(var + _EPS)
        return gamma[None, :, None, None] * xh + beta[None, :, None, None]

    w1 = params["w1"].T[:, :, None, None]
    w2 = jnp.transpose(params["w2"], (3, 2, 0, 1))
    w3 = params["w3"].T[:, :, None, None]
    cin, cout = params["w1"].shape[0], params["w3"].shape[1]
    if stride != 1 or cin != cout:
        wsc = params["ws"].T[:, :, None, None]
        sc = bn(conv(x_nchw, wsc, stride, ((0, 0), (0, 0))), params["gs"], params["bs"])
    else:
        sc = x_nchw
    y = jax.nn.relu(bn(conv(x_nchw, w1, 1, ((0, 0), (0, 0))), params["g1"], params["b1"]))
    y = jax.nn.relu(bn(conv(y, w2, stride, ((1, 1), (1, 1))), params["g2"], params["b2"]))
    y = bn(conv(y, w3, 1, ((0, 0), (0, 0))), params["g3"], params["b3"])
    return jax.nn.relu(y + sc)


def _make_params(key, cin, cb, cout, project):
    ks = jax.random.split(key, 12)
    p = {
        "w1": jax.random.normal(ks[0], (cin, cb), jnp.float32) * 0.2,
        "w2": jax.random.normal(ks[1], (3, 3, cb, cb), jnp.float32) * 0.1,
        "w3": jax.random.normal(ks[2], (cb, cout), jnp.float32) * 0.2,
        "g1": 1.0 + 0.1 * jax.random.normal(ks[4], (cb,), jnp.float32),
        "b1": 0.1 * jax.random.normal(ks[5], (cb,), jnp.float32),
        "g2": 1.0 + 0.1 * jax.random.normal(ks[6], (cb,), jnp.float32),
        "b2": 0.1 * jax.random.normal(ks[7], (cb,), jnp.float32),
        "g3": 1.0 + 0.1 * jax.random.normal(ks[8], (cout,), jnp.float32),
        "b3": 0.1 * jax.random.normal(ks[9], (cout,), jnp.float32),
    }
    if project:
        p["ws"] = jax.random.normal(ks[3], (cin, cout), jnp.float32) * 0.2
        p["gs"] = 1.0 + 0.1 * jax.random.normal(ks[10], (cout,), jnp.float32)
        p["bs"] = 0.1 * jax.random.normal(ks[11], (cout,), jnp.float32)
    return p


# ----------------------------------------------------------------------------
if __name__ == "__main__":
    key = jax.random.PRNGKey(0)
    kx, kp1, kp2 = jax.random.split(key, 3)

    # (name, cin, cb, cout, stride, compute dtype, atol, rtol)
    configs = [
        ("f32_stride2_proj", 4, 4, 8, 2, jnp.float32, 2e-3, 2e-3),
        ("bf16_stride2_proj", 4, 4, 8, 2, jnp.bfloat16, 1e-1, 1e-1),
        ("f32_stride1_identity", 8, 4, 8, 1, jnp.float32, 2e-3, 2e-3),
    ]

    for name, cin, cb, cout, stride, cdt, atol, rtol in configs:
        project = (stride != 1) or (cin != cout)
        params = _make_params(kp1 if project else kp2, cin, cb, cout, project)
        x = jax.random.normal(kx, (2, cin, 16, 16), jnp.float32)

        fn = jax.jit(functools.partial(bottleneck_block, stride=stride,
                                       compute_dtype=cdt))
        out = jax.block_until_ready(fn(x, params))
        ref = jax.block_until_ready(_ref_block(x, params, stride=stride))

        assert out.shape == ref.shape, (name, out.shape, ref.shape)
        err = float(jnp.max(jnp.abs(out - ref)))
        assert jnp.allclose(out, ref, atol=atol, rtol=rtol), (name, err)

    print("KERNEL_OK")
</pallas_src>

<mosaic_0001>
module attributes {stable_mosaic.version = 11 : i64} {
  func.func @_bn_relu_pad_kernel(%arg0: i32, %arg1: memref<1x16x16x128xf32, #tpu.memory_space<vmem>>, %arg2: memref<1x128xf32, #tpu.memory_space<vmem>>, %arg3: memref<1x128xf32, #tpu.memory_space<vmem>>, %arg4: memref<1x18x18x128xf32, #tpu.memory_space<vmem>>) attributes {dimension_semantics = [#tpu.dimension_semantics<parallel>], iteration_bounds = array<i64: 2>, scalar_prefetch = 0 : i64, scratch_operands = 0 : i64, tpu.core_type = #tpu.core_type<tc>, window_params = [{transform_indices = @transform_0, window_bounds = array<i64: 1, 16, 16, 128>}, {pipeline_mode = #tpu.pipeline_mode<synchronous>, transform_indices = @transform_1, window_bounds = array<i64: 1, 128>}, {pipeline_mode = #tpu.pipeline_mode<synchronous>, transform_indices = @transform_2, window_bounds = array<i64: 1, 128>}, {transform_indices = @transform_3, window_bounds = array<i64: 1, 18, 18, 128>}]} {
    %cst = arith.constant 0.000000e+00 : f32
    %0 = vector.broadcast %cst : f32 to vector<1x18x18x128xf32>
    %c0 = arith.constant 0 : index
    %c0_0 = arith.constant 0 : index
    %c0_1 = arith.constant 0 : index
    %c0_2 = arith.constant 0 : index
    %1 = vector.load %arg4[%c0, %c0_0, %c0_1, %c0_2] : memref<1x18x18x128xf32, #tpu.memory_space<vmem>>, vector<1x18x18x128xf32>
    tpu.vector_store %arg4[%c0, %c0_0, %c0_1, %c0_2], %0 {strides = array<i32>} : memref<1x18x18x128xf32, #tpu.memory_space<vmem>>, vector<1x18x18x128xf32>,
    %c0_3 = arith.constant 0 : index
    %c0_4 = arith.constant 0 : index
    %c0_5 = arith.constant 0 : index
    %c0_6 = arith.constant 0 : index
    %2 = vector.load %arg1[%c0_3, %c0_4, %c0_5, %c0_6] : memref<1x16x16x128xf32, #tpu.memory_space<vmem>>, vector<1x16x16x128xf32>
    %3 = vector.shape_cast %2 : vector<1x16x16x128xf32> to vector<16x16x128xf32>
    %c0_7 = arith.constant 0 : index
    %c0_8 = arith.constant 0 : index
    %4 = vector.load %arg2[%c0_7, %c0_8] : memref<1x128xf32, #tpu.memory_space<vmem>>, vector<1x128xf32>
    %5 = vector.shape_cast %4 : vector<1x128xf32> to vector<1x1x128xf32>
    %6 = vector.broadcast %5 : vector<1x1x128xf32> to vector<16x16x128xf32>
    %7 = arith.mulf %3, %6 : vector<16x16x128xf32>
    %c0_9 = arith.constant 0 : index
    %c0_10 = arith.constant 0 : index
    %8 = vector.load %arg3[%c0_9, %c0_10] : memref<1x128xf32, #tpu.memory_space<vmem>>, vector<1x128xf32>
    %9 = vector.shape_cast %8 : vector<1x128xf32> to vector<1x1x128xf32>
    %10 = vector.broadcast %9 : vector<1x1x128xf32> to vector<16x16x128xf32>
    %11 = arith.addf %7, %10 : vector<16x16x128xf32>
    %cst_11 = arith.constant 0.000000e+00 : f32
    %12 = vector.broadcast %cst_11 : f32 to vector<16x16x128xf32>
    %13 = arith.maximumf %11, %12 : vector<16x16x128xf32>
    %c0_12 = arith.constant 0 : index
    %c1 = arith.constant 1 : index
    %c1_13 = arith.constant 1 : index
    %c0_14 = arith.constant 0 : index
    %14 = vector.load %arg4[%c0_12, %c1, %c1_13, %c0_14] : memref<1x18x18x128xf32, #tpu.memory_space<vmem>>, vector<1x16x16x128xf32>
    %15 = vector.shape_cast %14 : vector<1x16x16x128xf32> to vector<16x16x128xf32>
    %16 = vector.shape_cast %13 : vector<16x16x128xf32> to vector<1x16x16x128xf32>
    tpu.vector_store %arg4[%c0_12, %c1, %c1_13, %c0_14], %16 {strides = array<i32>} : memref<1x18x18x128xf32, #tpu.memory_space<vmem>>, vector<1x16x16x128xf32>,
    return
  }
  func.func @transform_0(%arg0: i32) -> (i32, i32, i32, i32) {
    %c0_i32 = arith.constant 0 : i32
    %c0_i32_0 = arith.constant 0 : i32
    %c0_i32_1 = arith.constant 0 : i32
    %c0_i32_2 = arith.constant 0 : i32
    return %arg0, %c0_i32, %c0_i32_0, %c0_i32_1 : i32, i32, i32, i32
  }
  func.func @transform_1(%arg0: i32) -> (i32, i32) {
    %c0_i32 = arith.constant 0 : i32
    %c0_i32_0 = arith.constant 0 : i32
    %c0_i32_1 = arith.constant 0 : i32
    return %c0_i32, %c0_i32_0 : i32, i32
  }
  func.func @transform_2(%arg0: i32) -> (i32, i32) {
    %c0_i32 = arith.constant 0 : i32
    %c0_i32_0 = arith.constant 0 : i32
    %c0_i32_1 = arith.constant 0 : i32
    return %c0_i32, %c0_i32_0 : i32, i32
  }
  func.func @transform_3(%arg0: i32) -> (i32, i32, i32, i32) {
    %c0_i32 = arith.constant 0 : i32
    %c0_i32_0 = arith.constant 0 : i32
    %c0_i32_1 = arith.constant 0 : i32
    %c0_i32_2 = arith.constant 0 : i32
    return %arg0, %c0_i32, %c0_i32_0, %c0_i32_1 : i32, i32, i32, i32
  }
}

module attributes {stable_mosaic.version = 11 : i64} {
  func.func @_mm_stats_kernel(%arg0: i32, %arg1: memref<512x128xf32, #tpu.memory_space<vmem>>, %arg2: memref<128x128xf32, #tpu.memory_space<vmem>>, %arg3: memref<1x128xf32, #tpu.memory_space<vmem>>, %arg4: memref<1x128xf32, #tpu.memory_space<vmem>>, %arg5: memref<512x128xf32, #tpu.memory_space<vmem>>, %arg6: memref<1x2x128xf32, #tpu.memory_space<vmem>>) attributes {dimension_semantics = [#tpu.dimension_semantics<parallel>], iteration_bounds = array<i64: 1>, scalar_prefetch = 0 : i64, scratch_operands = 0 : i64, tpu.core_type = #tpu.core_type<tc>, window_params = [{transform_indices = @transform_0, window_bounds = array<i64: 512, 128>}, {pipeline_mode = #tpu.pipeline_mode<synchronous>, transform_indices = @transform_1, window_bounds = array<i64: 128, 128>}, {pipeline_mode = #tpu.pipeline_mode<synchronous>, transform_indices = @transform_2, window_bounds = array<i64: 1, 128>}, {pipeline_mode = #tpu.pipeline_mode<synchronous>, transform_indices = @transform_3, window_bounds = array<i64: 1, 128>}, {transform_indices = @transform_4, window_bounds = array<i64: 512, 128>}, {transform_indices = @transform_5, window_bounds = array<i64: 1, 2, 128>}]} {
    %c0 = arith.constant 0 : index
    %c0_0 = arith.constant 0 : index
    %0 = vector.load %arg1[%c0, %c0_0] : memref<512x128xf32, #tpu.memory_space<vmem>>, vector<512x128xf32>
    %c0_1 = arith.constant 0 : index
    %c0_2 = arith.constant 0 : index
    %1 = vector.load %arg2[%c0_1, %c0_2] : memref<128x128xf32, #tpu.memory_space<vmem>>, vector<128x128xf32>
    %cst = arith.constant dense<0.000000e+00> : vector<512x128xf32>
    %2 = tpu.matmul %0, %1, %cst {dimension_numbers = #tpu.dot_dimension_numbers<[1], [0], [0], [1], [0, 0, 1, 1], [], []>} : vector<512x128xf32>, vector<128x128xf32>, vector<512x128xf32> -> vector<512x128xf32>
    %c0_3 = arith.constant 0 : index
    %c0_4 = arith.constant 0 : index
    %3 = vector.load %arg5[%c0_3, %c0_4] : memref<512x128xf32, #tpu.memory_space<vmem>>, vector<512x128xf32>
    tpu.vector_store %arg5[%c0_3, %c0_4], %2 {strides = array<i32>} : memref<512x128xf32, #tpu.memory_space<vmem>>, vector<512x128xf32>,
    %cst_5 = arith.constant dense<0.000000e+00> : vector<128xf32>
    %4 = vector.multi_reduction <add>, %2, %cst_5 [0] : vector<512x128xf32> to vector<128xf32>
    %5 = vector.shape_cast %4 : vector<128xf32> to vector<1x128xf32>
    %c0_6 = arith.constant 0 : index
    %c0_7 = arith.constant 0 : index
    %c0_8 = arith.constant 0 : index
    %6 = vector.load %arg6[%c0_6, %c0_7, %c0_8] : memref<1x2x128xf32, #tpu.memory_space<vmem>>, vector<1x1x128xf32>
    %7 = vector.shape_cast %6 : vector<1x1x128xf32> to vector<1x128xf32>
    %8 = vector.shape_cast %5 : vector<1x128xf32> to vector<1x1x128xf32>
    tpu.vector_store %arg6[%c0_6, %c0_7, %c0_8], %8 {strides = array<i32>} : memref<1x2x128xf32, #tpu.memory_space<vmem>>, vector<1x1x128xf32>,
    %9 = arith.mulf %2, %2 : vector<512x128xf32>
    %cst_9 = arith.constant dense<0.000000e+00> : vector<128xf32>
    %10 = vector.multi_reduction <add>, %9, %cst_9 [0] : vector<512x128xf32> to vector<128xf32>
    %11 = vector.shape_cast %10 : vector<128xf32> to vector<1x128xf32>
    %c0_10 = arith.constant 0 : index
    %c1 = arith.constant 1 : index
    %c0_11 = arith.constant 0 : index
    %12 = vector.load %arg6[%c0_10, %c1, %c0_11] : memref<1x2x128xf32, #tpu.memory_space<vmem>>, vector<1x1x128xf32>
    %13 = vector.shape_cast %12 : vector<1x1x128xf32> to vector<1x128xf32>
    %14 = vector.shape_cast %11 : vector<1x128xf32> to vector<1x1x128xf32>
    tpu.vector_store %arg6[%c0_10, %c1, %c0_11], %14 {strides = array<i32>} : memref<1x2x128xf32, #tpu.memory_space<vmem>>, vector<1x1x128xf32>,
    return
  }
  func.func @transform_0(%arg0: i32) -> (i32, i32) {
    %c0_i32 = arith.constant 0 : i32
    %c0_i32_0 = arith.constant 0 : i32
    return %arg0, %c0_i32 : i32, i32
  }
  func.func @transform_1(%arg0: i32) -> (i32, i32) {
    %c0_i32 = arith.constant 0 : i32
    %c0_i32_0 = arith.constant 0 : i32
    %c0_i32_1 = arith.constant 0 : i32
    return %c0_i32, %c0_i32_0 : i32, i32
  }
  func.func @transform_2(%arg0: i32) -> (i32, i32) {
    %c0_i32 = arith.constant 0 : i32
    %c0_i32_0 = arith.constant 0 : i32
    %c0_i32_1 = arith.constant 0 : i32
    return %c0_i32, %c0_i32_0 : i32, i32
  }
  func.func @transform_3(%arg0: i32) -> (i32, i32) {
    %c0_i32 = arith.constant 0 : i32
    %c0_i32_0 = arith.constant 0 : i32
    %c0_i32_1 = arith.constant 0 : i32
    return %c0_i32, %c0_i32_0 : i32, i32
  }
  func.func @transform_4(%arg0: i32) -> (i32, i32) {
    %c0_i32 = arith.constant 0 : i32
    %c0_i32_0 = arith.constant 0 : i32
    return %arg0, %c0_i32 : i32, i32
  }
  func.func @transform_5(%arg0: i32) -> (i32, i32, i32) {
    %c0_i32 = arith.constant 0 : i32
    %c0_i32_0 = arith.constant 0 : i32
    %c0_i32_1 = arith.constant 0 : i32
    return %arg0, %c0_i32, %c0_i32_0 : i32, i32, i32
  }
}

module attributes {stable_mosaic.version = 11 : i64} {
  func.func @_conv2_kernel(%arg0: i32, %arg1: memref<1x18x9x256xf32, #tpu.memory_space<vmem>>, %arg2: memref<9x128x128xf32, #tpu.memory_space<vmem>>, %arg3: memref<1x8x8x128xf32, #tpu.memory_space<vmem>>, %arg4: memref<1x2x128xf32, #tpu.memory_space<vmem>>) attributes {dimension_semantics = [#tpu.dimension_semantics<parallel>], iteration_bounds = array<i64: 2>, scalar_prefetch = 0 : i64, scratch_operands = 0 : i64, tpu.core_type = #tpu.core_type<tc>, window_params = [{transform_indices = @transform_0, window_bounds = array<i64: 1, 18, 9, 256>}, {pipeline_mode = #tpu.pipeline_mode<synchronous>, transform_indices = @transform_1, window_bounds = array<i64: 9, 128, 128>}, {transform_indices = @transform_2, window_bounds = array<i64: 1, 8, 8, 128>}, {transform_indices = @transform_3, window_bounds = array<i64: 1, 2, 128>}]} {
    %c0 = arith.constant 0 : index
    %c0_0 = arith.constant 0 : index
    %c0_1 = arith.constant 0 : index
    %c0_2 = arith.constant 0 : index
    %0 = vector.load %arg1[%c0, %c0_0, %c0_1, %c0_2] : memref<1x18x9x256xf32, #tpu.memory_space<vmem>>, vector<1x18x9x256xf32>
    %1 = vector.shape_cast %0 : vector<1x18x9x256xf32> to vector<18x9x256xf32>
    %cst = arith.constant 0.000000e+00 : f32
    %2 = vector.broadcast %cst : f32 to vector<64x128xf32>
    %3 = vector.extract_strided_slice %1 {offsets = [0, 0, 0], sizes = [16, 9, 256], strides = [1, 1, 1]} : vector<18x9x256xf32> to vector<16x9x256xf32>
    %4 = vector.shape_cast %3 : vector<16x9x256xf32> to vector<8x2x9x256xf32>
    %5 = vector.extract_strided_slice %4 {offsets = [0, 0, 0, 0], sizes = [8, 1, 9, 256], strides = [1, 1, 1, 1]} : vector<8x2x9x256xf32> to vector<8x1x9x256xf32>
    %6 = vector.shape_cast %5 : vector<8x1x9x256xf32> to vector<8x9x256xf32>
    %7 = vector.extract_strided_slice %6 {offsets = [0, 0, 0], sizes = [8, 8, 128], strides = [1, 1, 1]} : vector<8x9x256xf32> to vector<8x8x128xf32>
    %8 = vector.shape_cast %7 : vector<8x8x128xf32> to vector<64x128xf32>
    %c0_3 = arith.constant 0 : index
    %c0_4 = arith.constant 0 : index
    %c0_5 = arith.constant 0 : index
    %9 = vector.load %arg2[%c0_3, %c0_4, %c0_5] : memref<9x128x128xf32, #tpu.memory_space<vmem>>, vector<1x128x128xf32>
    %10 = vector.shape_cast %9 : vector<1x128x128xf32> to vector<128x128xf32>
    %cst_6 = arith.constant dense<0.000000e+00> : vector<64x128xf32>
    %11 = tpu.matmul %8, %10, %cst_6 {dimension_numbers = #tpu.dot_dimension_numbers<[1], [0], [0], [1], [0, 0, 1, 1], [], []>} : vector<64x128xf32>, vector<128x128xf32>, vector<64x128xf32> -> vector<64x128xf32>
    %12 = arith.addf %2, %11 : vector<64x128xf32>
    %13 = vector.extract_strided_slice %6 {offsets = [0, 0, 128], sizes = [8, 8, 128], strides = [1, 1, 1]} : vector<8x9x256xf32> to vector<8x8x128xf32>
    %14 = vector.shape_cast %13 : vector<8x8x128xf32> to vector<64x128xf32>
    %c1 = arith.constant 1 : index
    %c0_7 = arith.constant 0 : index
    %c0_8 = arith.constant 0 : index
    %15 = vector.load %arg2[%c1, %c0_7, %c0_8] : memref<9x128x128xf32, #tpu.memory_space<vmem>>, vector<1x128x128xf32>
    %16 = vector.shape_cast %15 : vector<1x128x128xf32> to vector<128x128xf32>
    %cst_9 = arith.constant dense<0.000000e+00> : vector<64x128xf32>
    %17 = tpu.matmul %14, %16, %cst_9 {dimension_numbers = #tpu.dot_dimension_numbers<[1], [0], [0], [1], [0, 0, 1, 1], [], []>} : vector<64x128xf32>, vector<128x128xf32>, vector<64x128xf32> -> vector<64x128xf32>
    %18 = arith.addf %12, %17 : vector<64x128xf32>
    %19 = vector.extract_strided_slice %6 {offsets = [0, 1, 0], sizes = [8, 8, 128], strides = [1, 1, 1]} : vector<8x9x256xf32> to vector<8x8x128xf32>
    %20 = vector.shape_cast %19 : vector<8x8x128xf32> to vector<64x128xf32>
    %c2 = arith.constant 2 : index
    %c0_10 = arith.constant 0 : index
    %c0_11 = arith.constant 0 : index
    %21 = vector.load %arg2[%c2, %c0_10, %c0_11] : memref<9x128x128xf32, #tpu.memory_space<vmem>>, vector<1x128x128xf32>
    %22 = vector.shape_cast %21 : vector<1x128x128xf32> to vector<128x128xf32>
    %cst_12 = arith.constant dense<0.000000e+00> : vector<64x128xf32>
    %23 = tpu.matmul %20, %22, %cst_12 {dimension_numbers = #tpu.dot_dimension_numbers<[1], [0], [0], [1], [0, 0, 1, 1], [], []>} : vector<64x128xf32>, vector<128x128xf32>, vector<64x128xf32> -> vector<64x128xf32>
    %24 = arith.addf %18, %23 : vector<64x128xf32>
    %25 = vector.extract_strided_slice %1 {offsets = [1, 0, 0], sizes = [16, 9, 256], strides = [1, 1, 1]} : vector<18x9x256xf32> to vector<16x9x256xf32>
    %26 = vector.shape_cast %25 : vector<16x9x256xf32> to vector<8x2x9x256xf32>
    %27 = vector.extract_strided_slice %26 {offsets = [0, 0, 0, 0], sizes = [8, 1, 9, 256], strides = [1, 1, 1, 1]} : vector<8x2x9x256xf32> to vector<8x1x9x256xf32>
    %28 = vector.shape_cast %27 : vector<8x1x9x256xf32> to vector<8x9x256xf32>
    %29 = vector.extract_strided_slice %28 {offsets = [0, 0, 0], sizes = [8, 8, 128], strides = [1, 1, 1]} : vector<8x9x256xf32> to vector<8x8x128xf32>
    %30 = vector.shape_cast %29 : vector<8x8x128xf32> to vector<64x128xf32>
    %c3 = arith.constant 3 : index
    %c0_13 = arith.constant 0 : index
    %c0_14 = arith.constant 0 : index
    %31 = vector.load %arg2[%c3, %c0_13, %c0_14] : memref<9x128x128xf32, #tpu.memory_space<vmem>>, vector<1x128x128xf32>
    %32 = vector.shape_cast %31 : vector<1x128x128xf32> to vector<128x128xf32>
    %cst_15 = arith.constant dense<0.000000e+00> : vector<64x128xf32>
    %33 = tpu.matmul %30, %32, %cst_15 {dimension_numbers = #tpu.dot_dimension_numbers<[1], [0], [0], [1], [0, 0, 1, 1], [], []>} : vector<64x128xf32>, vector<128x128xf32>, vector<64x128xf32> -> vector<64x128xf32>
    %34 = arith.addf %24, %33 : vector<64x128xf32>
    %35 = vector.extract_strided_slice %28 {offsets = [0, 0, 128], sizes = [8, 8, 128], strides = [1, 1, 1]} : vector<8x9x256xf32> to vector<8x8x128xf32>
    %36 = vector.shape_cast %35 : vector<8x8x128xf32> to vector<64x128xf32>
    %c4 = arith.constant 4 : index
    %c0_16 = arith.constant 0 : index
    %c0_17 = arith.constant 0 : index
    %37 = vector.load %arg2[%c4, %c0_16, %c0_17] : memref<9x128x128xf32, #tpu.memory_space<vmem>>, vector<1x128x128xf32>
    %38 = vector.shape_cast %37 : vector<1x128x128xf32> to vector<128x128xf32>
    %cst_18 = arith.constant dense<0.000000e+00> : vector<64x128xf32>
    %39 = tpu.matmul %36, %38, %cst_18 {dimension_numbers = #tpu.dot_dimension_numbers<[1], [0], [0], [1], [0, 0, 1, 1], [], []>} : vector<64x128xf32>, vector<128x128xf32>, vector<64x128xf32> -> vector<64x128xf32>
    %40 = arith.addf %34, %39 : vector<64x128xf32>
    %41 = vector.extract_strided_slice %28 {offsets = [0, 1, 0], sizes = [8, 8, 128], strides = [1, 1, 1]} : vector<8x9x256xf32> to vector<8x8x128xf32>
    %42 = vector.shape_cast %41 : vector<8x8x128xf32> to vector<64x128xf32>
    %c5 = arith.constant 5 : index
    %c0_19 = arith.constant 0 : index
    %c0_20 = arith.constant 0 : index
    %43 = vector.load %arg2[%c5, %c0_19, %c0_20] : memref<9x128x128xf32, #tpu.memory_space<vmem>>, vector<1x128x128xf32>
    %44 = vector.shape_cast %43 : vector<1x128x128xf32> to vector<128x128xf32>
    %cst_21 = arith.constant dense<0.000000e+00> : vector<64x128xf32>
    %45 = tpu.matmul %42, %44, %cst_21 {dimension_numbers = #tpu.dot_dimension_numbers<[1], [0], [0], [1], [0, 0, 1, 1], [], []>} : vector<64x128xf32>, vector<128x128xf32>, vector<64x128xf32> -> vector<64x128xf32>
    %46 = arith.addf %40, %45 : vector<64x128xf32>
    %47 = vector.extract_strided_slice %1 {offsets = [2, 0, 0], sizes = [16, 9, 256], strides = [1, 1, 1]} : vector<18x9x256xf32> to vector<16x9x256xf32>
    %48 = vector.shape_cast %47 : vector<16x9x256xf32> to vector<8x2x9x256xf32>
    %49 = vector.extract_strided_slice %48 {offsets = [0, 0, 0, 0], sizes = [8, 1, 9, 256], strides = [1, 1, 1, 1]} : vector<8x2x9x256xf32> to vector<8x1x9x256xf32>
    %50 = vector.shape_cast %49 : vector<8x1x9x256xf32> to vector<8x9x256xf32>
    %51 = vector.extract_strided_slice %50 {offsets = [0, 0, 0], sizes = [8, 8, 128], strides = [1, 1, 1]} : vector<8x9x256xf32> to vector<8x8x128xf32>
    %52 = vector.shape_cast %51 : vector<8x8x128xf32> to vector<64x128xf32>
    %c6 = arith.constant 6 : index
    %c0_22 = arith.constant 0 : index
    %c0_23 = arith.constant 0 : index
    %53 = vector.load %arg2[%c6, %c0_22, %c0_23] : memref<9x128x128xf32, #tpu.memory_space<vmem>>, vector<1x128x128xf32>
    %54 = vector.shape_cast %53 : vector<1x128x128xf32> to vector<128x128xf32>
    %cst_24 = arith.constant dense<0.000000e+00> : vector<64x128xf32>
    %55 = tpu.matmul %52, %54, %cst_24 {dimension_numbers = #tpu.dot_dimension_numbers<[1], [0], [0], [1], [0, 0, 1, 1], [], []>} : vector<64x128xf32>, vector<128x128xf32>, vector<64x128xf32> -> vector<64x128xf32>
    %56 = arith.addf %46, %55 : vector<64x128xf32>
    %57 = vector.extract_strided_slice %50 {offsets = [0, 0, 128], sizes = [8, 8, 128], strides = [1, 1, 1]} : vector<8x9x256xf32> to vector<8x8x128xf32>
    %58 = vector.shape_cast %57 : vector<8x8x128xf32> to vector<64x128xf32>
    %c7 = arith.constant 7 : index
    %c0_25 = arith.constant 0 : index
    %c0_26 = arith.constant 0 : index
    %59 = vector.load %arg2[%c7, %c0_25, %c0_26] : memref<9x128x128xf32, #tpu.memory_space<vmem>>, vector<1x128x128xf32>
    %60 = vector.shape_cast %59 : vector<1x128x128xf32> to vector<128x128xf32>
    %cst_27 = arith.constant dense<0.000000e+00> : vector<64x128xf32>
    %61 = tpu.matmul %58, %60, %cst_27 {dimension_numbers = #tpu.dot_dimension_numbers<[1], [0], [0], [1], [0, 0, 1, 1], [], []>} : vector<64x128xf32>, vector<128x128xf32>, vector<64x128xf32> -> vector<64x128xf32>
    %62 = arith.addf %56, %61 : vector<64x128xf32>
    %63 = vector.extract_strided_slice %50 {offsets = [0, 1, 0], sizes = [8, 8, 128], strides = [1, 1, 1]} : vector<8x9x256xf32> to vector<8x8x128xf32>
    %64 = vector.shape_cast %63 : vector<8x8x128xf32> to vector<64x128xf32>
    %c8 = arith.constant 8 : index
    %c0_28 = arith.constant 0 : index
    %c0_29 = arith.constant 0 : index
    %65 = vector.load %arg2[%c8, %c0_28, %c0_29] : memref<9x128x128xf32, #tpu.memory_space<vmem>>, vector<1x128x128xf32>
    %66 = vector.shape_cast %65 : vector<1x128x128xf32> to vector<128x128xf32>
    %cst_30 = arith.constant dense<0.000000e+00> : vector<64x128xf32>
    %67 = tpu.matmul %64, %66, %cst_30 {dimension_numbers = #tpu.dot_dimension_numbers<[1], [0], [0], [1], [0, 0, 1, 1], [], []>} : vector<64x128xf32>, vector<128x128xf32>, vector<64x128xf32> -> vector<64x128xf32>
    %68 = arith.addf %62, %67 : vector<64x128xf32>
    %69 = vector.shape_cast %68 : vector<64x128xf32> to vector<1x8x8x128xf32>
    %c0_31 = arith.constant 0 : index
    %c0_32 = arith.constant 0 : index
    %c0_33 = arith.constant 0 : index
    %c0_34 = arith.constant 0 : index
    %70 = vector.load %arg3[%c0_31, %c0_32, %c0_33, %c0_34] : memref<1x8x8x128xf32, #tpu.memory_space<vmem>>, vector<1x8x8x128xf32>
    tpu.vector_store %arg3[%c0_31, %c0_32, %c0_33, %c0_34], %69 {strides = array<i32>} : memref<1x8x8x128xf32, #tpu.memory_space<vmem>>, vector<1x8x8x128xf32>,
    %cst_35 = arith.constant dense<0.000000e+00> : vector<128xf32>
    %71 = vector.multi_reduction <add>, %68, %cst_35 [0] : vector<64x128xf32> to vector<128xf32>
    %72 = vector.shape_cast %71 : vector<128xf32> to vector<1x128xf32>
    %c0_36 = arith.constant 0 : index
    %c0_37 = arith.constant 0 : index
    %c0_38 = arith.constant 0 : index
    %73 = vector.load %arg4[%c0_36, %c0_37, %c0_38] : memref<1x2x128xf32, #tpu.memory_space<vmem>>, vector<1x1x128xf32>
    %74 = vector.shape_cast %73 : vector<1x1x128xf32> to vector<1x128xf32>
    %75 = vector.shape_cast %72 : vector<1x128xf32> to vector<1x1x128xf32>
    tpu.vector_store %arg4[%c0_36, %c0_37, %c0_38], %75 {strides = array<i32>} : memref<1x2x128xf32, #tpu.memory_space<vmem>>, vector<1x1x128xf32>,
    %76 = arith.mulf %68, %68 : vector<64x128xf32>
    %cst_39 = arith.constant dense<0.000000e+00> : vector<128xf32>
    %77 = vector.multi_reduction <add>, %76, %cst_39 [0] : vector<64x128xf32> to vector<128xf32>
    %78 = vector.shape_cast %77 : vector<128xf32> to vector<1x128xf32>
    %c0_40 = arith.constant 0 : index
    %c1_41 = arith.constant 1 : index
    %c0_42 = arith.constant 0 : index
    %79 = vector.load %arg4[%c0_40, %c1_41, %c0_42] : memref<1x2x128xf32, #tpu.memory_space<vmem>>, vector<1x1x128xf32>
    %80 = vector.shape_cast %79 : vector<1x1x128xf32> to vector<1x128xf32>
    %81 = vector.shape_cast %78 : vector<1x128xf32> to vector<1x1x128xf32>
    tpu.vector_store %arg4[%c0_40, %c1_41, %c0_42], %81 {strides = array<i32>} : memref<1x2x128xf32, #tpu.memory_space<vmem>>, vector<1x1x128xf32>,
    return
  }
  func.func @transform_0(%arg0: i32) -> (i32, i32, i32, i32) {
    %c0_i32 = arith.constant 0 : i32
    %c0_i32_0 = arith.constant 0 : i32
    %c0_i32_1 = arith.constant 0 : i32
    %c0_i32_2 = arith.constant 0 : i32
    return %arg0, %c0_i32, %c0_i32_0, %c0_i32_1 : i32, i32, i32, i32
  }
  func.func @transform_1(%arg0: i32) -> (i32, i32, i32) {
    %c0_i32 = arith.constant 0 : i32
    %c0_i32_0 = arith.constant 0 : i32
    %c0_i32_1 = arith.constant 0 : i32
    %c0_i32_2 = arith.constant 0 : i32
    return %c0_i32, %c0_i32_0, %c0_i32_1 : i32, i32, i32
  }
  func.func @transform_2(%arg0: i32) -> (i32, i32, i32, i32) {
    %c0_i32 = arith.constant 0 : i32
    %c0_i32_0 = arith.constant 0 : i32
    %c0_i32_1 = arith.constant 0 : i32
    %c0_i32_2 = arith.constant 0 : i32
    return %arg0, %c0_i32, %c0_i32_0, %c0_i32_1 : i32, i32, i32, i32
  }
  func.func @transform_3(%arg0: i32) -> (i32, i32, i32) {
    %c0_i32 = arith.constant 0 : i32
    %c0_i32_0 = arith.constant 0 : i32
    %c0_i32_1 = arith.constant 0 : i32
    return %arg0, %c0_i32, %c0_i32_0 : i32, i32, i32
  }
}

module attributes {stable_mosaic.version = 11 : i64} {
  func.func @_mm_stats_kernel(%arg0: i32, %arg1: memref<128x128xf32, #tpu.memory_space<vmem>>, %arg2: memref<128x128xf32, #tpu.memory_space<vmem>>, %arg3: memref<1x128xf32, #tpu.memory_space<vmem>>, %arg4: memref<1x128xf32, #tpu.memory_space<vmem>>, %arg5: memref<128x128xf32, #tpu.memory_space<vmem>>, %arg6: memref<1x2x128xf32, #tpu.memory_space<vmem>>) attributes {dimension_semantics = [#tpu.dimension_semantics<parallel>], iteration_bounds = array<i64: 1>, scalar_prefetch = 0 : i64, scratch_operands = 0 : i64, tpu.core_type = #tpu.core_type<tc>, window_params = [{transform_indices = @transform_0, window_bounds = array<i64: 128, 128>}, {pipeline_mode = #tpu.pipeline_mode<synchronous>, transform_indices = @transform_1, window_bounds = array<i64: 128, 128>}, {pipeline_mode = #tpu.pipeline_mode<synchronous>, transform_indices = @transform_2, window_bounds = array<i64: 1, 128>}, {pipeline_mode = #tpu.pipeline_mode<synchronous>, transform_indices = @transform_3, window_bounds = array<i64: 1, 128>}, {transform_indices = @transform_4, window_bounds = array<i64: 128, 128>}, {transform_indices = @transform_5, window_bounds = array<i64: 1, 2, 128>}]} {
    %c0 = arith.constant 0 : index
    %c0_0 = arith.constant 0 : index
    %0 = vector.load %arg1[%c0, %c0_0] : memref<128x128xf32, #tpu.memory_space<vmem>>, vector<128x128xf32>
    %c0_1 = arith.constant 0 : index
    %c0_2 = arith.constant 0 : index
    %1 = vector.load %arg3[%c0_1, %c0_2] : memref<1x128xf32, #tpu.memory_space<vmem>>, vector<1x128xf32>
    %2 = vector.broadcast %1 : vector<1x128xf32> to vector<128x128xf32>
    %3 = arith.mulf %0, %2 : vector<128x128xf32>
    %c0_3 = arith.constant 0 : index
    %c0_4 = arith.constant 0 : index
    %4 = vector.load %arg4[%c0_3, %c0_4] : memref<1x128xf32, #tpu.memory_space<vmem>>, vector<1x128xf32>
    %5 = vector.broadcast %4 : vector<1x128xf32> to vector<128x128xf32>
    %6 = arith.addf %3, %5 : vector<128x128xf32>
    %cst = arith.constant 0.000000e+00 : f32
    %7 = vector.broadcast %cst : f32 to vector<128x128xf32>
    %8 = arith.maximumf %6, %7 : vector<128x128xf32>
    %c0_5 = arith.constant 0 : index
    %c0_6 = arith.constant 0 : index
    %9 = vector.load %arg2[%c0_5, %c0_6] : memref<128x128xf32, #tpu.memory_space<vmem>>, vector<128x128xf32>
    %cst_7 = arith.constant dense<0.000000e+00> : vector<128x128xf32>
    %10 = tpu.matmul %8, %9, %cst_7 {dimension_numbers = #tpu.dot_dimension_numbers<[1], [0], [0], [1], [0, 0, 1, 1], [], []>} : vector<128x128xf32>, vector<128x128xf32>, vector<128x128xf32> -> vector<128x128xf32>
    %c0_8 = arith.constant 0 : index
    %c0_9 = arith.constant 0 : index
    %11 = vector.load %arg5[%c0_8, %c0_9] : memref<128x128xf32, #tpu.memory_space<vmem>>, vector<128x128xf32>
    tpu.vector_store %arg5[%c0_8, %c0_9], %10 {strides = array<i32>} : memref<128x128xf32, #tpu.memory_space<vmem>>, vector<128x128xf32>,
    %cst_10 = arith.constant dense<0.000000e+00> : vector<128xf32>
    %12 = vector.multi_reduction <add>, %10, %cst_10 [0] : vector<128x128xf32> to vector<128xf32>
    %13 = vector.shape_cast %12 : vector<128xf32> to vector<1x128xf32>
    %c0_11 = arith.constant 0 : index
    %c0_12 = arith.constant 0 : index
    %c0_13 = arith.constant 0 : index
    %14 = vector.load %arg6[%c0_11, %c0_12, %c0_13] : memref<1x2x128xf32, #tpu.memory_space<vmem>>, vector<1x1x128xf32>
    %15 = vector.shape_cast %14 : vector<1x1x128xf32> to vector<1x128xf32>
    %16 = vector.shape_cast %13 : vector<1x128xf32> to vector<1x1x128xf32>
    tpu.vector_store %arg6[%c0_11, %c0_12, %c0_13], %16 {strides = array<i32>} : memref<1x2x128xf32, #tpu.memory_space<vmem>>, vector<1x1x128xf32>,
    %17 = arith.mulf %10, %10 : vector<128x128xf32>
    %cst_14 = arith.constant dense<0.000000e+00> : vector<128xf32>
    %18 = vector.multi_reduction <add>, %17, %cst_14 [0] : vector<128x128xf32> to vector<128xf32>
    %19 = vector.shape_cast %18 : vector<128xf32> to vector<1x128xf32>
    %c0_15 = arith.constant 0 : index
    %c1 = arith.constant 1 : index
    %c0_16 = arith.constant 0 : index
    %20 = vector.load %arg6[%c0_15, %c1, %c0_16] : memref<1x2x128xf32, #tpu.memory_space<vmem>>, vector<1x1x128xf32>
    %21 = vector.shape_cast %20 : vector<1x1x128xf32> to vector<1x128xf32>
    %22 = vector.shape_cast %19 : vector<1x128xf32> to vector<1x1x128xf32>
    tpu.vector_store %arg6[%c0_15, %c1, %c0_16], %22 {strides = array<i32>} : memref<1x2x128xf32, #tpu.memory_space<vmem>>, vector<1x1x128xf32>,
    return
  }
  func.func @transform_0(%arg0: i32) -> (i32, i32) {
    %c0_i32 = arith.constant 0 : i32
    %c0_i32_0 = arith.constant 0 : i32
    return %arg0, %c0_i32 : i32, i32
  }
  func.func @transform_1(%arg0: i32) -> (i32, i32) {
    %c0_i32 = arith.constant 0 : i32
    %c0_i32_0 = arith.constant 0 : i32
    %c0_i32_1 = arith.constant 0 : i32
    return %c0_i32, %c0_i32_0 : i32, i32
  }
  func.func @transform_2(%arg0: i32) -> (i32, i32) {
    %c0_i32 = arith.constant 0 : i32
    %c0_i32_0 = arith.constant 0 : i32
    %c0_i32_1 = arith.constant 0 : i32
    return %c0_i32, %c0_i32_0 : i32, i32
  }
  func.func @transform_3(%arg0: i32) -> (i32, i32) {
    %c0_i32 = arith.constant 0 : i32
    %c0_i32_0 = arith.constant 0 : i32
    %c0_i32_1 = arith.constant 0 : i32
    return %c0_i32, %c0_i32_0 : i32, i32
  }
  func.func @transform_4(%arg0: i32) -> (i32, i32) {
    %c0_i32 = arith.constant 0 : i32
    %c0_i32_0 = arith.constant 0 : i32
    return %arg0, %c0_i32 : i32, i32
  }
  func.func @transform_5(%arg0: i32) -> (i32, i32, i32) {
    %c0_i32 = arith.constant 0 : i32
    %c0_i32_0 = arith.constant 0 : i32
    %c0_i32_1 = arith.constant 0 : i32
    return %arg0, %c0_i32, %c0_i32_0 : i32, i32, i32
  }
}

module attributes {stable_mosaic.version = 11 : i64} {
  func.func @_mm_stats_kernel(%arg0: i32, %arg1: memref<128x128xf32, #tpu.memory_space<vmem>>, %arg2: memref<128x128xf32, #tpu.memory_space<vmem>>, %arg3: memref<1x128xf32, #tpu.memory_space<vmem>>, %arg4: memref<1x128xf32, #tpu.memory_space<vmem>>, %arg5: memref<128x128xf32, #tpu.memory_space<vmem>>, %arg6: memref<1x2x128xf32, #tpu.memory_space<vmem>>) attributes {dimension_semantics = [#tpu.dimension_semantics<parallel>], iteration_bounds = array<i64: 1>, scalar_prefetch = 0 : i64, scratch_operands = 0 : i64, tpu.core_type = #tpu.core_type<tc>, window_params = [{transform_indices = @transform_0, window_bounds = array<i64: 128, 128>}, {pipeline_mode = #tpu.pipeline_mode<synchronous>, transform_indices = @transform_1, window_bounds = array<i64: 128, 128>}, {pipeline_mode = #tpu.pipeline_mode<synchronous>, transform_indices = @transform_2, window_bounds = array<i64: 1, 128>}, {pipeline_mode = #tpu.pipeline_mode<synchronous>, transform_indices = @transform_3, window_bounds = array<i64: 1, 128>}, {transform_indices = @transform_4, window_bounds = array<i64: 128, 128>}, {transform_indices = @transform_5, window_bounds = array<i64: 1, 2, 128>}]} {
    %c0 = arith.constant 0 : index
    %c0_0 = arith.constant 0 : index
    %0 = vector.load %arg1[%c0, %c0_0] : memref<128x128xf32, #tpu.memory_space<vmem>>, vector<128x128xf32>
    %c0_1 = arith.constant 0 : index
    %c0_2 = arith.constant 0 : index
    %1 = vector.load %arg2[%c0_1, %c0_2] : memref<128x128xf32, #tpu.memory_space<vmem>>, vector<128x128xf32>
    %cst = arith.constant dense<0.000000e+00> : vector<128x128xf32>
    %2 = tpu.matmul %0, %1, %cst {dimension_numbers = #tpu.dot_dimension_numbers<[1], [0], [0], [1], [0, 0, 1, 1], [], []>} : vector<128x128xf32>, vector<128x128xf32>, vector<128x128xf32> -> vector<128x128xf32>
    %c0_3 = arith.constant 0 : index
    %c0_4 = arith.constant 0 : index
    %3 = vector.load %arg5[%c0_3, %c0_4] : memref<128x128xf32, #tpu.memory_space<vmem>>, vector<128x128xf32>
    tpu.vector_store %arg5[%c0_3, %c0_4], %2 {strides = array<i32>} : memref<128x128xf32, #tpu.memory_space<vmem>>, vector<128x128xf32>,
    %cst_5 = arith.constant dense<0.000000e+00> : vector<128xf32>
    %4 = vector.multi_reduction <add>, %2, %cst_5 [0] : vector<128x128xf32> to vector<128xf32>
    %5 = vector.shape_cast %4 : vector<128xf32> to vector<1x128xf32>
    %c0_6 = arith.constant 0 : index
    %c0_7 = arith.constant 0 : index
    %c0_8 = arith.constant 0 : index
    %6 = vector.load %arg6[%c0_6, %c0_7, %c0_8] : memref<1x2x128xf32, #tpu.memory_space<vmem>>, vector<1x1x128xf32>
    %7 = vector.shape_cast %6 : vector<1x1x128xf32> to vector<1x128xf32>
    %8 = vector.shape_cast %5 : vector<1x128xf32> to vector<1x1x128xf32>
    tpu.vector_store %arg6[%c0_6, %c0_7, %c0_8], %8 {strides = array<i32>} : memref<1x2x128xf32, #tpu.memory_space<vmem>>, vector<1x1x128xf32>,
    %9 = arith.mulf %2, %2 : vector<128x128xf32>
    %cst_9 = arith.constant dense<0.000000e+00> : vector<128xf32>
    %10 = vector.multi_reduction <add>, %9, %cst_9 [0] : vector<128x128xf32> to vector<128xf32>
    %11 = vector.shape_cast %10 : vector<128xf32> to vector<1x128xf32>
    %c0_10 = arith.constant 0 : index
    %c1 = arith.constant 1 : index
    %c0_11 = arith.constant 0 : index
    %12 = vector.load %arg6[%c0_10, %c1, %c0_11] : memref<1x2x128xf32, #tpu.memory_space<vmem>>, vector<1x1x128xf32>
    %13 = vector.shape_cast %12 : vector<1x1x128xf32> to vector<1x128xf32>
    %14 = vector.shape_cast %11 : vector<1x128xf32> to vector<1x1x128xf32>
    tpu.vector_store %arg6[%c0_10, %c1, %c0_11], %14 {strides = array<i32>} : memref<1x2x128xf32, #tpu.memory_space<vmem>>, vector<1x1x128xf32>,
    return
  }
  func.func @transform_0(%arg0: i32) -> (i32, i32) {
    %c0_i32 = arith.constant 0 : i32
    %c0_i32_0 = arith.constant 0 : i32
    return %arg0, %c0_i32 : i32, i32
  }
  func.func @transform_1(%arg0: i32) -> (i32, i32) {
    %c0_i32 = arith.constant 0 : i32
    %c0_i32_0 = arith.constant 0 : i32
    %c0_i32_1 = arith.constant 0 : i32
    return %c0_i32, %c0_i32_0 : i32, i32
  }
  func.func @transform_2(%arg0: i32) -> (i32, i32) {
    %c0_i32 = arith.constant 0 : i32
    %c0_i32_0 = arith.constant 0 : i32
    %c0_i32_1 = arith.constant 0 : i32
    return %c0_i32, %c0_i32_0 : i32, i32
  }
  func.func @transform_3(%arg0: i32) -> (i32, i32) {
    %c0_i32 = arith.constant 0 : i32
    %c0_i32_0 = arith.constant 0 : i32
    %c0_i32_1 = arith.constant 0 : i32
    return %c0_i32, %c0_i32_0 : i32, i32
  }
  func.func @transform_4(%arg0: i32) -> (i32, i32) {
    %c0_i32 = arith.constant 0 : i32
    %c0_i32_0 = arith.constant 0 : i32
    return %arg0, %c0_i32 : i32, i32
  }
  func.func @transform_5(%arg0: i32) -> (i32, i32, i32) {
    %c0_i32 = arith.constant 0 : i32
    %c0_i32_0 = arith.constant 0 : i32
    %c0_i32_1 = arith.constant 0 : i32
    return %arg0, %c0_i32, %c0_i32_0 : i32, i32, i32
  }
}

module attributes {stable_mosaic.version = 11 : i64} {
  func.func @_bn_add_relu_kernel(%arg0: i32, %arg1: memref<128x128xf32, #tpu.memory_space<vmem>>, %arg2: memref<128x128xf32, #tpu.memory_space<vmem>>, %arg3: memref<1x128xf32, #tpu.memory_space<vmem>>, %arg4: memref<1x128xf32, #tpu.memory_space<vmem>>, %arg5: memref<1x128xf32, #tpu.memory_space<vmem>>, %arg6: memref<1x128xf32, #tpu.memory_space<vmem>>, %arg7: memref<128x128xf32, #tpu.memory_space<vmem>>) attributes {dimension_semantics = [#tpu.dimension_semantics<parallel>], iteration_bounds = array<i64: 1>, scalar_prefetch = 0 : i64, scratch_operands = 0 : i64, tpu.core_type = #tpu.core_type<tc>, window_params = [{transform_indices = @transform_0, window_bounds = array<i64: 128, 128>}, {transform_indices = @transform_1, window_bounds = array<i64: 128, 128>}, {pipeline_mode = #tpu.pipeline_mode<synchronous>, transform_indices = @transform_2, window_bounds = array<i64: 1, 128>}, {pipeline_mode = #tpu.pipeline_mode<synchronous>, transform_indices = @transform_3, window_bounds = array<i64: 1, 128>}, {pipeline_mode = #tpu.pipeline_mode<synchronous>, transform_indices = @transform_4, window_bounds = array<i64: 1, 128>}, {pipeline_mode = #tpu.pipeline_mode<synchronous>, transform_indices = @transform_5, window_bounds = array<i64: 1, 128>}, {transform_indices = @transform_6, window_bounds = array<i64: 128, 128>}]} {
    %c0 = arith.constant 0 : index
    %c0_0 = arith.constant 0 : index
    %0 = vector.load %arg1[%c0, %c0_0] : memref<128x128xf32, #tpu.memory_space<vmem>>, vector<128x128xf32>
    %c0_1 = arith.constant 0 : index
    %c0_2 = arith.constant 0 : index
    %1 = vector.load %arg3[%c0_1, %c0_2] : memref<1x128xf32, #tpu.memory_space<vmem>>, vector<1x128xf32>
    %2 = vector.broadcast %1 : vector<1x128xf32> to vector<128x128xf32>
    %3 = arith.mulf %0, %2 : vector<128x128xf32>
    %c0_3 = arith.constant 0 : index
    %c0_4 = arith.constant 0 : index
    %4 = vector.load %arg4[%c0_3, %c0_4] : memref<1x128xf32, #tpu.memory_space<vmem>>, vector<1x128xf32>
    %5 = vector.broadcast %4 : vector<1x128xf32> to vector<128x128xf32>
    %6 = arith.addf %3, %5 : vector<128x128xf32>
    %c0_5 = arith.constant 0 : index
    %c0_6 = arith.constant 0 : index
    %7 = vector.load %arg2[%c0_5, %c0_6] : memref<128x128xf32, #tpu.memory_space<vmem>>, vector<128x128xf32>
    %c0_7 = arith.constant 0 : index
    %c0_8 = arith.constant 0 : index
    %8 = vector.load %arg5[%c0_7, %c0_8] : memref<1x128xf32, #tpu.memory_space<vmem>>, vector<1x128xf32>
    %9 = vector.broadcast %8 : vector<1x128xf32> to vector<128x128xf32>
    %10 = arith.mulf %7, %9 : vector<128x128xf32>
    %c0_9 = arith.constant 0 : index
    %c0_10 = arith.constant 0 : index
    %11 = vector.load %arg6[%c0_9, %c0_10] : memref<1x128xf32, #tpu.memory_space<vmem>>, vector<1x128xf32>
    %12 = vector.broadcast %11 : vector<1x128xf32> to vector<128x128xf32>
    %13 = arith.addf %10, %12 : vector<128x128xf32>
    %14 = arith.addf %6, %13 : vector<128x128xf32>
    %cst = arith.constant 0.000000e+00 : f32
    %15 = vector.broadcast %cst : f32 to vector<128x128xf32>
    %16 = arith.maximumf %14, %15 : vector<128x128xf32>
    %c0_11 = arith.constant 0 : index
    %c0_12 = arith.constant 0 : index
    %17 = vector.load %arg7[%c0_11, %c0_12] : memref<128x128xf32, #tpu.memory_space<vmem>>, vector<128x128xf32>
    tpu.vector_store %arg7[%c0_11, %c0_12], %16 {strides = array<i32>} : memref<128x128xf32, #tpu.memory_space<vmem>>, vector<128x128xf32>,
    return
  }
  func.func @transform_0(%arg0: i32) -> (i32, i32) {
    %c0_i32 = arith.constant 0 : i32
    %c0_i32_0 = arith.constant 0 : i32
    return %arg0, %c0_i32 : i32, i32
  }
  func.func @transform_1(%arg0: i32) -> (i32, i32) {
    %c0_i32 = arith.constant 0 : i32
    %c0_i32_0 = arith.constant 0 : i32
    return %arg0, %c0_i32 : i32, i32
  }
  func.func @transform_2(%arg0: i32) -> (i32, i32) {
    %c0_i32 = arith.constant 0 : i32
    %c0_i32_0 = arith.constant 0 : i32
    %c0_i32_1 = arith.constant 0 : i32
    return %c0_i32, %c0_i32_0 : i32, i32
  }
  func.func @transform_3(%arg0: i32) -> (i32, i32) {
    %c0_i32 = arith.constant 0 : i32
    %c0_i32_0 = arith.constant 0 : i32
    %c0_i32_1 = arith.constant 0 : i32
    return %c0_i32, %c0_i32_0 : i32, i32
  }
  func.func @transform_4(%arg0: i32) -> (i32, i32) {
    %c0_i32 = arith.constant 0 : i32
    %c0_i32_0 = arith.constant 0 : i32
    %c0_i32_1 = arith.constant 0 : i32
    return %c0_i32, %c0_i32_0 : i32, i32
  }
  func.func @transform_5(%arg0: i32) -> (i32, i32) {
    %c0_i32 = arith.constant 0 : i32
    %c0_i32_0 = arith.constant 0 : i32
    %c0_i32_1 = arith.constant 0 : i32
    return %c0_i32, %c0_i32_0 : i32, i32
  }
  func.func @transform_6(%arg0: i32) -> (i32, i32) {
    %c0_i32 = arith.constant 0 : i32
    %c0_i32_0 = arith.constant 0 : i32
    return %arg0, %c0_i32 : i32, i32
  }
}

</mosaic_0001>

<bundles_post_ra>
// kernel: bottleneck_block.7
= control target key start
LH: loop header
LB: loop body
LE: loop exit
PB: predicated region body
PF: predicated region fallthrough
CT: control target
= control target key end

     0   :  { %s539_s12 = smov 0   ;;  %s752_s0 = inlined_call_operand.vmem [shape: f32[2,16,16,128], index: 0, kind: input, shape index: {}]   ;;  %s753_s1 = inlined_call_operand.vmem [shape: f32[1,128], index: 1, kind: input, shape index: {}]   ;;  %s754_s2 = inlined_call_operand.vmem [shape: f32[1,128], index: 2, kind: input, shape index: {}]   ;;  %s755_s3 = inlined_call_operand.vmem [shape: f32[2,18,18,128], index: 3, kind: output, shape index: {}]  }
   0x1 LB: > { %s455_s13 = sadd.s32 4294967295, %s516_s12   ;;  %p459_p0 = scmp.ge.s32.totalorder %s516_s12, 1  ;;  %s516_s12 = sphi %s539_s12, %s13_s12  }
   0x2   : > { %p137_p1 = scmp.lt.s32.totalorder %s516_s12, 3 }
   0x4   : > { %p138_p2 = pnand %p459_p0, %p137_p1 }
   0x5   : > { %p161_p3 = scmp.lt.s32.totalorder (!%p138_p2), %s455_s13, 1  ;;  %v550_v0 = vld [vmem:[%s753_s1] ss:$0 sm:$0xff] (!%p138_p2)  ;;  %v518_v5 = vmov (!%p138_p2), 0.0  }
   0x6   : > { %141 = sbr.rel (%p138_p2) target bundleno = 60 (0x3c), region = 32  ;;  %v560_v1 = vld [vmem:[%s754_s2] ss:$0 sm:$0xff] (!%p138_p2) }
   0xd   : > { %s757_s13 = smov (!%p161_p3, %s455_s13), 1 }
   0xe   : > { %s500_s14 = smul.u32 432, %s757_s13  ;;  %s499_s15 = sshll.u32 %s757_s13, 8 }
   0xf   : > { %s555_s20 = scalar_lea.vmem %s752_s0, %s499_s15 }
  0x10   : > { %s565_s25 = scalar_lea.vmem %s755_s3, %s500_s14  ;;  %v225_v2 = vld [vmem:[%s555_s20] sm:$0xff]  ;;  %v226_v3 = vld [vmem:[%s555_s20 + $0x8] sm:$0xff]  ;;  %v227_v4 = vld [vmem:[%s555_s20 + $0x10] sm:$0xff] }
  0x11   : > { %174 = vst [vmem:[%s565_s25 + $0x18] sm:$0xff] %v518_v5  ;;  %171 = vst [vmem:[%s565_s25] sm:$0xff] %v518_v5  ;;  %v264_v6 = vmul.f32 %v550_v0, %v225_v2  ;;  %v265_v7 = vmul.f32 %v550_v0, %v226_v3  ;;  %v266_v8 = vmul.f32 %v550_v0, %v227_v4  ;;  %v228_v9 = vld [vmem:[%s555_s20 + $0x18] sm:$0xff]  ;;  %v229_v10 = vld [vmem:[%s555_s20 + $0x20] sm:$0xff] }
  0x12   : > { %172 = vst [vmem:[%s565_s25 + $0x8] sm:$0xff] %v518_v5  ;;  %173 = vst [vmem:[%s565_s25 + $0x10] sm:$0x3] %v518_v5  ;;  %v230_v11 = vld [vmem:[%s555_s20 + $0x28] sm:$0xff]  ;;  %v267_v12 = vmul.f32 %v550_v0, %v228_v9  ;;  %v268_v13 = vmul.f32 %v550_v0, %v229_v10  ;;  %v231_v15 = vld [vmem:[%s555_s20 + $0x30] sm:$0xff] }
  0x13   : > { %175 = vst [vmem:[%s565_s25 + $0x20] sm:$0xff] %v518_v5  ;;  %176 = vst [vmem:[%s565_s25 + $0x28] sm:$0x3] %v518_v5  ;;  %v269_v14 = vmul.f32 %v550_v0, %v230_v11  ;;  %v232_v16 = vld [vmem:[%s555_s20 + $0x38] sm:$0xff]  ;;  %v303_v17 = vadd.f32 %v560_v1, %v264_v6  ;;  %v304_v18 = vadd.f32 %v560_v1, %v265_v7  ;;  %v233_v25 = vld [vmem:[%s555_s20 + $0x40] sm:$0xff] }
  0x14   : > { %177 = vst [vmem:[%s565_s25 + $0x30] sm:$0xff] %v518_v5  ;;  %178 = vst [vmem:[%s565_s25 + $0x38] sm:$0xff] %v518_v5  ;;  %v305_v19 = vadd.f32 %v560_v1, %v266_v8  ;;  %v270_v20 = vmul.f32 %v550_v0, %v231_v15  ;;  %v306_v21 = vadd.f32 %v560_v1, %v267_v12  ;;  %v234_v26 = vld [vmem:[%s555_s20 + $0x48] sm:$0xff]  ;;  %v235_v27 = vld [vmem:[%s555_s20 + $0x50] sm:$0xff] }
  0x15   : > { %179 = vst [vmem:[%s565_s25 + $0x40] sm:$0x3] %v518_v5  ;;  %180 = vst [vmem:[%s565_s25 + $0x48] sm:$0xff] %v518_v5  ;;  %v307_v22 = vadd.f32 %v560_v1, %v268_v13  ;;  %v308_v23 = vadd.f32 %v560_v1, %v269_v14  ;;  %v271_v24 = vmul.f32 %v550_v0, %v232_v16  ;;  %v335_v28 = vmax.f32 %v303_v17, 0.0  ;;  %v236_v32 = vld [vmem:[%s555_s20 + $0x58] sm:$0xff]  ;;  %v237_v33 = vld [vmem:[%s555_s20 + $0x60] sm:$0xff] }
  0x16   : > { %181 = vst [vmem:[%s565_s25 + $0x50] sm:$0xff] %v518_v5  ;;  %182 = vst [vmem:[%s565_s25 + $0x58] sm:$0x3] %v518_v5  ;;  %v336_v29 = vmax.f32 %v304_v18, 0.0  ;;  %v337_v30 = vmax.f32 %v305_v19, 0.0  ;;  %v309_v31 = vadd.f32 %v560_v1, %v270_v20  ;;  %v238_v34 = vld [vmem:[%s555_s20 + $0x68] sm:$0xff]  ;;  %v272_v41 = vmul.f32 %v550_v0, %v233_v25 }
  0x17   : > { %183 = vst [vmem:[%s565_s25 + $0x60] sm:$0xff] %v518_v5  ;;  %184 = vst [vmem:[%s565_s25 + $0x68] sm:$0xff] %v518_v5  ;;  %v338_v35 = vmax.f32 %v306_v21, 0.0  ;;  %v339_v36 = vmax.f32 %v307_v22, 0.0  ;;  %v340_v37 = vmax.f32 %v308_v23, 0.0  ;;  %v310_v38 = vadd.f32 %v560_v1, %v271_v24  ;;  %v239_v39 = vld [vmem:[%s555_s20 + $0x70] sm:$0xff] }
  0x18   : > { %185 = vst [vmem:[%s565_s25 + $0x70] sm:$0x3] %v518_v5  ;;  %186 = vst [vmem:[%s565_s25 + $0x78] sm:$0xff] %v518_v5  ;;  %v341_v40 = vmax.f32 %v309_v31, 0.0  ;;  %v273_v42 = vmul.f32 %v550_v0, %v234_v26  ;;  %v274_v43 = vmul.f32 %v550_v0, %v235_v27  ;;  %v240_v44 = vld [vmem:[%s555_s20 + $0x78] sm:$0xff]  ;;  %v275_v46 = vmul.f32 %v550_v0, %v236_v32  ;;  %v241_v57 = vld [vmem:[%s555_s20 + $0x80] sm:$0xff] }
  0x19   : > { %187 = vst [vmem:[%s565_s25 + $0x80] sm:$0xff] %v518_v5  ;;  %188 = vst [vmem:[%s565_s25 + $0x88] sm:$0x3] %v518_v5  ;;  %v342_v45 = vmax.f32 %v310_v38, 0.0  ;;  %v276_v47 = vmul.f32 %v550_v0, %v237_v33  ;;  %v277_v48 = vmul.f32 %v550_v0, %v238_v34  ;;  %v311_v49 = vadd.f32 %v560_v1, %v272_v41  ;;  %v242_v58 = vld [vmem:[%s555_s20 + $0x88] sm:$0xff]  ;;  %v243_v59 = vld [vmem:[%s555_s20 + $0x90] sm:$0xff] }
  0x1a   : > { %189 = vst [vmem:[%s565_s25 + $0x90] sm:$0xff] %v518_v5  ;;  %190 = vst [vmem:[%s565_s25 + $0x98] sm:$0xff] %v518_v5  ;;  %v312_v50 = vadd.f32 %v560_v1, %v273_v42  ;;  %v313_v51 = vadd.f32 %v560_v1, %v274_v43  ;;  %v278_v52 = vmul.f32 %v550_v0, %v239_v39  ;;  %v244_v2 = vld [vmem:[%s555_s20 + $0x98] sm:$0xff]  ;;  %v245_v3 = vld [vmem:[%s555_s20 + $0xa0] sm:$0xff] }
  0x1b   : > { %191 = vst [vmem:[%s565_s25 + $0xa0] sm:$0x3] %v518_v5  ;;  %192 = vst [vmem:[%s565_s25 + $0xa8] sm:$0xff] %v518_v5  ;;  %v314_v53 = vadd.f32 %v560_v1, %v275_v46  ;;  %v315_v54 = vadd.f32 %v560_v1, %v276_v47  ;;  %v316_v55 = vadd.f32 %v560_v1, %v277_v48  ;;  %v343_v60 = vmax.f32 %v311_v49, 0.0  ;;  %v246_v4 = vld [vmem:[%s555_s20 + $0xa8] sm:$0xff]  ;;  %v247_v9 = vld [vmem:[%s555_s20 + $0xb0] sm:$0xff] }
  0x1c   : > { %193 = vst [vmem:[%s565_s25 + $0xb0] sm:$0xff] %v518_v5  ;;  %194 = vst [vmem:[%s565_s25 + $0xb8] sm:$0x3] %v518_v5  ;;  %v279_v56 = vmul.f32 %v550_v0, %v240_v44  ;;  %v344_v61 = vmax.f32 %v312_v50, 0.0  ;;  %v345_v62 = vmax.f32 %v313_v51, 0.0  ;;  %v317_v63 = vadd.f32 %v560_v1, %v278_v52  ;;  %v248_v14 = vld [vmem:[%s555_s20 + $0xb8] sm:$0xff] }
  0x1d   : > { %195 = vst [vmem:[%s565_s25 + $0xc0] sm:$0xff] %v518_v5  ;;  %196 = vst [vmem:[%s565_s25 + $0xc8] sm:$0xff] %v518_v5  ;;  %v347_v6 = vmax.f32 %v315_v54, 0.0  ;;  %v348_v7 = vmax.f32 %v316_v55, 0.0  ;;  %v280_v11 = vmul.f32 %v550_v0, %v241_v57  ;;  %v281_v12 = vmul.f32 %v550_v0, %v242_v58  ;;  %v249_v27 = vld [vmem:[%s555_s20 + $0xc0] sm:$0xff]  ;;  %v252_v34 = vld [vmem:[%s555_s20 + $0xd8] sm:$0xff] }
  0x1e   : > { %197 = vst [vmem:[%s565_s25 + $0xd0] sm:$0x3] %v518_v5  ;;  %198 = vst [vmem:[%s565_s25 + $0xd8] sm:$0xff] %v518_v5  ;;  %v318_v8 = vadd.f32 %v560_v1, %v279_v56  ;;  %v349_v10 = vmax.f32 %v317_v63, 0.0  ;;  %v282_v13 = vmul.f32 %v550_v0, %v243_v59  ;;  %v283_v16 = vmul.f32 %v550_v0, %v244_v2  ;;  %v255_v41 = vld [vmem:[%s555_s20 + $0xf0] sm:$0xff]  ;;  %v256_v46 = vld [vmem:[%s555_s20 + $0xf8] sm:$0xff] }
  0x1f   : > { %199 = vst [vmem:[%s565_s25 + $0xe0] sm:$0xff] %v518_v5  ;;  %200 = vst [vmem:[%s565_s25 + $0xe8] sm:$0x3] %v518_v5  ;;  %v284_v17 = vmul.f32 %v550_v0, %v245_v3  ;;  %v285_v18 = vmul.f32 %v550_v0, %v246_v4  ;;  %v319_v19 = vadd.f32 %v560_v1, %v280_v11 }
  0x20   : > { %201 = vst [vmem:[%s565_s25 + $0xf0] sm:$0xff] %v518_v5  ;;  %202 = vst [vmem:[%s565_s25 + $0xf8] sm:$0xff] %v518_v5  ;;  %v350_v15 = vmax.f32 %v318_v8, 0.0  ;;  %v320_v20 = vadd.f32 %v560_v1, %v281_v12  ;;  %v321_v21 = vadd.f32 %v560_v1, %v282_v13  ;;  %v286_v22 = vmul.f32 %v550_v0, %v247_v9 }
  0x21   : > { %203 = vst [vmem:[%s565_s25 + $0x100] sm:$0x3] %v518_v5  ;;  %204 = vst [vmem:[%s565_s25 + $0x108] sm:$0xff] %v518_v5  ;;  %v322_v23 = vadd.f32 %v560_v1, %v283_v16  ;;  %v323_v24 = vadd.f32 %v560_v1, %v284_v17  ;;  %v324_v25 = vadd.f32 %v560_v1, %v285_v18 }
  0x22   : > { %205 = vst [vmem:[%s565_s25 + $0x110] sm:$0xff] %v518_v5  ;;  %206 = vst [vmem:[%s565_s25 + $0x118] sm:$0x3] %v518_v5  ;;  %v287_v26 = vmul.f32 %v550_v0, %v248_v14  ;;  %v352_v31 = vmax.f32 %v320_v20, 0.0  ;;  %v353_v32 = vmax.f32 %v321_v21, 0.0  ;;  %v325_v33 = vadd.f32 %v560_v1, %v286_v22 }
  0x23   : > { %207 = vst [vmem:[%s565_s25 + $0x120] sm:$0xff] %v518_v5  ;;  %208 = vst [vmem:[%s565_s25 + $0x128] sm:$0xff] %v518_v5  ;;  %v355_v38 = vmax.f32 %v323_v24, 0.0  ;;  %v356_v39 = vmax.f32 %v324_v25, 0.0  ;;  %v288_v43 = vmul.f32 %v550_v0, %v249_v27  ;;  %v291_v48 = vmul.f32 %v550_v0, %v252_v34 }
  0x24   : > { %209 = vst [vmem:[%s565_s25 + $0x130] sm:$0x3] %v518_v5  ;;  %210 = vst [vmem:[%s565_s25 + $0x138] sm:$0xff] %v518_v5  ;;  %v357_v42 = vmax.f32 %v325_v33, 0.0  ;;  %v294_v54 = vmul.f32 %v550_v0, %v255_v41  ;;  %v295_v58 = vmul.f32 %v550_v0, %v256_v46 }
  0x25   : > { %211 = vst [vmem:[%s565_s25 + $0x140] sm:$0xff] %v518_v5  ;;  %212 = vst [vmem:[%s565_s25 + $0x148] sm:$0x3] %v518_v5  ;;  %v327_v51 = vadd.f32 %v560_v1, %v288_v43  ;;  %v330_v55 = vadd.f32 %v560_v1, %v291_v48 }
  0x26   : > { %213 = vst [vmem:[%s565_s25 + $0x150] sm:$0xff] %v518_v5  ;;  %214 = vst [vmem:[%s565_s25 + $0x158] sm:$0xff] %v518_v5  ;;  %v334_v4 = vadd.f32 %v560_v1, %v295_v58 }
  0x27   : > { %215 = vst [vmem:[%s565_s25 + $0x160] sm:$0x3] %v518_v5  ;;  %216 = vst [vmem:[%s565_s25 + $0x168] sm:$0xff] %v518_v5  ;;  %v359_v59 = vmax.f32 %v327_v51, 0.0  ;;  %v362_v63 = vmax.f32 %v330_v55, 0.0 }
  0x28   : > { %217 = vst [vmem:[%s565_s25 + $0x170] sm:$0xff] %v518_v5  ;;  %218 = vst [vmem:[%s565_s25 + $0x178] sm:$0x3] %v518_v5 }
  0x29   : > { %219 = vst [vmem:[%s565_s25 + $0x180] sm:$0xff] %v518_v5  ;;  %220 = vst [vmem:[%s565_s25 + $0x188] sm:$0xff] %v518_v5 }
  0x2a   : > { %221 = vst [vmem:[%s565_s25 + $0x190] sm:$0x3] %v518_v5  ;;  %222 = vst [vmem:[%s565_s25 + $0x198] sm:$0xff] %v518_v5 }
  0x2b   : > { %223 = vst [vmem:[%s565_s25 + $0x1a0] sm:$0xff] %v518_v5  ;;  %224 = vst [vmem:[%s565_s25 + $0x1a8] sm:$0x3] %v518_v5  ;;  %v346_v5 = vmax.f32 %v314_v53, 0.0 }
  0x2c   : > { %465 = vst [vmem:[%s565_s25 + $0x19] sm:$0xff] %v335_v28  ;;  %466 = vst [vmem:[%s565_s25 + $0x21] sm:$0xff] %v336_v29  ;;  %v250_v28 = vld [vmem:[%s555_s20 + $0xc8] sm:$0xff]  ;;  %v251_v29 = vld [vmem:[%s555_s20 + $0xd0] sm:$0xff] }
  0x2d   : > { %467 = vst [vmem:[%s565_s25 + $0x31] sm:$0xff] %v337_v30  ;;  %468 = vst [vmem:[%s565_s25 + $0x39] sm:$0xff] %v338_v35  ;;  %v351_v30 = vmax.f32 %v319_v19, 0.0  ;;  %v253_v35 = vld [vmem:[%s555_s20 + $0xe0] sm:$0xff]  ;;  %v289_v44 = vmul.f32 %v550_v0, %v250_v28 }
  0x2e   : > { %469 = vst [vmem:[%s565_s25 + $0x49] sm:$0xff] %v339_v36  ;;  %470 = vst [vmem:[%s565_s25 + $0x51] sm:$0xff] %v340_v37  ;;  %v254_v36 = vld [vmem:[%s555_s20 + $0xe8] sm:$0xff]  ;;  %v354_v37 = vmax.f32 %v322_v23, 0.0  ;;  %v292_v49 = vmul.f32 %v550_v0, %v253_v35 }
  0x2f   : > { %471 = vst [vmem:[%s565_s25 + $0x61] sm:$0xff] %v341_v40  ;;  %472 = vst [vmem:[%s565_s25 + $0x69] sm:$0xff] %v342_v45  ;;  %v326_v40 = vadd.f32 %v560_v1, %v287_v26  ;;  %v290_v45 = vmul.f32 %v550_v0, %v251_v29  ;;  %v293_v50 = vmul.f32 %v550_v0, %v254_v36  ;;  %v366_v0 = vmax.f32 %v334_v4, 0.0 }
  0x30   : > { %473 = vst [vmem:[%s565_s25 + $0x79] sm:$0xff] %v343_v60  ;;  %474 = vst [vmem:[%s565_s25 + $0x81] sm:$0xff] %v344_v61  ;;  %v328_v52 = vadd.f32 %v560_v1, %v289_v44  ;;  %v331_v56 = vadd.f32 %v560_v1, %v292_v49 }
  0x31   : > { %475 = vst [vmem:[%s565_s25 + $0x91] sm:$0xff] %v345_v62  ;;  %476 = vst [vmem:[%s565_s25 + $0x99] sm:$0xff] %v346_v5  ;;  %v358_v47 = vmax.f32 %v326_v40, 0.0  ;;  %v329_v53 = vadd.f32 %v560_v1, %v290_v45  ;;  %v332_v57 = vadd.f32 %v560_v1, %v293_v50  ;;  %v333_v62 = vadd.f32 %v560_v1, %v294_v54 }
  0x32   : > { %477 = vst [vmem:[%s565_s25 + $0xa9] sm:$0xff] %v347_v6  ;;  %478 = vst [vmem:[%s565_s25 + $0xb1] sm:$0xff] %v348_v7  ;;  %v360_v60 = vmax.f32 %v328_v52, 0.0  ;;  %v363_v2 = vmax.f32 %v331_v56, 0.0 }
  0x33   : > { %479 = vst [vmem:[%s565_s25 + $0xc1] sm:$0xff] %v349_v10  ;;  %480 = vst [vmem:[%s565_s25 + $0xc9] sm:$0xff] %v350_v15  ;;  %v361_v61 = vmax.f32 %v329_v53, 0.0  ;;  %v364_v3 = vmax.f32 %v332_v57, 0.0  ;;  %v365_v5 = vmax.f32 %v333_v62, 0.0 }
  0x34   : > { %481 = vst [vmem:[%s565_s25 + $0xd9] sm:$0xff] %v351_v30  ;;  %482 = vst [vmem:[%s565_s25 + $0xe1] sm:$0xff] %v352_v31 }
  0x35   : > { %483 = vst [vmem:[%s565_s25 + $0xf1] sm:$0xff] %v353_v32  ;;  %484 = vst [vmem:[%s565_s25 + $0xf9] sm:$0xff] %v354_v37 }
  0x36   : > { %485 = vst [vmem:[%s565_s25 + $0x109] sm:$0xff] %v355_v38  ;;  %486 = vst [vmem:[%s565_s25 + $0x111] sm:$0xff] %v356_v39 }
  0x37   : > { %487 = vst [vmem:[%s565_s25 + $0x121] sm:$0xff] %v357_v42  ;;  %488 = vst [vmem:[%s565_s25 + $0x129] sm:$0xff] %v358_v47 }
  0x38   : > { %489 = vst [vmem:[%s565_s25 + $0x139] sm:$0xff] %v359_v59  ;;  %490 = vst [vmem:[%s565_s25 + $0x141] sm:$0xff] %v360_v60 }
  0x39   : > { %491 = vst [vmem:[%s565_s25 + $0x151] sm:$0xff] %v361_v61  ;;  %492 = vst [vmem:[%s565_s25 + $0x159] sm:$0xff] %v362_v63 }
  0x3a   : > { %493 = vst [vmem:[%s565_s25 + $0x169] sm:$0xff] %v363_v2  ;;  %494 = vst [vmem:[%s565_s25 + $0x171] sm:$0xff] %v364_v3 }
  0x3b   : > { %495 = vst [vmem:[%s565_s25 + $0x181] sm:$0xff] %v365_v5  ;;  %496 = vst [vmem:[%s565_s25 + $0x189] sm:$0xff] %v366_v0 }
  0x3c PF: > { %s13_s12 = sadd.s32 1, %s516_s12  }
  0x3d   : > { %p10_p4 = scmp.ge.s32.totalorder %s13_s12, 4  }
  0x3f   :  { %12 = sbr.rel (!%p10_p4) target bundleno = 1 (0x1), region = 63 }

// kernel: bottleneck_block.6
= control target key start
LH: loop header
LB: loop body
LE: loop exit
PB: predicated region body
PF: predicated region fallthrough
CT: control target
= control target key end

     0   :  { %s1676_s1 = inlined_call_operand.vmem [shape: f32[128,128], index: 1, kind: input, shape index: {}]   ;;  %s1677_s2 = inlined_call_operand.vmem [shape: f32[1,128], index: 2, kind: input, shape index: {}]   ;;  %s1678_s3 = inlined_call_operand.vmem [shape: f32[1,128], index: 3, kind: input, shape index: {}]   ;;  %s1679_s0 = inlined_call_operand.vmem [shape: f32[512,128], index: 0, kind: input, shape index: {}]   ;;  %s1680_s4 = inlined_call_operand.vmem [shape: f32[512,128], index: 4, kind: output, shape index: {0}]   ;;  %s1681_s5 = inlined_call_operand.vmem [shape: f32[1,2,128], index: 5, kind: output, shape index: {1}]  }
   0x1   :  { %v83_v0 = vld [vmem:[%s1676_s1] sm:$0xff]  ;;  %v84_v1 = vld [vmem:[%s1676_s1 + $0x8] sm:$0xff]  ;;  %v85_v2 = vld [vmem:[%s1676_s1 + $0x10] sm:$0xff] }
   0x2   :  { %v968_v3 = vpack.c.bf16 %v84_v1, %v83_v0  ;;  %v86_v4 = vld [vmem:[%s1676_s1 + $0x18] sm:$0xff]  ;;  %v87_v6 = vld [vmem:[%s1676_s1 + $0x20] sm:$0xff]  ;;  %v88_v7 = vld [vmem:[%s1676_s1 + $0x28] sm:$0xff] }
   0x3   :  { %v972_v5 = vpack.c.bf16 %v86_v4, %v85_v2  ;;  %v976_v8 = vpack.c.bf16 %v88_v7, %v87_v6  ;;  %v19_v9 = vld [vmem:[%s1679_s0] sm:$0xff]  ;;  %v89_v10 = vld [vmem:[%s1676_s1 + $0x30] sm:$0xff]  ;;  %v90_v11 = vld [vmem:[%s1676_s1 + $0x38] sm:$0xff] }
   0x4   :  { %969 = vmatprep.subr.bf16.mxu0 %v968_v3  ;;  %1000 = vmatprep.subr.bf16.mxu1 %v968_v3  ;;  %v980_v12 = vpack.c.bf16 %v90_v11, %v89_v10  ;;  %v91_v13 = vld [vmem:[%s1676_s1 + $0x40] sm:$0xff]  ;;  %v92_v14 = vld [vmem:[%s1676_s1 + $0x48] sm:$0xff]  ;;  %v93_v16 = vld [vmem:[%s1676_s1 + $0x50] sm:$0xff] }
   0x5   :  { %971 = vmatpush3.bf16.msra.mxu0 %v968_v3  ;;  %1008 = vmatpush3.bf16.msra.mxu1 %v968_v3  ;;  %v984_v15 = vpack.c.bf16 %v92_v14, %v91_v13  ;;  %v94_v17 = vld [vmem:[%s1676_s1 + $0x58] sm:$0xff]  ;;  %v51_v18 = vld [vmem:[%s1679_s0 + $0x100] sm:$0xff]  ;;  %v96_v21 = vld [vmem:[%s1676_s1 + $0x68] sm:$0xff] }
   0x6   :  { %973 = vmatprep.subr.bf16.mxu0 %v972_v5  ;;  %1001 = vmatprep.subr.bf16.mxu1 %v972_v5  ;;  %v988_v19 = vpack.c.bf16 %v94_v17, %v93_v16  ;;  %v95_v20 = vld [vmem:[%s1676_s1 + $0x60] sm:$0xff]  ;;  %v97_v23 = vld [vmem:[%s1676_s1 + $0x70] sm:$0xff]  ;;  %v98_v24 = vld [vmem:[%s1676_s1 + $0x78] sm:$0xff] }
   0x7   :  { %872 = vmatprep.mubr.f32.mxu0 %v19_v9  ;;  %920 = vmatprep.mubr.f32.mxu1 %v51_v18  ;;  %v992_v22 = vpack.c.bf16 %v96_v21, %v95_v20  ;;  %v996_v25 = vpack.c.bf16 %v98_v24, %v97_v23  ;;  %v20_v26 = vld [vmem:[%s1679_s0 + $0x8] sm:$0xff]  ;;  %v21_v28 = vld [vmem:[%s1679_s0 + $0x10] sm:$0xff]  ;;  %v22_v30 = vld [vmem:[%s1679_s0 + $0x18] sm:$0xff] }
   0x8   :  { %v52_v27 = vld [vmem:[%s1679_s0 + $0x108] sm:$0xff]  ;;  %v53_v29 = vld [vmem:[%s1679_s0 + $0x110] sm:$0xff]  ;;  %v54_v31 = vld [vmem:[%s1679_s0 + $0x118] sm:$0xff] }
   0x9   :  { %975 = vmatpush3.bf16.msra.mxu0 %v972_v5  ;;  %1009 = vmatpush3.bf16.msra.mxu1 %v972_v5  ;;  %v23_v32 = vld [vmem:[%s1679_s0 + $0x20] sm:$0xff]  ;;  %v24_v34 = vld [vmem:[%s1679_s0 + $0x28] sm:$0xff]  ;;  %v25_v36 = vld [vmem:[%s1679_s0 + $0x30] sm:$0xff] }
   0xa   :  { %977 = vmatprep.subr.bf16.mxu0 %v976_v8  ;;  %1002 = vmatprep.subr.bf16.mxu1 %v976_v8  ;;  %v55_v33 = vld [vmem:[%s1679_s0 + $0x120] sm:$0xff]  ;;  %v56_v35 = vld [vmem:[%s1679_s0 + $0x128] sm:$0xff]  ;;  %v57_v37 = vld [vmem:[%s1679_s0 + $0x130] sm:$0xff] }
   0xb   :  { %v26_v38 = vld [vmem:[%s1679_s0 + $0x38] sm:$0xff]  ;;  %v27_v40 = vld [vmem:[%s1679_s0 + $0x40] sm:$0xff]  ;;  %v28_v42 = vld [vmem:[%s1679_s0 + $0x48] sm:$0xff] }
   0xc   :  { %v58_v39 = vld [vmem:[%s1679_s0 + $0x138] sm:$0xff]  ;;  %v59_v41 = vld [vmem:[%s1679_s0 + $0x140] sm:$0xff]  ;;  %v60_v43 = vld [vmem:[%s1679_s0 + $0x148] sm:$0xff] }
   0xd   :  { %979 = vmatpush3.bf16.msra.mxu0 %v976_v8  ;;  %1010 = vmatpush3.bf16.msra.mxu1 %v976_v8  ;;  %v29_v44 = vld [vmem:[%s1679_s0 + $0x50] sm:$0xff]  ;;  %v30_v46 = vld [vmem:[%s1679_s0 + $0x58] sm:$0xff]  ;;  %v31_v48 = vld [vmem:[%s1679_s0 + $0x60] sm:$0xff] }
   0xe   :  { %981 = vmatprep.subr.bf16.mxu0 %v980_v12  ;;  %1003 = vmatprep.subr.bf16.mxu1 %v980_v12  ;;  %v61_v45 = vld [vmem:[%s1679_s0 + $0x150] sm:$0xff]  ;;  %v62_v47 = vld [vmem:[%s1679_s0 + $0x158] sm:$0xff]  ;;  %v63_v49 = vld [vmem:[%s1679_s0 + $0x160] sm:$0xff] }
   0xf   :  { %v32_v50 = vld [vmem:[%s1679_s0 + $0x68] sm:$0xff]  ;;  %v33_v52 = vld [vmem:[%s1679_s0 + $0x70] sm:$0xff]  ;;  %v34_v54 = vld [vmem:[%s1679_s0 + $0x78] sm:$0xff] }
  0x10   :  { %v64_v51 = vld [vmem:[%s1679_s0 + $0x168] sm:$0xff]  ;;  %v65_v53 = vld [vmem:[%s1679_s0 + $0x170] sm:$0xff]  ;;  %v66_v55 = vld [vmem:[%s1679_s0 + $0x178] sm:$0xff] }
  0x11   :  { %983 = vmatpush3.bf16.msra.mxu0 %v980_v12  ;;  %1011 = vmatpush3.bf16.msra.mxu1 %v980_v12  ;;  %v35_v56 = vld [vmem:[%s1679_s0 + $0x80] sm:$0xff]  ;;  %v36_v58 = vld [vmem:[%s1679_s0 + $0x88] sm:$0xff]  ;;  %v37_v60 = vld [vmem:[%s1679_s0 + $0x90] sm:$0xff] }
  0x12   :  { %985 = vmatprep.subr.bf16.mxu0 %v984_v15  ;;  %1004 = vmatprep.subr.bf16.mxu1 %v984_v15  ;;  %v67_v57 = vld [vmem:[%s1679_s0 + $0x180] sm:$0xff]  ;;  %v68_v59 = vld [vmem:[%s1679_s0 + $0x188] sm:$0xff]  ;;  %v69_v61 = vld [vmem:[%s1679_s0 + $0x190] sm:$0xff] }
  0x13   :  { %v38_v62 = vld [vmem:[%s1679_s0 + $0x98] sm:$0xff]  ;;  %v39_v0 = vld [vmem:[%s1679_s0 + $0xa0] sm:$0xff]  ;;  %v40_v2 = vld [vmem:[%s1679_s0 + $0xa8] sm:$0xff] }
  0x14   :  { %v70_v63 = vld [vmem:[%s1679_s0 + $0x198] sm:$0xff]  ;;  %v71_v1 = vld [vmem:[%s1679_s0 + $0x1a0] sm:$0xff]  ;;  %v72_v3 = vld [vmem:[%s1679_s0 + $0x1a8] sm:$0xff] }
  0x15   :  { %987 = vmatpush3.bf16.msra.mxu0 %v984_v15  ;;  %1012 = vmatpush3.bf16.msra.mxu1 %v984_v15  ;;  %v41_v4 = vld [vmem:[%s1679_s0 + $0xb0] sm:$0xff]  ;;  %v42_v6 = vld [vmem:[%s1679_s0 + $0xb8] sm:$0xff]  ;;  %v43_v8 = vld [vmem:[%s1679_s0 + $0xc0] sm:$0xff] }
  0x16   :  { %989 = vmatprep.subr.bf16.mxu0 %v988_v19  ;;  %1005 = vmatprep.subr.bf16.mxu1 %v988_v19  ;;  %v73_v5 = vld [vmem:[%s1679_s0 + $0x1b0] sm:$0xff]  ;;  %v74_v7 = vld [vmem:[%s1679_s0 + $0x1b8] sm:$0xff]  ;;  %v75_v9 = vld [vmem:[%s1679_s0 + $0x1c0] sm:$0xff] }
  0x17   :  { %v44_v10 = vld [vmem:[%s1679_s0 + $0xc8] sm:$0xff]  ;;  %v45_v12 = vld [vmem:[%s1679_s0 + $0xd0] sm:$0xff]  ;;  %v46_v14 = vld [vmem:[%s1679_s0 + $0xd8] sm:$0xff] }
  0x18   :  { %v76_v11 = vld [vmem:[%s1679_s0 + $0x1c8] sm:$0xff]  ;;  %v77_v13 = vld [vmem:[%s1679_s0 + $0x1d0] sm:$0xff]  ;;  %v78_v15 = vld [vmem:[%s1679_s0 + $0x1d8] sm:$0xff] }
  0x19   :  { %991 = vmatpush3.bf16.msra.mxu0 %v988_v19  ;;  %1013 = vmatpush3.bf16.msra.mxu1 %v988_v19  ;;  %v47_v16 = vld [vmem:[%s1679_s0 + $0xe0] sm:$0xff]  ;;  %v48_v18 = vld [vmem:[%s1679_s0 + $0xe8] sm:$0xff]  ;;  %v49_v20 = vld [vmem:[%s1679_s0 + $0xf0] sm:$0xff] }
  0x1a   :  { %993 = vmatprep.subr.bf16.mxu0 %v992_v22  ;;  %1006 = vmatprep.subr.bf16.mxu1 %v992_v22  ;;  %v79_v17 = vld [vmem:[%s1679_s0 + $0x1e0] sm:$0xff]  ;;  %v80_v19 = vld [vmem:[%s1679_s0 + $0x1e8] sm:$0xff]  ;;  %v81_v21 = vld [vmem:[%s1679_s0 + $0x1f0] sm:$0xff] }
  0x1b   :  { %v82_v23 = vld [vmem:[%s1679_s0 + $0x1f8] sm:$0xff] }
  0x1d   :  { %995 = vmatpush3.bf16.msra.mxu0 %v992_v22  ;;  %1014 = vmatpush3.bf16.msra.mxu1 %v992_v22  ;;  %v50_v22 = vld [vmem:[%s1679_s0 + $0xf8] sm:$0xff] }
  0x1e   :  { %997 = vmatprep.subr.bf16.mxu0 %v996_v25  ;;  %1007 = vmatprep.subr.bf16.mxu1 %v996_v25 }
  0x21   :  { %999 = vmatpush3.bf16.msra.mxu0 %v996_v25  ;;  %1015 = vmatpush3.bf16.msra.mxu1 %v996_v25 }
  0x24   :  { %873 = vmatmul.mubr.f32.vlgmr.msra.gmra.mrb[0].mxu0 %v20_v26  ;;  %921 = vmatmul.mubr.f32.vlgmr.msra.gmra.mrb[0].mxu1 %v52_v27 }
  0x25   :  { %875 = vmatprep.mubr.f32.mxu0 %v21_v28  ;;  %923 = vmatprep.mubr.f32.mxu1 %v53_v29 }
  0x28   :  { %876 = vmatmul.mubr.f32.gmra.mrb[2].mxu0 %v22_v30  ;;  %924 = vmatmul.mubr.f32.gmra.mrb[2].mxu1 %v54_v31 }
  0x29   :  { %878 = vmatprep.mubr.f32.mxu0 %v23_v32  ;;  %926 = vmatprep.mubr.f32.mxu1 %v55_v33 }
  0x2c   :  { %879 = vmatmul.mubr.f32.gmra.mrb[4].mxu0 %v24_v34  ;;  %927 = vmatmul.mubr.f32.gmra.mrb[4].mxu1 %v56_v35 }
  0x2d   :  { %881 = vmatprep.mubr.f32.mxu0 %v25_v36  ;;  %929 = vmatprep.mubr.f32.mxu1 %v57_v37 }
  0x30   :  { %882 = vmatmul.mubr.f32.gmra.mrb[6].mxu0 %v26_v38  ;;  %930 = vmatmul.mubr.f32.gmra.mrb[6].mxu1 %v58_v39 }
  0x31   :  { %884 = vmatprep.mubr.f32.mxu0 %v27_v40  ;;  %932 = vmatprep.mubr.f32.mxu1 %v59_v41 }
  0x34   :  { %885 = vmatmul.mubr.f32.gmra.mrb[8].mxu0 %v28_v42  ;;  %933 = vmatmul.mubr.f32.gmra.mrb[8].mxu1 %v60_v43 }
  0x35   :  { %887 = vmatprep.mubr.f32.mxu0 %v29_v44  ;;  %935 = vmatprep.mubr.f32.mxu1 %v61_v45 }
  0x38   :  { %888 = vmatmul.mubr.f32.gmra.mrb[10].mxu0 %v30_v46  ;;  %936 = vmatmul.mubr.f32.gmra.mrb[10].mxu1 %v62_v47 }
  0x39   :  { %890 = vmatprep.mubr.f32.mxu0 %v31_v48  ;;  %938 = vmatprep.mubr.f32.mxu1 %v63_v49 }
  0x3c   :  { %891 = vmatmul.mubr.f32.gmra.mrb[12].mxu0 %v32_v50  ;;  %939 = vmatmul.mubr.f32.gmra.mrb[12].mxu1 %v64_v51 }
  0x3d   :  { %893 = vmatprep.mubr.f32.mxu0 %v33_v52  ;;  %941 = vmatprep.mubr.f32.mxu1 %v65_v53 }
  0x40   :  { %894 = vmatmul.mubr.f32.gmra.mrb[14].mxu0 %v34_v54  ;;  %942 = vmatmul.mubr.f32.gmra.mrb[14].mxu1 %v66_v55 }
  0x41   :  { %896 = vmatprep.mubr.f32.mxu0 %v35_v56  ;;  %944 = vmatprep.mubr.f32.mxu1 %v67_v57 }
  0x44   :  { %897 = vmatmul.mubr.f32.gmra.mrb[16].mxu0 %v36_v58  ;;  %945 = vmatmul.mubr.f32.gmra.mrb[16].mxu1 %v68_v59 }
  0x45   :  { %899 = vmatprep.mubr.f32.mxu0 %v37_v60  ;;  %947 = vmatprep.mubr.f32.mxu1 %v69_v61 }
  0x48   :  { %900 = vmatmul.mubr.f32.gmra.mrb[18].mxu0 %v38_v62  ;;  %948 = vmatmul.mubr.f32.gmra.mrb[18].mxu1 %v70_v63 }
  0x49   :  { %902 = vmatprep.mubr.f32.mxu0 %v39_v0  ;;  %950 = vmatprep.mubr.f32.mxu1 %v71_v1 }
  0x4c   :  { %903 = vmatmul.mubr.f32.gmra.mrb[20].mxu0 %v40_v2  ;;  %951 = vmatmul.mubr.f32.gmra.mrb[20].mxu1 %v72_v3 }
  0x4d   :  { %905 = vmatprep.mubr.f32.mxu0 %v41_v4  ;;  %953 = vmatprep.mubr.f32.mxu1 %v73_v5 }
  0x50   :  { %906 = vmatmul.mubr.f32.gmra.mrb[22].mxu0 %v42_v6  ;;  %954 = vmatmul.mubr.f32.gmra.mrb[22].mxu1 %v74_v7 }
  0x51   :  { %908 = vmatprep.mubr.f32.mxu0 %v43_v8  ;;  %956 = vmatprep.mubr.f32.mxu1 %v75_v9 }
  0x54   :  { %909 = vmatmul.mubr.f32.gmra.mrb[24].mxu0 %v44_v10  ;;  %957 = vmatmul.mubr.f32.gmra.mrb[24].mxu1 %v76_v11 }
  0x55   :  { %911 = vmatprep.mubr.f32.mxu0 %v45_v12  ;;  %959 = vmatprep.mubr.f32.mxu1 %v77_v13 }
  0x58   :  { %912 = vmatmul.mubr.f32.gmra.mrb[26].mxu0 %v46_v14  ;;  %960 = vmatmul.mubr.f32.gmra.mrb[26].mxu1 %v78_v15 }
  0x59   :  { %914 = vmatprep.mubr.f32.mxu0 %v47_v16  ;;  %962 = vmatprep.mubr.f32.mxu1 %v79_v17 }
  0x5c   :  { %915 = vmatmul.mubr.f32.gmra.mrb[28].mxu0 %v48_v18  ;;  %963 = vmatmul.mubr.f32.gmra.mrb[28].mxu1 %v80_v19 }
  0x5d   :  { %917 = vmatprep.mubr.f32.mxu0 %v49_v20  ;;  %965 = vmatprep.mubr.f32.mxu1 %v81_v21 }
  0x60   :  { %918 = vmatmul.mubr.f32.gmra.mrb[30].mxu0 %v50_v22  ;;  %966 = vmatmul.mubr.f32.gmra.mrb[30].mxu1 %v82_v23 }
  0xf7   :  { %v874_v24 = vpop.f32.mrb[0].mxu0  ;;  %v1286_v25 = vpop.f32.mrb[0].mxu1 }
  0xf8   :  { %485 = vst [vmem:[%s1680_s4 + $0x8] sm:$0xff] %v874_v24  ;;  %v619_v26 = vmul.f32 %v874_v24, %v874_v24  ;;  %v165_v27 = vpop.f32.mrb[1].mxu0  ;;  %517 = vst [vmem:[%s1680_s4 + $0x108] sm:$0xff] %v1286_v25  ;;  %v1295_v28 = vpop.f32.mrb[1].mxu1 }
  0xf9   :  { %484 = vst [vmem:[%s1680_s4] sm:$0xff] %v165_v27  ;;  %v548_v29 = vadd.f32 %v874_v24, %v165_v27  ;;  %v618_v30 = vmul.f32 %v165_v27, %v165_v27  ;;  %516 = vst [vmem:[%s1680_s4 + $0x100] sm:$0xff] %v1295_v28 }
  0xfb   :  { %v682_v31 = vadd.f32 %v619_v26, %v618_v30  ;;  %v877_v32 = vpop.f32.mrb[2].mxu0  ;;  %v1304_v33 = vpop.f32.mrb[2].mxu1 }
  0xfc   :  { %487 = vst [vmem:[%s1680_s4 + $0x18] sm:$0xff] %v877_v32  ;;  %v175_v34 = vpop.f32.mrb[3].mxu0  ;;  %519 = vst [vmem:[%s1680_s4 + $0x118] sm:$0xff] %v1304_v33  ;;  %v1313_v35 = vpop.f32.mrb[3].mxu1  ;;  %v621_v38 = vmul.f32 %v877_v32, %v877_v32 }
  0xfd   :  { %486 = vst [vmem:[%s1680_s4 + $0x10] sm:$0xff] %v175_v34  ;;  %v549_v36 = vadd.f32 %v548_v29, %v175_v34  ;;  %v620_v37 = vmul.f32 %v175_v34, %v175_v34  ;;  %518 = vst [vmem:[%s1680_s4 + $0x110] sm:$0xff] %v1313_v35 }
  0xff   :  { %v683_v39 = vadd.f32 %v682_v31, %v620_v37  ;;  %v880_v40 = vpop.f32.mrb[4].mxu0  ;;  %v550_v41 = vadd.f32 %v877_v32, %v549_v36  ;;  %v1322_v42 = vpop.f32.mrb[4].mxu1 }
 0x100   :  { %489 = vst [vmem:[%s1680_s4 + $0x28] sm:$0xff] %v880_v40  ;;  %v185_v43 = vpop.f32.mrb[5].mxu0  ;;  %521 = vst [vmem:[%s1680_s4 + $0x128] sm:$0xff] %v1322_v42  ;;  %v1331_v44 = vpop.f32.mrb[5].mxu1  ;;  %v623_v48 = vmul.f32 %v880_v40, %v880_v40 }
 0x101   :  { %488 = vst [vmem:[%s1680_s4 + $0x20] sm:$0xff] %v185_v43  ;;  %v551_v45 = vadd.f32 %v550_v41, %v185_v43  ;;  %v622_v46 = vmul.f32 %v185_v43, %v185_v43  ;;  %v684_v47 = vadd.f32 %v683_v39, %v621_v38  ;;  %520 = vst [vmem:[%s1680_s4 + $0x120] sm:$0xff] %v1331_v44 }
 0x103   :  { %v685_v49 = vadd.f32 %v684_v47, %v622_v46  ;;  %v883_v50 = vpop.f32.mrb[6].mxu0  ;;  %v552_v51 = vadd.f32 %v880_v40, %v551_v45  ;;  %v1340_v52 = vpop.f32.mrb[6].mxu1 }
 0x104   :  { %491 = vst [vmem:[%s1680_s4 + $0x38] sm:$0xff] %v883_v50  ;;  %v195_v53 = vpop.f32.mrb[7].mxu0  ;;  %523 = vst [vmem:[%s1680_s4 + $0x138] sm:$0xff] %v1340_v52  ;;  %v1349_v54 = vpop.f32.mrb[7].mxu1  ;;  %v625_v58 = vmul.f32 %v883_v50, %v883_v50 }
 0x105   :  { %490 = vst [vmem:[%s1680_s4 + $0x30] sm:$0xff] %v195_v53  ;;  %v553_v55 = vadd.f32 %v552_v51, %v195_v53  ;;  %v624_v56 = vmul.f32 %v195_v53, %v195_v53  ;;  %v686_v57 = vadd.f32 %v685_v49, %v623_v48  ;;  %522 = vst [vmem:[%s1680_s4 + $0x130] sm:$0xff] %v1349_v54 }
 0x107   :  { %v687_v59 = vadd.f32 %v686_v57, %v624_v56  ;;  %v886_v60 = vpop.f32.mrb[8].mxu0  ;;  %v554_v61 = vadd.f32 %v883_v50, %v553_v55  ;;  %v1358_v62 = vpop.f32.mrb[8].mxu1 }
 0x108   :  { %493 = vst [vmem:[%s1680_s4 + $0x48] sm:$0xff] %v886_v60  ;;  %v205_v63 = vpop.f32.mrb[9].mxu0  ;;  %525 = vst [vmem:[%s1680_s4 + $0x148] sm:$0xff] %v1358_v62  ;;  %v1367_v0 = vpop.f32.mrb[9].mxu1  ;;  %v627_v4 = vmul.f32 %v886_v60, %v886_v60 }
 0x109   :  { %492 = vst [vmem:[%s1680_s4 + $0x40] sm:$0xff] %v205_v63  ;;  %v555_v1 = vadd.f32 %v554_v61, %v205_v63  ;;  %v626_v2 = vmul.f32 %v205_v63, %v205_v63  ;;  %v688_v3 = vadd.f32 %v687_v59, %v625_v58  ;;  %524 = vst [vmem:[%s1680_s4 + $0x140] sm:$0xff] %v1367_v0 }
 0x10b   :  { %v689_v5 = vadd.f32 %v688_v3, %v626_v2  ;;  %v889_v6 = vpop.f32.mrb[10].mxu0  ;;  %v556_v7 = vadd.f32 %v886_v60, %v555_v1  ;;  %v1376_v8 = vpop.f32.mrb[10].mxu1 }
 0x10c   :  { %495 = vst [vmem:[%s1680_s4 + $0x58] sm:$0xff] %v889_v6  ;;  %v215_v9 = vpop.f32.mrb[11].mxu0  ;;  %527 = vst [vmem:[%s1680_s4 + $0x158] sm:$0xff] %v1376_v8  ;;  %v1385_v10 = vpop.f32.mrb[11].mxu1  ;;  %v629_v14 = vmul.f32 %v889_v6, %v889_v6 }
 0x10d   :  { %494 = vst [vmem:[%s1680_s4 + $0x50] sm:$0xff] %v215_v9  ;;  %v557_v11 = vadd.f32 %v556_v7, %v215_v9  ;;  %v628_v12 = vmul.f32 %v215_v9, %v215_v9  ;;  %v690_v13 = vadd.f32 %v689_v5, %v627_v4  ;;  %526 = vst [vmem:[%s1680_s4 + $0x150] sm:$0xff] %v1385_v10 }
 0x10f   :  { %v691_v15 = vadd.f32 %v690_v13, %v628_v12  ;;  %v892_v16 = vpop.f32.mrb[12].mxu0  ;;  %v558_v17 = vadd.f32 %v889_v6, %v557_v11  ;;  %v1394_v18 = vpop.f32.mrb[12].mxu1 }
 0x110   :  { %497 = vst [vmem:[%s1680_s4 + $0x68] sm:$0xff] %v892_v16  ;;  %v225_v19 = vpop.f32.mrb[13].mxu0  ;;  %529 = vst [vmem:[%s1680_s4 + $0x168] sm:$0xff] %v1394_v18  ;;  %v1403_v20 = vpop.f32.mrb[13].mxu1  ;;  %v631_v24 = vmul.f32 %v892_v16, %v892_v16 }
 0x111   :  { %496 = vst [vmem:[%s1680_s4 + $0x60] sm:$0xff] %v225_v19  ;;  %v559_v21 = vadd.f32 %v558_v17, %v225_v19  ;;  %v630_v22 = vmul.f32 %v225_v19, %v225_v19  ;;  %v692_v23 = vadd.f32 %v691_v15, %v629_v14  ;;  %528 = vst [vmem:[%s1680_s4 + $0x160] sm:$0xff] %v1403_v20 }
 0x113   :  { %v693_v26 = vadd.f32 %v692_v23, %v630_v22  ;;  %v895_v27 = vpop.f32.mrb[14].mxu0  ;;  %v560_v29 = vadd.f32 %v892_v16, %v559_v21  ;;  %v1412_v30 = vpop.f32.mrb[14].mxu1 }
 0x114   :  { %499 = vst [vmem:[%s1680_s4 + $0x78] sm:$0xff] %v895_v27  ;;  %v235_v31 = vpop.f32.mrb[15].mxu0  ;;  %531 = vst [vmem:[%s1680_s4 + $0x178] sm:$0xff] %v1412_v30  ;;  %v1421_v32 = vpop.f32.mrb[15].mxu1  ;;  %v633_v38 = vmul.f32 %v895_v27, %v895_v27 }
 0x115   :  { %498 = vst [vmem:[%s1680_s4 + $0x70] sm:$0xff] %v235_v31  ;;  %v561_v34 = vadd.f32 %v560_v29, %v235_v31  ;;  %v632_v36 = vmul.f32 %v235_v31, %v235_v31  ;;  %v694_v37 = vadd.f32 %v693_v26, %v631_v24  ;;  %530 = vst [vmem:[%s1680_s4 + $0x170] sm:$0xff] %v1421_v32 }
 0x117   :  { %v695_v39 = vadd.f32 %v694_v37, %v632_v36  ;;  %v898_v40 = vpop.f32.mrb[16].mxu0  ;;  %v562_v41 = vadd.f32 %v895_v27, %v561_v34  ;;  %v1430_v43 = vpop.f32.mrb[16].mxu1 }
 0x118   :  { %501 = vst [vmem:[%s1680_s4 + $0x88] sm:$0xff] %v898_v40  ;;  %v245_v45 = vpop.f32.mrb[17].mxu0  ;;  %533 = vst [vmem:[%s1680_s4 + $0x188] sm:$0xff] %v1430_v43  ;;  %v1439_v46 = vpop.f32.mrb[17].mxu1  ;;  %v635_v50 = vmul.f32 %v898_v40, %v898_v40 }
 0x119   :  { %500 = vst [vmem:[%s1680_s4 + $0x80] sm:$0xff] %v245_v45  ;;  %v563_v47 = vadd.f32 %v562_v41, %v245_v45  ;;  %v634_v48 = vmul.f32 %v245_v45, %v245_v45  ;;  %v696_v49 = vadd.f32 %v695_v39, %v633_v38  ;;  %532 = vst [vmem:[%s1680_s4 + $0x180] sm:$0xff] %v1439_v46 }
 0x11b   :  { %v697_v51 = vadd.f32 %v696_v49, %v634_v48  ;;  %v901_v53 = vpop.f32.mrb[18].mxu0  ;;  %v564_v55 = vadd.f32 %v898_v40, %v563_v47  ;;  %v1448_v56 = vpop.f32.mrb[18].mxu1 }
 0x11c   :  { %503 = vst [vmem:[%s1680_s4 + $0x98] sm:$0xff] %v901_v53  ;;  %v255_v57 = vpop.f32.mrb[19].mxu0  ;;  %535 = vst [vmem:[%s1680_s4 + $0x198] sm:$0xff] %v1448_v56  ;;  %v1457_v58 = vpop.f32.mrb[19].mxu1  ;;  %v637_v63 = vmul.f32 %v901_v53, %v901_v53 }
 0x11d   :  { %502 = vst [vmem:[%s1680_s4 + $0x90] sm:$0xff] %v255_v57  ;;  %v565_v59 = vadd.f32 %v564_v55, %v255_v57  ;;  %v636_v60 = vmul.f32 %v255_v57, %v255_v57  ;;  %v698_v61 = vadd.f32 %v697_v51, %v635_v50  ;;  %534 = vst [vmem:[%s1680_s4 + $0x190] sm:$0xff] %v1457_v58 }
 0x11f   :  { %v699_v1 = vadd.f32 %v698_v61, %v636_v60  ;;  %v904_v2 = vpop.f32.mrb[20].mxu0  ;;  %v566_v3 = vadd.f32 %v901_v53, %v565_v59  ;;  %v1466_v4 = vpop.f32.mrb[20].mxu1 }
 0x120   :  { %505 = vst [vmem:[%s1680_s4 + $0xa8] sm:$0xff] %v904_v2  ;;  %v265_v5 = vpop.f32.mrb[21].mxu0  ;;  %537 = vst [vmem:[%s1680_s4 + $0x1a8] sm:$0xff] %v1466_v4  ;;  %v1475_v6 = vpop.f32.mrb[21].mxu1  ;;  %v639_v12 = vmul.f32 %v904_v2, %v904_v2 }
 0x121   :  { %504 = vst [vmem:[%s1680_s4 + $0xa0] sm:$0xff] %v265_v5  ;;  %v567_v7 = vadd.f32 %v566_v3, %v265_v5  ;;  %v638_v9 = vmul.f32 %v265_v5, %v265_v5  ;;  %v700_v11 = vadd.f32 %v699_v1, %v637_v63  ;;  %536 = vst [vmem:[%s1680_s4 + $0x1a0] sm:$0xff] %v1475_v6 }
 0x123   :  { %v701_v13 = vadd.f32 %v700_v11, %v638_v9  ;;  %v907_v14 = vpop.f32.mrb[22].mxu0  ;;  %v568_v15 = vadd.f32 %v904_v2, %v567_v7  ;;  %v1484_v16 = vpop.f32.mrb[22].mxu1 }
 0x124   :  { %507 = vst [vmem:[%s1680_s4 + $0xb8] sm:$0xff] %v907_v14  ;;  %v275_v17 = vpop.f32.mrb[23].mxu0  ;;  %539 = vst [vmem:[%s1680_s4 + $0x1b8] sm:$0xff] %v1484_v16  ;;  %v1493_v19 = vpop.f32.mrb[23].mxu1  ;;  %v641_v24 = vmul.f32 %v907_v14, %v907_v14 }
 0x125   :  { %506 = vst [vmem:[%s1680_s4 + $0xb0] sm:$0xff] %v275_v17  ;;  %v569_v21 = vadd.f32 %v568_v15, %v275_v17  ;;  %v640_v22 = vmul.f32 %v275_v17, %v275_v17  ;;  %v702_v23 = vadd.f32 %v701_v13, %v639_v12  ;;  %538 = vst [vmem:[%s1680_s4 + $0x1b0] sm:$0xff] %v1493_v19 }
 0x127   :  { %v703_v26 = vadd.f32 %v702_v23, %v640_v22  ;;  %v910_v27 = vpop.f32.mrb[24].mxu0  ;;  %v570_v29 = vadd.f32 %v907_v14, %v569_v21  ;;  %v1502_v31 = vpop.f32.mrb[24].mxu1 }
 0x128   :  { %509 = vst [vmem:[%s1680_s4 + $0xc8] sm:$0xff] %v910_v27  ;;  %v285_v34 = vpop.f32.mrb[25].mxu0  ;;  %541 = vst [vmem:[%s1680_s4 + $0x1c8] sm:$0xff] %v1502_v31  ;;  %v1511_v36 = vpop.f32.mrb[25].mxu1  ;;  %v643_v40 = vmul.f32 %v910_v27, %v910_v27 }
 0x129   :  { %508 = vst [vmem:[%s1680_s4 + $0xc0] sm:$0xff] %v285_v34  ;;  %v571_v37 = vadd.f32 %v570_v29, %v285_v34  ;;  %v642_v38 = vmul.f32 %v285_v34, %v285_v34  ;;  %v704_v39 = vadd.f32 %v703_v26, %v641_v24  ;;  %540 = vst [vmem:[%s1680_s4 + $0x1c0] sm:$0xff] %v1511_v36 }
 0x12a   :  { %v650_v29 = vmul.f32 %v1295_v28, %v1295_v28 }
 0x12b   :  { %v705_v41 = vadd.f32 %v704_v39, %v642_v38  ;;  %v913_v45 = vpop.f32.mrb[26].mxu0  ;;  %v572_v47 = vadd.f32 %v910_v27, %v571_v37  ;;  %v1520_v48 = vpop.f32.mrb[26].mxu1  ;;  %v651_v38 = vmul.f32 %v1286_v25, %v1286_v25 }
 0x12c   :  { %511 = vst [vmem:[%s1680_s4 + $0xd8] sm:$0xff] %v913_v45  ;;  %v295_v49 = vpop.f32.mrb[27].mxu0  ;;  %543 = vst [vmem:[%s1680_s4 + $0x1d8] sm:$0xff] %v1520_v48  ;;  %v1529_v50 = vpop.f32.mrb[27].mxu1  ;;  %v645_v57 = vmul.f32 %v913_v45, %v913_v45 }
 0x12d   :  { %510 = vst [vmem:[%s1680_s4 + $0xd0] sm:$0xff] %v295_v49  ;;  %v573_v51 = vadd.f32 %v572_v47, %v295_v49  ;;  %v644_v53 = vmul.f32 %v295_v49, %v295_v49  ;;  %v706_v55 = vadd.f32 %v705_v41, %v643_v40  ;;  %542 = vst [vmem:[%s1680_s4 + $0x1d0] sm:$0xff] %v1529_v50 }
 0x12e   :  { %v652_v41 = vmul.f32 %v1313_v35, %v1313_v35  ;;  %v653_v49 = vmul.f32 %v1304_v33, %v1304_v33 }
 0x12f   :  { %v707_v59 = vadd.f32 %v706_v55, %v644_v53  ;;  %v916_v60 = vpop.f32.mrb[28].mxu0  ;;  %v574_v61 = vadd.f32 %v913_v45, %v573_v51  ;;  %v1538_v63 = vpop.f32.mrb[28].mxu1 }
 0x130   :  { %513 = vst [vmem:[%s1680_s4 + $0xe8] sm:$0xff] %v916_v60  ;;  %v305_v1 = vpop.f32.mrb[29].mxu0  ;;  %545 = vst [vmem:[%s1680_s4 + $0x1e8] sm:$0xff] %v1538_v63  ;;  %v1547_v2 = vpop.f32.mrb[29].mxu1  ;;  %v647_v9 = vmul.f32 %v916_v60, %v916_v60 }
 0x131   :  { %512 = vst [vmem:[%s1680_s4 + $0xe0] sm:$0xff] %v305_v1  ;;  %v575_v3 = vadd.f32 %v574_v61, %v305_v1  ;;  %v646_v5 = vmul.f32 %v305_v1, %v305_v1  ;;  %v708_v7 = vadd.f32 %v707_v59, %v645_v57  ;;  %544 = vst [vmem:[%s1680_s4 + $0x1e0] sm:$0xff] %v1547_v2 }
 0x133   :  { %v709_v11 = vadd.f32 %v708_v7, %v646_v5  ;;  %v919_v12 = vpop.f32.mrb[30].mxu0  ;;  %v576_v13 = vadd.f32 %v916_v60, %v575_v3  ;;  %v1556_v14 = vpop.f32.mrb[30].mxu1 }
 0x134   :  { %515 = vst [vmem:[%s1680_s4 + $0xf8] sm:$0xff] %v919_v12  ;;  %v315_v15 = vpop.f32.mrb[31].mxu0  ;;  %547 = vst [vmem:[%s1680_s4 + $0x1f8] sm:$0xff] %v1556_v14  ;;  %v1565_v17 = vpop.f32.mrb[31].mxu1  ;;  %v649_v24 = vmul.f32 %v919_v12, %v919_v12 }
 0x135   :  { %514 = vst [vmem:[%s1680_s4 + $0xf0] sm:$0xff] %v315_v15  ;;  %v577_v21 = vadd.f32 %v576_v13, %v315_v15  ;;  %v648_v22 = vmul.f32 %v315_v15, %v315_v15  ;;  %v710_v23 = vadd.f32 %v709_v11, %v647_v9  ;;  %546 = vst [vmem:[%s1680_s4 + $0x1f0] sm:$0xff] %v1565_v17 }
 0x137   :  { %v578_v26 = vadd.f32 %v919_v12, %v577_v21  ;;  %v711_v27 = vadd.f32 %v710_v23, %v648_v22 }
 0x139   :  { %v712_v34 = vadd.f32 %v711_v27, %v649_v24  ;;  %v579_v37 = vadd.f32 %v578_v26, %v1295_v28  ;;  %v654_v28 = vmul.f32 %v1331_v44, %v1331_v44 }
 0x13b   :  { %v713_v39 = vadd.f32 %v712_v34, %v650_v29  ;;  %v580_v40 = vadd.f32 %v1286_v25, %v579_v37  ;;  %v655_v25 = vmul.f32 %v1322_v42, %v1322_v42 }
 0x13d   :  { %v581_v45 = vadd.f32 %v580_v40, %v1313_v35  ;;  %v714_v47 = vadd.f32 %v713_v39, %v651_v38  ;;  %v656_v35 = vmul.f32 %v1349_v54, %v1349_v54 }
 0x13f   :  { %v715_v51 = vadd.f32 %v714_v47, %v652_v41  ;;  %v582_v53 = vadd.f32 %v1304_v33, %v581_v45  ;;  %v657_v33 = vmul.f32 %v1340_v52, %v1340_v52 }
 0x141   :  { %v583_v55 = vadd.f32 %v582_v53, %v1331_v44  ;;  %v716_v57 = vadd.f32 %v715_v51, %v653_v49  ;;  %v658_v44 = vmul.f32 %v1367_v0, %v1367_v0 }
 0x143   :  { %v717_v59 = vadd.f32 %v716_v57, %v654_v28  ;;  %v584_v60 = vadd.f32 %v1322_v42, %v583_v55  ;;  %v659_v42 = vmul.f32 %v1358_v62, %v1358_v62 }
 0x145   :  { %v585_v61 = vadd.f32 %v584_v60, %v1349_v54  ;;  %v718_v1 = vadd.f32 %v717_v59, %v655_v25  ;;  %v660_v54 = vmul.f32 %v1385_v10, %v1385_v10 }
 0x147   :  { %v719_v3 = vadd.f32 %v718_v1, %v656_v35  ;;  %v586_v5 = vadd.f32 %v1340_v52, %v585_v61  ;;  %v661_v52 = vmul.f32 %v1376_v8, %v1376_v8 }
 0x149   :  { %v587_v7 = vadd.f32 %v586_v5, %v1367_v0  ;;  %v720_v9 = vadd.f32 %v719_v3, %v657_v33  ;;  %v662_v0 = vmul.f32 %v1403_v20, %v1403_v20 }
 0x14b   :  { %v721_v11 = vadd.f32 %v720_v9, %v658_v44  ;;  %v588_v12 = vadd.f32 %v1358_v62, %v587_v7  ;;  %v663_v62 = vmul.f32 %v1394_v18, %v1394_v18 }
 0x14d   :  { %v589_v13 = vadd.f32 %v588_v12, %v1385_v10  ;;  %v722_v15 = vadd.f32 %v721_v11, %v659_v42  ;;  %v664_v10 = vmul.f32 %v1421_v32, %v1421_v32 }
 0x14f   :  { %v723_v21 = vadd.f32 %v722_v15, %v660_v54  ;;  %v590_v22 = vadd.f32 %v1376_v8, %v589_v13  ;;  %v665_v8 = vmul.f32 %v1412_v30, %v1412_v30 }
 0x151   :  { %v591_v23 = vadd.f32 %v590_v22, %v1403_v20  ;;  %v724_v24 = vadd.f32 %v723_v21, %v661_v52  ;;  %v666_v20 = vmul.f32 %v1439_v46, %v1439_v46 }
 0x153   :  { %v725_v26 = vadd.f32 %v724_v24, %v662_v0  ;;  %v592_v27 = vadd.f32 %v1394_v18, %v591_v23  ;;  %v667_v18 = vmul.f32 %v1430_v43, %v1430_v43 }
 0x155   :  { %v593_v29 = vadd.f32 %v592_v27, %v1421_v32  ;;  %v726_v34 = vadd.f32 %v725_v26, %v663_v62  ;;  %v668_v32 = vmul.f32 %v1457_v58, %v1457_v58 }
 0x157   :  { %v727_v37 = vadd.f32 %v726_v34, %v664_v10  ;;  %v594_v38 = vadd.f32 %v1412_v30, %v593_v29  ;;  %v669_v30 = vmul.f32 %v1448_v56, %v1448_v56 }
 0x159   :  { %v595_v39 = vadd.f32 %v594_v38, %v1439_v46  ;;  %v728_v40 = vadd.f32 %v727_v37, %v665_v8  ;;  %v670_v46 = vmul.f32 %v1475_v6, %v1475_v6 }
 0x15b   :  { %v729_v41 = vadd.f32 %v728_v40, %v666_v20  ;;  %v596_v45 = vadd.f32 %v1430_v43, %v595_v39  ;;  %v671_v43 = vmul.f32 %v1466_v4, %v1466_v4 }
 0x15d   :  { %v597_v47 = vadd.f32 %v596_v45, %v1457_v58  ;;  %v730_v49 = vadd.f32 %v729_v41, %v667_v18  ;;  %v672_v58 = vmul.f32 %v1493_v19, %v1493_v19 }
 0x15f   :  { %v731_v51 = vadd.f32 %v730_v49, %v668_v32  ;;  %v598_v53 = vadd.f32 %v1448_v56, %v597_v47  ;;  %v673_v56 = vmul.f32 %v1484_v16, %v1484_v16 }
 0x161   :  { %v599_v28 = vadd.f32 %v598_v53, %v1475_v6  ;;  %v732_v55 = vadd.f32 %v731_v51, %v669_v30  ;;  %v674_v6 = vmul.f32 %v1511_v36, %v1511_v36 }
 0x163   :  { %v733_v57 = vadd.f32 %v732_v55, %v670_v46  ;;  %v600_v25 = vadd.f32 %v1466_v4, %v599_v28  ;;  %v675_v4 = vmul.f32 %v1502_v31, %v1502_v31 }
 0x165   :  { %v601_v59 = vadd.f32 %v600_v25, %v1493_v19  ;;  %v734_v60 = vadd.f32 %v733_v57, %v671_v43  ;;  %v676_v19 = vmul.f32 %v1529_v50, %v1529_v50 }
 0x167   :  { %v735_v35 = vadd.f32 %v734_v60, %v672_v58  ;;  %v602_v61 = vadd.f32 %v1484_v16, %v601_v59  ;;  %v677_v16 = vmul.f32 %v1520_v48, %v1520_v48 }
 0x169   :  { %v603_v1 = vadd.f32 %v602_v61, %v1511_v36  ;;  %v736_v33 = vadd.f32 %v735_v35, %v673_v56  ;;  %v678_v36 = vmul.f32 %v1547_v2, %v1547_v2 }
 0x16b   :  { %v737_v3 = vadd.f32 %v736_v33, %v674_v6  ;;  %v604_v5 = vadd.f32 %v1502_v31, %v603_v1  ;;  %v679_v31 = vmul.f32 %v1538_v63, %v1538_v63 }
 0x16d   :  { %v605_v44 = vadd.f32 %v604_v5, %v1529_v50  ;;  %v738_v7 = vadd.f32 %v737_v3, %v675_v4  ;;  %v680_v50 = vmul.f32 %v1565_v17, %v1565_v17 }
 0x16f   :  { %v739_v9 = vadd.f32 %v738_v7, %v676_v19  ;;  %v606_v42 = vadd.f32 %v1520_v48, %v605_v44  ;;  %v681_v48 = vmul.f32 %v1556_v14, %v1556_v14 }
 0x171   :  { %v607_v11 = vadd.f32 %v606_v42, %v1547_v2  ;;  %v740_v12 = vadd.f32 %v739_v9, %v677_v16 }
 0x173   :  { %v741_v54 = vadd.f32 %v740_v12, %v678_v36  ;;  %v608_v13 = vadd.f32 %v1538_v63, %v607_v11 }
 0x175   :  { %v609_v15 = vadd.f32 %v608_v13, %v1565_v17  ;;  %v742_v52 = vadd.f32 %v741_v54, %v679_v31 }
 0x177   :  { %v610_v21 = vadd.f32 %v1556_v14, %v609_v15  ;;  %v743_v22 = vadd.f32 %v742_v52, %v680_v50 }
 0x179   :  { %v611_v2 = vrot.slane %v610_v21, 4  ;;  %v744_v0 = vadd.f32 %v743_v22, %v681_v48 }
 0x17b   :  { %v612_v23 = vadd.f32 %v611_v2, %v610_v21  ;;  %v745_v24 = vrot.slane %v744_v0, 4 }
 0x17d   :  { %v613_v62 = vrot.slane %v612_v23, 2  ;;  %v746_v26 = vadd.f32 %v745_v24, %v744_v0 }
 0x17f   :  { %v614_v27 = vadd.f32 %v613_v62, %v612_v23  ;;  %v747_v63 = vrot.slane %v746_v26, 2 }
 0x181   :  { %v615_v10 = vrot.slane %v614_v27, 1  ;;  %v748_v29 = vadd.f32 %v747_v63, %v746_v26 }
 0x183   :  { %v616_v34 = vadd.f32 %v615_v10, %v614_v27  ;;  %v749_v8 = vrot.slane %v748_v29, 1 }
 0x185   :  { %617 = vst [vmem:[%s1681_s5] sm:$0x1] %v616_v34  ;;  %v750_v17 = vadd.f32 %v749_v8, %v748_v29 }
 0x187   :  { %751 = vst [vmem:[%s1681_s5 + $0x1] sm:$0x1] %v750_v17 }

// kernel: bottleneck_block.8
= control target key start
LH: loop header
LB: loop body
LE: loop exit
PB: predicated region body
PF: predicated region fallthrough
CT: control target
= control target key end

     0   :  { %s2776_s12 = smov 0   ;;  %s3437_s0 = inlined_call_operand.vmem [shape: f32[2,18,9,256], index: 0, kind: input, shape index: {}]   ;;  %s3438_s1 = inlined_call_operand.vmem [shape: f32[9,128,128], index: 1, kind: input, shape index: {}]   ;;  %s3439_s2 = inlined_call_operand.vmem [shape: f32[2,8,8,128], index: 2, kind: output, shape index: {0}]   ;;  %s3440_s3 = inlined_call_operand.vmem [shape: f32[2,2,128], index: 3, kind: output, shape index: {1}]  }
   0x1 LB: > { %s1619_s13 = sadd.s32 4294967295, %s2754_s12   ;;  %p1623_p0 = scmp.ge.s32.totalorder %s2754_s12, 1  ;;  %s2754_s12 = sphi %s2776_s12, %s14_s12  }
   0x2   : > { %p140_p1 = scmp.lt.s32.totalorder %s2754_s12, 3 }
   0x4   : > { %p141_p2 = pnand %p1623_p0, %p140_p1 }
   0x5   : > { %v1628_v0 = vld [vmem:[%s3438_s1 + $0x80] sm:$0xff] (!%p141_p2)  ;;  %v1629_v1 = vld [vmem:[%s3438_s1 + $0x88] sm:$0xff] (!%p141_p2)  ;;  %p168_p3 = scmp.lt.s32.totalorder (!%p141_p2), %s1619_s13, 1  ;;  %v1630_v5 = vld [vmem:[%s3438_s1 + $0x90] sm:$0xff] (!%p141_p2)  ;;  %vm492_vm0 = vcmask (!%p141_p2), 1046528  }
   0x6   : > { %144 = sbr.rel (%p141_p2) target bundleno = 415 (0x19f), region = 28  ;;  %v1676_v2 = vld [vmem:[%s3438_s1 + $0x200] sm:$0xff] (!%p141_p2)  ;;  %v2371_v3 = vpack.c.bf16 (!%p141_p2), %v1629_v1, %v1628_v0  ;;  %v1677_v4 = vld [vmem:[%s3438_s1 + $0x208] sm:$0xff] (!%p141_p2)  ;;  %v1631_v6 = vld [vmem:[%s3438_s1 + $0x98] sm:$0xff] (!%p141_p2) }
   0x7   : > { %v2499_v7 = vpack.c.bf16 (!%p141_p2), %v1677_v4, %v1676_v2  ;;  %v2375_v8 = vpack.c.bf16 (!%p141_p2), %v1631_v6, %v1630_v5  ;;  %v1678_v9 = vld [vmem:[%s3438_s1 + $0x210] sm:$0xff] (!%p141_p2)  ;;  %v1679_v10 = vld [vmem:[%s3438_s1 + $0x218] sm:$0xff] (!%p141_p2)  ;;  %v1632_v11 = vld [vmem:[%s3438_s1 + $0xa0] sm:$0xff] (!%p141_p2) }
   0x8   : > { %2372 = vmatprep.subr.bf16.mxu1 (!%p141_p2), %v2371_v3  ;;  %v2503_v12 = vpack.c.bf16 (!%p141_p2), %v1679_v10, %v1678_v9  ;;  %v1633_v13 = vld [vmem:[%s3438_s1 + $0xa8] sm:$0xff] (!%p141_p2)  ;;  %v1680_v14 = vld [vmem:[%s3438_s1 + $0x220] sm:$0xff] (!%p141_p2)  ;;  %v1634_v18 = vld [vmem:[%s3438_s1 + $0xb0] sm:$0xff] (!%p141_p2) }
   0x9   : > { %v1681_v15 = vld [vmem:[%s3438_s1 + $0x228] sm:$0xff] (!%p141_p2)  ;;  %2500 = vmatprep.subr.bf16.mxu0 (!%p141_p2), %v2499_v7  ;;  %2374 = vmatpush3.bf16.msra.mxu1 (!%p141_p2), %v2371_v3  ;;  %v2379_v16 = vpack.c.bf16 (!%p141_p2), %v1633_v13, %v1632_v11  ;;  %v1635_v19 = vld [vmem:[%s3438_s1 + $0xb8] sm:$0xff] (!%p141_p2)  ;;  %v1682_v20 = vld [vmem:[%s3438_s1 + $0x230] sm:$0xff] (!%p141_p2) }
   0xa   : > { %2502 = vmatpush3.bf16.msra.mxu0 (!%p141_p2), %v2499_v7  ;;  %2376 = vmatprep.subr.bf16.mxu1 (!%p141_p2), %v2375_v8  ;;  %v2507_v17 = vpack.c.bf16 (!%p141_p2), %v1681_v15, %v1680_v14  ;;  %v1683_v21 = vld [vmem:[%s3438_s1 + $0x238] sm:$0xff] (!%p141_p2)  ;;  %v2383_v22 = vpack.c.bf16 (!%p141_p2), %v1635_v19, %v1634_v18  ;;  %v1636_v24 = vld [vmem:[%s3438_s1 + $0xc0] sm:$0xff] (!%p141_p2)  ;;  %v1637_v25 = vld [vmem:[%s3438_s1 + $0xc8] sm:$0xff] (!%p141_p2) }
   0xb   : > { %2504 = vmatprep.subr.bf16.mxu0 (!%p141_p2), %v2503_v12  ;;  %v2511_v23 = vpack.c.bf16 (!%p141_p2), %v1683_v21, %v1682_v20  ;;  %v1684_v27 = vld [vmem:[%s3438_s1 + $0x240] sm:$0xff] (!%p141_p2)  ;;  %v1685_v28 = vld [vmem:[%s3438_s1 + $0x248] sm:$0xff] (!%p141_p2)  ;;  %v2387_v30 = vpack.c.bf16 (!%p141_p2), %v1637_v25, %v1636_v24  ;;  %v1638_v32 = vld [vmem:[%s3438_s1 + $0xd0] sm:$0xff] (!%p141_p2) }
   0xc   : > { %v2515_v31 = vpack.c.bf16 (!%p141_p2), %v1685_v28, %v1684_v27  ;;  %v1639_v33 = vld [vmem:[%s3438_s1 + $0xd8] sm:$0xff] (!%p141_p2)  ;;  %v1686_v34 = vld [vmem:[%s3438_s1 + $0x250] sm:$0xff] (!%p141_p2)  ;;  %v1640_v38 = vld [vmem:[%s3438_s1 + $0xe0] sm:$0xff] (!%p141_p2) }
   0xd   : > { %s3442_s13 = smov (!%p168_p3, %s1619_s13), 1  ;;  %2378 = vmatpush3.bf16.msra.mxu1 %v2375_v8  ;;  %v1687_v35 = vld [vmem:[%s3438_s1 + $0x258] sm:$0xff]  ;;  %v2391_v36 = vpack.c.bf16 %v1639_v33, %v1638_v32  ;;  %v1641_v39 = vld [vmem:[%s3438_s1 + $0xe8] sm:$0xff]  ;;  %v1688_v40 = vld [vmem:[%s3438_s1 + $0x260] sm:$0xff] }
   0xe   : > { %s2739_s11 = smul.u32 576, %s3442_s13  ;;  %2506 = vmatpush3.bf16.msra.mxu0 %v2503_v12  ;;  %2380 = vmatprep.subr.bf16.mxu1 %v2379_v16  ;;  %v2519_v37 = vpack.c.bf16 %v1687_v35, %v1686_v34  ;;  %v1689_v41 = vld [vmem:[%s3438_s1 + $0x268] sm:$0xff]  ;;  %v2395_v42 = vpack.c.bf16 %v1641_v39, %v1640_v38  ;;  %v1642_v44 = vld [vmem:[%s3438_s1 + $0xf0] sm:$0xff]  ;;  %v1643_v45 = vld [vmem:[%s3438_s1 + $0xf8] sm:$0xff]  ;;  %s1758_s15 = sshll.u32 %s3442_s13, 6 }
   0xf   : > { %2508 = vmatprep.subr.bf16.mxu0 %v2507_v17  ;;  %v2523_v43 = vpack.c.bf16 %v1689_v41, %v1688_v40  ;;  %v1690_v46 = vld [vmem:[%s3438_s1 + $0x270] sm:$0xff]  ;;  %v1691_v47 = vld [vmem:[%s3438_s1 + $0x278] sm:$0xff]  ;;  %v2399_v48 = vpack.c.bf16 %v1643_v45, %v1642_v44  ;;  %v233_v50 = vld [vmem:[%s3438_s1] sm:$0xff]  ;;  %s177_s18 = scalar_lea.vmem %s3439_s2, %s1758_s15  ;;  %s1627_s19 = sshll.u32 %s3442_s13, 1 }
  0x10   : > { %s2838_s24 = scalar_lea.vmem %s3437_s0, %s2739_s11  ;;  %v2527_v49 = vpack.c.bf16 %v1691_v47, %v1690_v46  ;;  %v234_v51 = vld [vmem:[%s3438_s1 + $0x8] sm:$0xff]  ;;  %v1692_v52 = vld [vmem:[%s3438_s1 + $0x280] sm:$0xff]  ;;  %v235_v56 = vld [vmem:[%s3438_s1 + $0x10] sm:$0xff]  ;;  %s181_s22 = scalar_lea.vmem %s3440_s3, %s1627_s19 }
  0x11   : > { %v183_v26 = vld [vmem:[%s2838_s24 + $0x8] sm:$0xff]  ;;  %2382 = vmatpush3.bf16.msra.mxu1 %v2379_v16  ;;  %v2403_v54 = vpack.c.bf16 %v234_v51, %v233_v50  ;;  %v236_v57 = vld [vmem:[%s3438_s1 + $0x18] sm:$0xff]  ;;  %v1694_v58 = vld [vmem:[%s3438_s1 + $0x290] sm:$0xff] }
  0x12   : > { %2007 = vmatprep.mubr.f32.mxu1 %v183_v26  ;;  %v186_v29 = vld [vmem:[%s2838_s24 + $0x28] sm:$0xff]  ;;  %2510 = vmatpush3.bf16.msra.mxu0 %v2507_v17  ;;  %v1695_v59 = vld [vmem:[%s3438_s1 + $0x298] sm:$0xff]  ;;  %v2407_v62 = vpack.c.bf16 %v236_v57, %v235_v56  ;;  %v237_v0 = vld [vmem:[%s3438_s1 + $0x20] sm:$0xff] }
  0x13   : > { %2183 = vmatprep.mubr.f32.mxu0 %v186_v29  ;;  %2384 = vmatprep.subr.bf16.mxu1 %v2383_v22  ;;  %v1693_v53 = vld [vmem:[%s3438_s1 + $0x288] sm:$0xff]  ;;  %v2535_v63 = vpack.c.bf16 %v1695_v59, %v1694_v58  ;;  %v1696_v2 = vld [vmem:[%s3438_s1 + $0x2a0] sm:$0xff]  ;;  %v239_v10 = vld [vmem:[%s3438_s1 + $0x30] sm:$0xff] }
  0x14   : > { %2512 = vmatprep.subr.bf16.mxu0 %v2511_v23  ;;  %v2531_v55 = vpack.c.bf16 %v1693_v53, %v1692_v52  ;;  %v2915_v60 = vld [vmem:[%s2838_s24 + $0x48] sm:$0xff]  ;;  %v240_v11 = vld [vmem:[%s3438_s1 + $0x38] sm:$0xff]  ;;  %v1698_v12 = vld [vmem:[%s3438_s1 + $0x2b0] sm:$0xff] }
  0x15   : > { %2386 = vmatpush3.bf16.msra.mxu1 %v2383_v22  ;;  %v192_v61 = vld [vmem:[%s2838_s24 + $0x68] sm:$0xff]  ;;  %v1699_v13 = vld [vmem:[%s3438_s1 + $0x2b8] sm:$0xff]  ;;  %v2415_v17 = vpack.c.bf16 %v240_v11, %v239_v10  ;;  %v2962_v19 = vld [vmem:[%s2838_s24 + $0x20] sm:$0xff] }
  0x16   : > { %2514 = vmatpush3.bf16.msra.mxu0 %v2511_v23  ;;  %2388 = vmatprep.subr.bf16.mxu1 %v2387_v30  ;;  %v238_v1 = vld [vmem:[%s3438_s1 + $0x28] sm:$0xff]  ;;  %v187_v20 = vld [vmem:[%s2838_s24 + $0x30] sm:$0x1]  ;;  %v2543_v21 = vpack.c.bf16 %v1699_v13, %v1698_v12  ;;  %v241_v22 = vld [vmem:[%s3438_s1 + $0x40] sm:$0xff]  ;;  %v931_v29 = vrot.slane %v2962_v19, 1 }
  0x17   : > { %2516 = vmatprep.subr.bf16.mxu0 %v2515_v31  ;;  %v1697_v3 = vld [vmem:[%s3438_s1 + $0x2a8] sm:$0xff]  ;;  %v2411_v7 = vpack.c.bf16 %v238_v1, %v237_v0  ;;  %v1700_v24 = vld [vmem:[%s3438_s1 + $0x2c0] sm:$0xff]  ;;  %v243_v34 = vld [vmem:[%s3438_s1 + $0x50] sm:$0xff] }
  0x18   : > { %v2932_v4 = vld [vmem:[%s2838_s24 + $0x88] sm:$0xff]  ;;  %v2539_v9 = vpack.c.bf16 %v1697_v3, %v1696_v2  ;;  %v244_v35 = vld [vmem:[%s3438_s1 + $0x58] sm:$0xff]  ;;  %v3003_v38 = vld [vmem:[%s2838_s24] sm:$0xff] }
  0x19   : > { %2390 = vmatpush3.bf16.msra.mxu1 %v2387_v30  ;;  %v198_v5 = vld [vmem:[%s2838_s24 + $0xa8] sm:$0xff]  ;;  %v932_v30 = vrot.slane %v187_v20, 1  ;;  %v2423_v40 = vpack.c.bf16 %v244_v35, %v243_v34  ;;  %v1704_v44 = vld [vmem:[%s3438_s1 + $0x2e0] sm:$0xff]  ;;  %v1706_v50 = vld [vmem:[%s3438_s1 + $0x2f0] sm:$0xff] }
  0x1a   : > { %2518 = vmatpush3.bf16.msra.mxu0 %v2515_v31  ;;  %2392 = vmatprep.subr.bf16.mxu1 %v2391_v36  ;;  %v2936_v6 = vld [vmem:[%s2838_s24 + $0xc8] sm:$0xff]  ;;  %v1707_v51 = vld [vmem:[%s3438_s1 + $0x2f8] sm:$0xff]  ;;  %v1644_v53 = vld [vmem:[%s3438_s1 + $0x100] sm:$0xff] }
  0x1b   : > { %2520 = vmatprep.subr.bf16.mxu0 %v2519_v37  ;;  %v204_v8 = vld [vmem:[%s2838_s24 + $0xe8] sm:$0xff]  ;;  %v933_v39 = vsel %vm492_vm0, %v931_v29, %v932_v30  ;;  %v3038_v56 = vld [vmem:[%s2838_s24 + $0x60] sm:$0xff]  ;;  %v193_v57 = vld [vmem:[%s2838_s24 + $0x70] sm:$0x1] }
  0x1c   : > { %v2954_v14 = vld [vmem:[%s2838_s24 + $0x108] sm:$0xff]  ;;  %v1708_v58 = vld [vmem:[%s3438_s1 + $0x300] sm:$0xff]  ;;  %v199_v1 = vld [vmem:[%s2838_s24 + $0xb0] sm:$0x1] }
  0x1d   : > { %2394 = vmatpush3.bf16.msra.mxu1 %v2391_v36  ;;  %v210_v15 = vld [vmem:[%s2838_s24 + $0x128] sm:$0xff]  ;;  %v1702_v36 = vld [vmem:[%s3438_s1 + $0x2d0] sm:$0xff]  ;;  %v3049_v0 = vld [vmem:[%s2838_s24 + $0xa0] sm:$0xff] }
  0x1e   : > { %2522 = vmatpush3.bf16.msra.mxu0 %v2519_v37  ;;  %2396 = vmatprep.subr.bf16.mxu1 %v2395_v42  ;;  %v2958_v16 = vld [vmem:[%s2838_s24 + $0x148] sm:$0xff]  ;;  %v1703_v37 = vld [vmem:[%s3438_s1 + $0x2d8] sm:$0xff]  ;;  %v3053_v2 = vld [vmem:[%s2838_s24 + $0xe0] sm:$0xff] }
  0x1f   : > { %2524 = vmatprep.subr.bf16.mxu0 %v2523_v43  ;;  %v216_v18 = vld [vmem:[%s2838_s24 + $0x168] sm:$0xff]  ;;  %v2551_v41 = vpack.c.bf16 %v1703_v37, %v1702_v36  ;;  %v1711_v10 = vld [vmem:[%s3438_s1 + $0x318] sm:$0xff]  ;;  %v3069_v11 = vld [vmem:[%s2838_s24 + $0x200] sm:$0xff] }
  0x20   : > { %v242_v23 = vld [vmem:[%s3438_s1 + $0x48] sm:$0xff]  ;;  %v3072_v12 = vld [vmem:[%s2838_s24 + $0x40] sm:$0xff]  ;;  %v1355_v20 = vrot.slane %v3069_v11, 1 }
  0x21   : > { %2398 = vmatpush3.bf16.msra.mxu1 %v2395_v42  ;;  %v1701_v25 = vld [vmem:[%s3438_s1 + $0x2c8] sm:$0xff]  ;;  %v2419_v31 = vpack.c.bf16 %v242_v23, %v241_v22  ;;  %v245_v42 = vld [vmem:[%s3438_s1 + $0x60] sm:$0xff] }
  0x22   : > { %2526 = vmatpush3.bf16.msra.mxu0 %v2523_v43  ;;  %2400 = vmatprep.subr.bf16.mxu1 %v2399_v48  ;;  %v2980_v26 = vld [vmem:[%s2838_s24 + $0x188] sm:$0xff]  ;;  %v2547_v33 = vpack.c.bf16 %v1701_v25, %v1700_v24  ;;  %v1648_v13 = vld [vmem:[%s3438_s1 + $0x120] sm:$0xff]  ;;  %v211_v25 = vld [vmem:[%s2838_s24 + $0x130] sm:$0x1] }
  0x23   : > { %2528 = vmatprep.subr.bf16.mxu0 %v2527_v49  ;;  %v222_v27 = vld [vmem:[%s2838_s24 + $0x1a8] sm:$0xff]  ;;  %v3082_v24 = vld [vmem:[%s2838_s24 + $0x120] sm:$0xff] }
  0x24   : > { %v2984_v28 = vld [vmem:[%s2838_s24 + $0x1c8] sm:$0xff]  ;;  %v1712_v34 = vld [vmem:[%s3438_s1 + $0x320] sm:$0xff] }
  0x25   : > { %2402 = vmatpush3.bf16.msra.mxu1 %v2399_v48  ;;  %v228_v32 = vld [vmem:[%s2838_s24 + $0x1e8] sm:$0xff]  ;;  %v247_v48 = vld [vmem:[%s3438_s1 + $0x70] sm:$0xff]  ;;  %v3101_v36 = vld [vmem:[%s2838_s24 + $0x80] sm:$0xff] }
  0x26   : > { %2530 = vmatpush3.bf16.msra.mxu0 %v2527_v49  ;;  %2404 = vmatprep.subr.bf16.mxu1 %v2403_v54  ;;  %v246_v43 = vld [vmem:[%s3438_s1 + $0x68] sm:$0xff]  ;;  %v248_v49 = vld [vmem:[%s3438_s1 + $0x78] sm:$0xff] }
  0x27   : > { %2532 = vmatprep.subr.bf16.mxu0 %v2531_v55  ;;  %v1705_v45 = vld [vmem:[%s3438_s1 + $0x2e8] sm:$0xff]  ;;  %v2427_v46 = vpack.c.bf16 %v246_v43, %v245_v42  ;;  %v2431_v52 = vpack.c.bf16 %v248_v49, %v247_v48  ;;  %v3117_v48 = vld [vmem:[%s2838_s24 + $0x1a0] sm:$0xff]  ;;  %v223_v49 = vld [vmem:[%s2838_s24 + $0x1b0] sm:$0x1] }
  0x28   : > { %2008 = vmatmul.mubr.f32.vlgmr.msra.gmra.mrb[0].mxu1 %v2915_v60  ;;  %v2555_v47 = vpack.c.bf16 %v1705_v45, %v1704_v44  ;;  %v1709_v59 = vld [vmem:[%s3438_s1 + $0x308] sm:$0xff]  ;;  %v1650_v44 = vld [vmem:[%s3438_s1 + $0x130] sm:$0xff] }
  0x29   : > { %2406 = vmatpush3.bf16.msra.mxu1 %v2403_v54  ;;  %2184 = vmatmul.mubr.f32.vlgmr.msra.gmra.mrb[0].mxu0 %v192_v61  ;;  %v2559_v54 = vpack.c.bf16 %v1707_v51, %v1706_v50  ;;  %v2563_v3 = vpack.c.bf16 %v1709_v59, %v1708_v58  ;;  %v1649_v30 = vld [vmem:[%s3438_s1 + $0x128] sm:$0xff]  ;;  %v1651_v51 = vld [vmem:[%s3438_s1 + $0x138] sm:$0xff]  ;;  %v3140_v59 = vld [vmem:[%s2838_s24 + $0x140] sm:$0xff] }
  0x2a   : > { %2534 = vmatpush3.bf16.msra.mxu0 %v2531_v55  ;;  %2408 = vmatprep.subr.bf16.mxu1 %v2407_v62  ;;  %v1645_v55 = vld [vmem:[%s3438_s1 + $0x108] sm:$0xff]  ;;  %v2443_v43 = vpack.c.bf16 %v1649_v30, %v1648_v13  ;;  %v493_v13 = vrot.slane %v3003_v38, 1  ;;  %v1718_v30 = vld [vmem:[%s3438_s1 + $0x350] sm:$0xff] }
  0x2b   : > { %2536 = vmatprep.subr.bf16.mxu0 %v2535_v63  ;;  %2010 = vmatprep.mubr.f32.mxu1 %v2932_v4  ;;  %v2435_v61 = vpack.c.bf16 %v1645_v55, %v1644_v53  ;;  %v1713_v35 = vld [vmem:[%s3438_s1 + $0x328] sm:$0xff]  ;;  %v229_v53 = vld [vmem:[%s2838_s24 + $0x1f0] sm:$0x1]  ;;  %v1715_v55 = vld [vmem:[%s3438_s1 + $0x338] sm:$0xff] }
  0x2c   : > { %2186 = vmatprep.mubr.f32.mxu0 %v198_v5  ;;  %2011 = vmatmul.mubr.f32.gmra.mrb[2].mxu1 %v2936_v6  ;;  %v1646_v5 = vld [vmem:[%s3438_s1 + $0x110] sm:$0xff]  ;;  %v2571_v50 = vpack.c.bf16 %v1713_v35, %v1712_v34 }
  0x2d   : > { %2410 = vmatpush3.bf16.msra.mxu1 %v2407_v62  ;;  %2187 = vmatmul.mubr.f32.gmra.mrb[2].mxu0 %v204_v8  ;;  %v934_v62 = vrot.slane %v3038_v56, 1  ;;  %v205_v8 = vld [vmem:[%s2838_s24 + $0xf0] sm:$0x1] }
  0x2e   : > { %2538 = vmatpush3.bf16.msra.mxu0 %v2535_v63  ;;  %2412 = vmatprep.subr.bf16.mxu1 %v2411_v7  ;;  %v935_v63 = vrot.slane %v193_v57, 1  ;;  %v941_v23 = vrot.slane %v205_v8, 1  ;;  %v3136_v57 = vld [vmem:[%s2838_s24 + $0x100] sm:$0xff] }
  0x2f   : > { %2540 = vmatprep.subr.bf16.mxu0 %v2539_v9  ;;  %2013 = vmatprep.mubr.f32.mxu1 %v2954_v14 }
  0x30   : > { %2189 = vmatprep.mubr.f32.mxu0 %v210_v15  ;;  %2014 = vmatmul.mubr.f32.gmra.mrb[4].mxu1 %v2958_v16  ;;  %v937_v15 = vrot.slane %v3049_v0, 1 }
  0x31   : > { %2414 = vmatpush3.bf16.msra.mxu1 %v2411_v7  ;;  %2190 = vmatmul.mubr.f32.gmra.mrb[4].mxu0 %v216_v18  ;;  %v1647_v7 = vld [vmem:[%s3438_s1 + $0x118] sm:$0xff]  ;;  %v940_v18 = vrot.slane %v3053_v2, 1 }
  0x32   : > { %2542 = vmatpush3.bf16.msra.mxu0 %v2539_v9  ;;  %2416 = vmatprep.subr.bf16.mxu1 %v2415_v17  ;;  %v1710_v9 = vld [vmem:[%s3438_s1 + $0x310] sm:$0xff]  ;;  %v2439_v22 = vpack.c.bf16 %v1647_v7, %v1646_v5  ;;  %v953_v7 = vrot.slane %v229_v53, 1 }
  0x33   : > { %2544 = vmatprep.subr.bf16.mxu0 %v2543_v21  ;;  %2016 = vmatprep.mubr.f32.mxu1 %v2980_v26  ;;  %v2567_v29 = vpack.c.bf16 %v1711_v10, %v1710_v9  ;;  %v942_v45 = vsel %vm492_vm0, %v940_v18, %v941_v23  ;;  %v1652_v9 = vld [vmem:[%s3438_s1 + $0x140] sm:$0xff]  ;;  %v1653_v10 = vld [vmem:[%s3438_s1 + $0x148] sm:$0xff]  ;;  %v190_v53 = vld [vmem:[%s2838_s24 + $0x50] sm:$0x1] }
  0x34   : > { %2192 = vmatprep.mubr.f32.mxu0 %v222_v27  ;;  %2017 = vmatmul.mubr.f32.gmra.mrb[6].mxu1 %v2984_v28  ;;  %v232_v27 = vld [vmem:[%s2838_s24 + $0x210] sm:$0x1]  ;;  %v3162_v18 = vld [vmem:[%s2838_s24 + $0x180] sm:$0xff] }
  0x35   : > { %2418 = vmatpush3.bf16.msra.mxu1 %v2415_v17  ;;  %2193 = vmatmul.mubr.f32.gmra.mrb[6].mxu0 %v228_v32  ;;  %v938_v17 = vrot.slane %v199_v1, 1  ;;  %v217_v32 = vld [vmem:[%s2838_s24 + $0x170] sm:$0x1]  ;;  %v2447_v1 = vpack.c.bf16 %v1651_v51, %v1650_v44 }
  0x36   : > { %2546 = vmatpush3.bf16.msra.mxu0 %v2543_v21  ;;  %2420 = vmatprep.subr.bf16.mxu1 %v2419_v31  ;;  %v936_v21 = vsel %vm492_vm0, %v934_v62, %v935_v63  ;;  %v950_v62 = vrot.slane %v223_v49, 1  ;;  %v184_v63 = vld [vmem:[%s2838_s24 + $0x10] sm:$0x1] }
  0x37   : > { %2548 = vmatprep.subr.bf16.mxu0 %v2547_v33  ;;  %2051 = vmatprep.mubr.f32.mxu1 %v3003_v38  ;;  %v939_v37 = vsel %vm492_vm0, %v937_v15, %v938_v17  ;;  %v1716_v15 = vld [vmem:[%s3438_s1 + $0x340] sm:$0xff]  ;;  %v1717_v17 = vld [vmem:[%s3438_s1 + $0x348] sm:$0xff]  ;;  %v2451_v38 = vpack.c.bf16 %v1653_v10, %v1652_v9  ;;  %v1722_v49 = vld [vmem:[%s3438_s1 + $0x370] sm:$0xff] }
  0x38   : > { %2227 = vmatprep.mubr.f32.mxu0 %v933_v39  ;;  %v3105_v39 = vld [vmem:[%s2838_s24 + $0xc0] sm:$0xff]  ;;  %v1662_v9 = vld [vmem:[%s3438_s1 + $0x190] sm:$0xff]  ;;  %v1663_v10 = vld [vmem:[%s3438_s1 + $0x198] sm:$0xff] }
  0x39   : > { %2422 = vmatpush3.bf16.msra.mxu1 %v2419_v31  ;;  %v3090_v31 = vld [vmem:[%s2838_s24 + $0x160] sm:$0xff] }
  0x3a   : > { %2550 = vmatpush3.bf16.msra.mxu0 %v2547_v33  ;;  %2424 = vmatprep.subr.bf16.mxu1 %v2423_v40  ;;  %v1356_v33 = vrot.slane %v232_v27, 1  ;;  %v1654_v27 = vld [vmem:[%s3438_s1 + $0x150] sm:$0xff] }
  0x3b   : > { %2552 = vmatprep.subr.bf16.mxu0 %v2551_v41 }
  0x3c   : > { %v3109_v42 = vsel %vm492_vm0, %v1355_v20, %v1356_v33  ;;  %v494_v20 = vrot.slane %v184_v63, 1  ;;  %v496_v63 = vrot.slane %v3072_v12, 1 }
  0x3d   : > { %2426 = vmatpush3.bf16.msra.mxu1 %v2423_v40  ;;  %v943_v40 = vrot.slane %v3082_v24, 1 }
  0x3e   : > { %2554 = vmatpush3.bf16.msra.mxu0 %v2551_v41  ;;  %2428 = vmatprep.subr.bf16.mxu1 %v2427_v46  ;;  %v944_v41 = vrot.slane %v211_v25, 1  ;;  %v2579_v25 = vpack.c.bf16 %v1717_v17, %v1716_v15  ;;  %v495_v33 = vsel %vm492_vm0, %v493_v13, %v494_v20  ;;  %v1726_v13 = vld [vmem:[%s3438_s1 + $0x390] sm:$0xff]  ;;  %v1727_v15 = vld [vmem:[%s3438_s1 + $0x398] sm:$0xff]  ;;  %v502_v20 = vrot.slane %v3105_v39, 1 }
  0x3f   : > { %2556 = vmatprep.subr.bf16.mxu0 %v2555_v47 }
  0x40   : > { %v945_v58 = vsel %vm492_vm0, %v943_v40, %v944_v41  ;;  %v1657_v40 = vld [vmem:[%s3438_s1 + $0x168] sm:$0xff]  ;;  %v1720_v41 = vld [vmem:[%s3438_s1 + $0x360] sm:$0xff] }
  0x41   : > { %2430 = vmatpush3.bf16.msra.mxu1 %v2427_v46  ;;  %v946_v46 = vrot.slane %v3090_v31, 1 }
  0x42   : > { %2558 = vmatpush3.bf16.msra.mxu0 %v2555_v47  ;;  %2432 = vmatprep.subr.bf16.mxu1 %v2431_v52  ;;  %v947_v47 = vrot.slane %v217_v32, 1  ;;  %v1719_v32 = vld [vmem:[%s3438_s1 + $0x358] sm:$0xff] }
  0x43   : > { %2560 = vmatprep.subr.bf16.mxu0 %v2559_v54  ;;  %v2583_v35 = vpack.c.bf16 %v1719_v32, %v1718_v30  ;;  %v1664_v30 = vld [vmem:[%s3438_s1 + $0x1a0] sm:$0xff]  ;;  %v1665_v32 = vld [vmem:[%s3438_s1 + $0x1a8] sm:$0xff] }
  0x45   : > { %2434 = vmatpush3.bf16.msra.mxu1 %v2431_v52  ;;  %v3125_v52 = vld [vmem:[%s2838_s24 + $0x1e0] sm:$0xff] }
  0x46   : > { %2562 = vmatpush3.bf16.msra.mxu0 %v2559_v54  ;;  %2436 = vmatprep.subr.bf16.mxu1 %v2435_v61  ;;  %v1714_v54 = vld [vmem:[%s3438_s1 + $0x330] sm:$0xff]  ;;  %v952_v5 = vrot.slane %v3125_v52, 1 }
  0x47   : > { %2564 = vmatprep.subr.bf16.mxu0 %v2563_v3  ;;  %v2575_v8 = vpack.c.bf16 %v1715_v55, %v1714_v54  ;;  %v1660_v55 = vld [vmem:[%s3438_s1 + $0x180] sm:$0xff] }
  0x48   : > { %2052 = vmatmul.mubr.f32.vlgmr.msra.gmra.mrb[0].mxu1 %v3072_v12  ;;  %v954_v23 = vsel %vm492_vm0, %v952_v5, %v953_v7  ;;  %v202_v7 = vld [vmem:[%s2838_s24 + $0xd0] sm:$0x1] }
  0x49   : > { %2438 = vmatpush3.bf16.msra.mxu1 %v2435_v61  ;;  %2228 = vmatmul.mubr.f32.vlgmr.msra.gmra.mrb[0].mxu0 %v936_v21  ;;  %v949_v61 = vrot.slane %v3117_v48, 1 }
  0x4a   : > { %2566 = vmatpush3.bf16.msra.mxu0 %v2563_v3  ;;  %2440 = vmatprep.subr.bf16.mxu1 %v2439_v22  ;;  %v948_v3 = vsel %vm492_vm0, %v946_v46, %v947_v47  ;;  %v1658_v46 = vld [vmem:[%s3438_s1 + $0x170] sm:$0xff]  ;;  %v1659_v47 = vld [vmem:[%s3438_s1 + $0x178] sm:$0xff] }
  0x4b   : > { %2568 = vmatprep.subr.bf16.mxu0 %v2567_v29  ;;  %2054 = vmatprep.mubr.f32.mxu1 %v3101_v36  ;;  %v951_v21 = vsel %vm492_vm0, %v949_v61, %v950_v62  ;;  %v2463_v51 = vpack.c.bf16 %v1659_v47, %v1658_v46  ;;  %v1724_v61 = vld [vmem:[%s3438_s1 + $0x380] sm:$0xff]  ;;  %v1725_v62 = vld [vmem:[%s3438_s1 + $0x388] sm:$0xff]  ;;  %v2475_v46 = vpack.c.bf16 %v1665_v32, %v1664_v30  ;;  %v226_v47 = vld [vmem:[%s2838_s24 + $0x1d0] sm:$0x1] }
  0x4c   : > { %2230 = vmatprep.mubr.f32.mxu0 %v939_v37  ;;  %2055 = vmatmul.mubr.f32.gmra.mrb[2].mxu1 %v3105_v39  ;;  %v1656_v37 = vld [vmem:[%s3438_s1 + $0x160] sm:$0xff]  ;;  %v1738_v30 = vld [vmem:[%s3438_s1 + $0x3f0] sm:$0xff] }
  0x4d   : > { %2442 = vmatpush3.bf16.msra.mxu1 %v2439_v22  ;;  %2231 = vmatmul.mubr.f32.gmra.mrb[2].mxu0 %v942_v45  ;;  %v3166_v22 = vld [vmem:[%s2838_s24 + $0x1c0] sm:$0xff]  ;;  %v2459_v44 = vpack.c.bf16 %v1657_v40, %v1656_v37 }
  0x4e   : > { %2570 = vmatpush3.bf16.msra.mxu0 %v2567_v29  ;;  %2444 = vmatprep.subr.bf16.mxu1 %v2443_v43  ;;  %v1655_v29 = vld [vmem:[%s3438_s1 + $0x158] sm:$0xff] }
  0x4f   : > { %2572 = vmatprep.subr.bf16.mxu0 %v2571_v50  ;;  %2057 = vmatprep.mubr.f32.mxu1 %v3136_v57  ;;  %v2455_v34 = vpack.c.bf16 %v1655_v29, %v1654_v27  ;;  %v214_v27 = vld [vmem:[%s2838_s24 + $0x150] sm:$0x1]  ;;  %v2599_v29 = vpack.c.bf16 %v1727_v15, %v1726_v13  ;;  %v1671_v13 = vld [vmem:[%s3438_s1 + $0x1d8] sm:$0xff] }
  0x50   : > { %2233 = vmatprep.mubr.f32.mxu0 %v945_v58  ;;  %2058 = vmatmul.mubr.f32.gmra.mrb[4].mxu1 %v3140_v59  ;;  %v1661_v58 = vld [vmem:[%s3438_s1 + $0x188] sm:$0xff]  ;;  %v1735_v15 = vld [vmem:[%s3438_s1 + $0x3d8] sm:$0xff] }
  0x51   : > { %2446 = vmatpush3.bf16.msra.mxu1 %v2443_v43  ;;  %2234 = vmatmul.mubr.f32.gmra.mrb[4].mxu0 %v948_v3  ;;  %v1721_v43 = vld [vmem:[%s3438_s1 + $0x368] sm:$0xff]  ;;  %v196_v3 = vld [vmem:[%s2838_s24 + $0x90] sm:$0x1]  ;;  %v2467_v5 = vpack.c.bf16 %v1661_v58, %v1660_v55 }
  0x52   : > { %2574 = vmatpush3.bf16.msra.mxu0 %v2571_v50  ;;  %2448 = vmatprep.subr.bf16.mxu1 %v2447_v1  ;;  %v2587_v45 = vpack.c.bf16 %v1721_v43, %v1720_v41  ;;  %v1723_v50 = vld [vmem:[%s3438_s1 + $0x378] sm:$0xff]  ;;  %v500_v17 = vrot.slane %v196_v3, 1  ;;  %v508_v41 = vrot.slane %v3140_v59, 1  ;;  %v1668_v3 = vld [vmem:[%s3438_s1 + $0x1c0] sm:$0xff] }
  0x53   : > { %2576 = vmatprep.subr.bf16.mxu0 %v2575_v8  ;;  %2060 = vmatprep.mubr.f32.mxu1 %v3162_v18  ;;  %v2591_v54 = vpack.c.bf16 %v1723_v50, %v1722_v49  ;;  %v1666_v50 = vld [vmem:[%s3438_s1 + $0x1b0] sm:$0xff] }
  0x54   : > { %2236 = vmatprep.mubr.f32.mxu0 %v951_v21  ;;  %2061 = vmatmul.mubr.f32.gmra.mrb[6].mxu1 %v3166_v22 }
  0x55   : > { %2450 = vmatpush3.bf16.msra.mxu1 %v2447_v1  ;;  %2237 = vmatmul.mubr.f32.gmra.mrb[6].mxu0 %v954_v23  ;;  %v497_v1 = vrot.slane %v190_v53, 1  ;;  %v208_v23 = vld [vmem:[%s2838_s24 + $0x110] sm:$0x1] }
  0x56   : > { %2578 = vmatpush3.bf16.msra.mxu0 %v2575_v8  ;;  %2452 = vmatprep.subr.bf16.mxu1 %v2451_v38  ;;  %v2595_v8 = vpack.c.bf16 %v1725_v62, %v1724_v61  ;;  %v506_v40 = vrot.slane %v208_v23, 1  ;;  %v1730_v53 = vld [vmem:[%s3438_s1 + $0x3b0] sm:$0xff]  ;;  %v514_v61 = vrot.slane %v3166_v22, 1  ;;  %v1673_v23 = vld [vmem:[%s3438_s1 + $0x1e8] sm:$0xff] }
  0x57   : > { %2580 = vmatprep.subr.bf16.mxu0 %v2579_v25  ;;  %2095 = vmatprep.mubr.f32.mxu1 %v495_v33  ;;  %v3240_v21 = vsel %vm492_vm0, %v496_v63, %v497_v1  ;;  %v505_v33 = vrot.slane %v3136_v57, 1  ;;  %v515_v63 = vrot.slane %v226_v47, 1  ;;  %v1745_v47 = vld [vmem:[%s3438_s1 + $0x428] sm:$0xff] }
  0x58   : > { %2271 = vmatprep.mubr.f32.mxu0 %v3072_v12  ;;  %v499_v12 = vrot.slane %v3101_v36, 1 }
  0x59   : > { %2454 = vmatpush3.bf16.msra.mxu1 %v2451_v38  ;;  %v503_v38 = vrot.slane %v202_v7, 1  ;;  %v3285_v55 = vsel %vm492_vm0, %v505_v33, %v506_v40  ;;  %v1733_v7 = vld [vmem:[%s3438_s1 + $0x3c8] sm:$0xff] }
  0x5a   : > { %2582 = vmatpush3.bf16.msra.mxu0 %v2579_v25  ;;  %2456 = vmatprep.subr.bf16.mxu1 %v2455_v34  ;;  %v2471_v25 = vpack.c.bf16 %v1663_v10, %v1662_v9  ;;  %v3259_v37 = vsel %vm492_vm0, %v499_v12, %v500_v17  ;;  %v3312_v9 = vsel %vm492_vm0, %v514_v61, %v515_v63 }
  0x5b   : > { %2584 = vmatprep.subr.bf16.mxu0 %v2583_v35  ;;  %v3264_v43 = vsel %vm492_vm0, %v502_v20, %v503_v38  ;;  %v1672_v38 = vld [vmem:[%s3438_s1 + $0x1e0] sm:$0xff] }
  0x5d   : > { %2458 = vmatpush3.bf16.msra.mxu1 %v2455_v34  ;;  %v1728_v34 = vld [vmem:[%s3438_s1 + $0x3a0] sm:$0xff] }
  0x5e   : > { %2586 = vmatpush3.bf16.msra.mxu0 %v2583_v35  ;;  %2460 = vmatprep.subr.bf16.mxu1 %v2459_v44  ;;  %v1729_v35 = vld [vmem:[%s3438_s1 + $0x3a8] sm:$0xff] }
  0x5f   : > { %2588 = vmatprep.subr.bf16.mxu0 %v2587_v45  ;;  %v2603_v49 = vpack.c.bf16 %v1729_v35, %v1728_v34  ;;  %v1740_v34 = vld [vmem:[%s3438_s1 + $0x400] sm:$0xff]  ;;  %v1741_v35 = vld [vmem:[%s3438_s1 + $0x408] sm:$0xff] }
  0x60   : > { %v2627_v40 = vpack.c.bf16 %v1741_v35, %v1740_v34 }
  0x61   : > { %2462 = vmatpush3.bf16.msra.mxu1 %v2459_v44  ;;  %v509_v44 = vrot.slane %v214_v27, 1 }
  0x62   : > { %2590 = vmatpush3.bf16.msra.mxu0 %v2587_v45  ;;  %2464 = vmatprep.subr.bf16.mxu1 %v2463_v51  ;;  %v220_v45 = vld [vmem:[%s2838_s24 + $0x190] sm:$0x1] }
  0x63   : > { %2592 = vmatprep.subr.bf16.mxu0 %v2591_v54  ;;  %v512_v58 = vrot.slane %v220_v45, 1  ;;  %v3290_v62 = vsel %vm492_vm0, %v508_v41, %v509_v44  ;;  %v1742_v41 = vld [vmem:[%s3438_s1 + $0x410] sm:$0xff]  ;;  %v1743_v44 = vld [vmem:[%s3438_s1 + $0x418] sm:$0xff] }
  0x64   : > { %v2631_v45 = vpack.c.bf16 %v1743_v44, %v1742_v41 }
  0x65   : > { %2466 = vmatpush3.bf16.msra.mxu1 %v2463_v51  ;;  %v1667_v51 = vld [vmem:[%s3438_s1 + $0x1b8] sm:$0xff] }
  0x66   : > { %2594 = vmatpush3.bf16.msra.mxu0 %v2591_v54  ;;  %2468 = vmatprep.subr.bf16.mxu1 %v2467_v5  ;;  %v1731_v54 = vld [vmem:[%s3438_s1 + $0x3b8] sm:$0xff]  ;;  %v2479_v1 = vpack.c.bf16 %v1667_v51, %v1666_v50 }
  0x67   : > { %2596 = vmatprep.subr.bf16.mxu0 %v2595_v8  ;;  %v1747_v50 = vld [vmem:[%s3438_s1 + $0x438] sm:$0xff] }
  0x68   : > { %2096 = vmatmul.mubr.f32.vlgmr.msra.gmra.mrb[0].mxu1 %v3240_v21  ;;  %v1755_v51 = vld [vmem:[%s3438_s1 + $0x478] sm:$0xff] }
  0x69   : > { %2470 = vmatpush3.bf16.msra.mxu1 %v2467_v5  ;;  %2272 = vmatmul.mubr.f32.vlgmr.msra.gmra.mrb[0].mxu0 %v3101_v36  ;;  %v511_v36 = vrot.slane %v3162_v18, 1  ;;  %v1669_v5 = vld [vmem:[%s3438_s1 + $0x1c8] sm:$0xff] }
  0x6a   : > { %2598 = vmatpush3.bf16.msra.mxu0 %v2595_v8  ;;  %2472 = vmatprep.subr.bf16.mxu1 %v2471_v25  ;;  %v2483_v10 = vpack.c.bf16 %v1669_v5, %v1668_v3 }
  0x6b   : > { %2600 = vmatprep.subr.bf16.mxu0 %v2599_v29  ;;  %2098 = vmatprep.mubr.f32.mxu1 %v3259_v37  ;;  %v3308_v8 = vsel %vm492_vm0, %v511_v36, %v512_v58 }
  0x6c   : > { %2274 = vmatprep.mubr.f32.mxu0 %v3105_v39  ;;  %2099 = vmatmul.mubr.f32.gmra.mrb[2].mxu1 %v3264_v43  ;;  %v2607_v39 = vpack.c.bf16 %v1731_v54, %v1730_v53 }
  0x6d   : > { %2474 = vmatpush3.bf16.msra.mxu1 %v2471_v25  ;;  %2275 = vmatmul.mubr.f32.gmra.mrb[2].mxu0 %v3136_v57  ;;  %v1732_v57 = vld [vmem:[%s3438_s1 + $0x3c0] sm:$0xff]  ;;  %v2491_v25 = vpack.c.bf16 %v1673_v23, %v1672_v38 }
  0x6e   : > { %2602 = vmatpush3.bf16.msra.mxu0 %v2599_v29  ;;  %2476 = vmatprep.subr.bf16.mxu1 %v2475_v46  ;;  %v2611_v12 = vpack.c.bf16 %v1733_v7, %v1732_v57  ;;  %v1675_v29 = vld [vmem:[%s3438_s1 + $0x1f8] sm:$0xff] }
  0x6f   : > { %2604 = vmatprep.subr.bf16.mxu0 %v2603_v49  ;;  %2101 = vmatprep.mubr.f32.mxu1 %v3285_v55 }
  0x70   : > { %2277 = vmatprep.mubr.f32.mxu0 %v3140_v59  ;;  %2102 = vmatmul.mubr.f32.gmra.mrb[4].mxu1 %v3290_v62  ;;  %v1670_v59 = vld [vmem:[%s3438_s1 + $0x1d0] sm:$0xff] }
  0x71   : > { %2478 = vmatpush3.bf16.msra.mxu1 %v2475_v46  ;;  %2278 = vmatmul.mubr.f32.gmra.mrb[4].mxu0 %v3162_v18  ;;  %v1734_v18 = vld [vmem:[%s3438_s1 + $0x3d0] sm:$0xff]  ;;  %v2487_v17 = vpack.c.bf16 %v1671_v13, %v1670_v59  ;;  %v1744_v46 = vld [vmem:[%s3438_s1 + $0x420] sm:$0xff] }
  0x72   : > { %2606 = vmatpush3.bf16.msra.mxu0 %v2603_v49  ;;  %2480 = vmatprep.subr.bf16.mxu1 %v2479_v1  ;;  %v2615_v20 = vpack.c.bf16 %v1735_v15, %v1734_v18  ;;  %v2635_v49 = vpack.c.bf16 %v1745_v47, %v1744_v46 }
  0x73   : > { %2608 = vmatprep.subr.bf16.mxu0 %v2607_v39  ;;  %2104 = vmatprep.mubr.f32.mxu1 %v3308_v8 }
  0x74   : > { %2280 = vmatprep.mubr.f32.mxu0 %v3166_v22  ;;  %2105 = vmatmul.mubr.f32.gmra.mrb[6].mxu1 %v3312_v9  ;;  %v1736_v22 = vld [vmem:[%s3438_s1 + $0x3e0] sm:$0xff] }
  0x75   : > { %2482 = vmatpush3.bf16.msra.mxu1 %v2479_v1  ;;  %2281 = vmatmul.mubr.f32.gmra.mrb[6].mxu0 %v3069_v11  ;;  %v1737_v11 = vld [vmem:[%s3438_s1 + $0x3e8] sm:$0xff] }
  0x76   : > { %2610 = vmatpush3.bf16.msra.mxu0 %v2607_v39  ;;  %2484 = vmatprep.subr.bf16.mxu1 %v2483_v10  ;;  %v2619_v27 = vpack.c.bf16 %v1737_v11, %v1736_v22 }
  0x77   : > { %2612 = vmatprep.subr.bf16.mxu0 %v2611_v12  ;;  %2139 = vmatprep.mubr.f32.mxu1 %v2962_v19  ;;  %v1674_v19 = vld [vmem:[%s3438_s1 + $0x1f0] sm:$0xff] }
  0x78   : > { %2315 = vmatprep.mubr.f32.mxu0 %v2915_v60  ;;  %v1739_v60 = vld [vmem:[%s3438_s1 + $0x3f8] sm:$0xff]  ;;  %v2495_v32 = vpack.c.bf16 %v1675_v29, %v1674_v19 }
  0x79   : > { %2486 = vmatpush3.bf16.msra.mxu1 %v2483_v10  ;;  %v2623_v33 = vpack.c.bf16 %v1739_v60, %v1738_v30 }
  0x7a   : > { %2614 = vmatpush3.bf16.msra.mxu0 %v2611_v12  ;;  %2488 = vmatprep.subr.bf16.mxu1 %v2487_v17 }
  0x7b   : > { %2616 = vmatprep.subr.bf16.mxu0 %v2615_v20 }
  0x7d   : > { %2490 = vmatpush3.bf16.msra.mxu1 %v2487_v17 }
  0x7e   : > { %2618 = vmatpush3.bf16.msra.mxu0 %v2615_v20  ;;  %2492 = vmatprep.subr.bf16.mxu1 %v2491_v25 }
  0x7f   : > { %2620 = vmatprep.subr.bf16.mxu0 %v2619_v27 }
  0x81   : > { %2494 = vmatpush3.bf16.msra.mxu1 %v2491_v25 }
  0x82   : > { %2622 = vmatpush3.bf16.msra.mxu0 %v2619_v27  ;;  %2496 = vmatprep.subr.bf16.mxu1 %v2495_v32 }
  0x83   : > { %2624 = vmatprep.subr.bf16.mxu0 %v2623_v33 }
  0x85   : > { %2498 = vmatpush3.bf16.msra.mxu1 %v2495_v32 }
  0x86   : > { %2626 = vmatpush3.bf16.msra.mxu0 %v2623_v33  ;;  %2659 = vmatprep.subr.bf16.mxu1 %v2627_v40 }
  0x87   : > { %2628 = vmatprep.subr.bf16.mxu0 %v2627_v40 }
  0x88   : > { %2140 = vmatmul.mubr.f32.vlgmr.msra.gmra.mrb[0].mxu1 %v3038_v56  ;;  %v1746_v56 = vld [vmem:[%s3438_s1 + $0x430] sm:$0xff] }
  0x89   : > { %2316 = vmatmul.mubr.f32.vlgmr.msra.gmra.mrb[0].mxu0 %v2932_v4  ;;  %2667 = vmatpush3.bf16.msra.mxu1 %v2627_v40  ;;  %v2639_v4 = vpack.c.bf16 %v1747_v50, %v1746_v56 }
  0x8a   : > { %2630 = vmatpush3.bf16.msra.mxu0 %v2627_v40  ;;  %2142 = vmatprep.mubr.f32.mxu1 %v3049_v0  ;;  %v1749_v0 = vld [vmem:[%s3438_s1 + $0x448] sm:$0xff] }
  0x8b   : > { %2318 = vmatprep.mubr.f32.mxu0 %v2936_v6  ;;  %2632 = vmatprep.subr.bf16.mxu0 %v2631_v45  ;;  %v1748_v6 = vld [vmem:[%s3438_s1 + $0x440] sm:$0xff] }
  0x8c   : > { %2143 = vmatmul.mubr.f32.gmra.mrb[2].mxu1 %v3053_v2  ;;  %2660 = vmatprep.subr.bf16.mxu1 %v2631_v45  ;;  %v1750_v2 = vld [vmem:[%s3438_s1 + $0x450] sm:$0xff] }
  0x8d   : > { %2319 = vmatmul.mubr.f32.gmra.mrb[2].mxu0 %v2954_v14  ;;  %2668 = vmatpush3.bf16.msra.mxu1 %v2631_v45  ;;  %v231_v14 = vld [vmem:[%s2838_s24 + $0x208] sm:$0xff] }
  0x8e   : > { %2634 = vmatpush3.bf16.msra.mxu0 %v2631_v45  ;;  %2145 = vmatprep.mubr.f32.mxu1 %v3082_v24  ;;  %v1751_v24 = vld [vmem:[%s3438_s1 + $0x458] sm:$0xff] }
  0x8f   : > { %2321 = vmatprep.mubr.f32.mxu0 %v2958_v16  ;;  %2636 = vmatprep.subr.bf16.mxu0 %v2635_v49  ;;  %v2643_v16 = vpack.c.bf16 %v1749_v0, %v1748_v6 }
  0x90   : > { %2146 = vmatmul.mubr.f32.gmra.mrb[4].mxu1 %v3090_v31  ;;  %2661 = vmatprep.subr.bf16.mxu1 %v2635_v49  ;;  %v1753_v31 = vld [vmem:[%s3438_s1 + $0x468] sm:$0xff] }
  0x91   : > { %2322 = vmatmul.mubr.f32.gmra.mrb[4].mxu0 %v2980_v26  ;;  %2669 = vmatpush3.bf16.msra.mxu1 %v2635_v49  ;;  %v2647_v26 = vpack.c.bf16 %v1751_v24, %v1750_v2 }
  0x92   : > { %2638 = vmatpush3.bf16.msra.mxu0 %v2635_v49  ;;  %2148 = vmatprep.mubr.f32.mxu1 %v3117_v48 }
  0x93   : > { %2324 = vmatprep.mubr.f32.mxu0 %v2984_v28  ;;  %2640 = vmatprep.subr.bf16.mxu0 %v2639_v4  ;;  %v1752_v28 = vld [vmem:[%s3438_s1 + $0x460] sm:$0xff] }
  0x94   : > { %2149 = vmatmul.mubr.f32.gmra.mrb[6].mxu1 %v3125_v52  ;;  %2662 = vmatprep.subr.bf16.mxu1 %v2639_v4  ;;  %v2651_v48 = vpack.c.bf16 %v1753_v31, %v1752_v28  ;;  %v1754_v52 = vld [vmem:[%s3438_s1 + $0x470] sm:$0xff] }
  0x95   : > { %2325 = vmatmul.mubr.f32.gmra.mrb[6].mxu0 %v231_v14  ;;  %2670 = vmatpush3.bf16.msra.mxu1 %v2639_v4  ;;  %v2655_v36 = vpack.c.bf16 %v1755_v51, %v1754_v52 }
  0x96   : > { %2642 = vmatpush3.bf16.msra.mxu0 %v2639_v4  ;;  %2663 = vmatprep.subr.bf16.mxu1 %v2643_v16 }
  0x97   : > { %2644 = vmatprep.subr.bf16.mxu0 %v2643_v16  ;;  %2359 = vmatprep.mubr.f32.mxu0 %v3240_v21 }
  0x98   : > { %2365 = vmatprep.mubr.f32.mxu1 %v3290_v62 }
  0x99   : > { %2671 = vmatpush3.bf16.msra.mxu1 %v2643_v16 }
  0x9a   : > { %2646 = vmatpush3.bf16.msra.mxu0 %v2643_v16  ;;  %2664 = vmatprep.subr.bf16.mxu1 %v2647_v26 }
  0x9b   : > { %2648 = vmatprep.subr.bf16.mxu0 %v2647_v26 }
  0x9d   : > { %2672 = vmatpush3.bf16.msra.mxu1 %v2647_v26 }
  0x9e   : > { %2650 = vmatpush3.bf16.msra.mxu0 %v2647_v26  ;;  %2665 = vmatprep.subr.bf16.mxu1 %v2651_v48 }
  0x9f   : > { %2652 = vmatprep.subr.bf16.mxu0 %v2651_v48 }
  0xa1   : > { %2673 = vmatpush3.bf16.msra.mxu1 %v2651_v48 }
  0xa2   : > { %2654 = vmatpush3.bf16.msra.mxu0 %v2651_v48  ;;  %2666 = vmatprep.subr.bf16.mxu1 %v2655_v36 }
  0xa3   : > { %2656 = vmatprep.subr.bf16.mxu0 %v2655_v36 }
  0xa5   : > { %2674 = vmatpush3.bf16.msra.mxu1 %v2655_v36 }
  0xa6   : > { %2658 = vmatpush3.bf16.msra.mxu0 %v2655_v36 }
  0xa8   : > { %2366 = vmatmul.mubr.f32.vlgmr.msra.gmra.mrb[8].mxu1 %v3308_v8 }
  0xa9   : > { %2360 = vmatmul.mubr.f32.vlgmr.msra.gmra.mrb[0].mxu0 %v3259_v37  ;;  %2368 = vmatprep.mubr.f32.mxu1 %v3312_v9 }
  0xaa   : > { %2362 = vmatprep.mubr.f32.mxu0 %v3264_v43 }
  0xac   : > { %2369 = vmatmul.mubr.f32.gmra.mrb[10].mxu1 %v3109_v42 }
  0xad   : > { %2363 = vmatmul.mubr.f32.gmra.mrb[2].mxu0 %v3285_v55 }
 0x15b   : > { %v2141_v21 = vpop.f32.mrb[0].mxu1 }
 0x15c   : > { %v738_v53 = vpop.f32.mrb[1].mxu1 }
 0x15f   : > { %v2144_v54 = vpop.f32.mrb[2].mxu1 }
 0x160   : > { %v748_v58 = vpop.f32.mrb[3].mxu1 }
 0x163   : > { %v2147_v61 = vpop.f32.mrb[4].mxu1 }
 0x164   : > { %v2323_v62 = vpop.f32.mrb[4].mxu0  ;;  %v758_v63 = vpop.f32.mrb[5].mxu1 }
 0x165   : > { %v2679_v1 = vadd.f32 %v2323_v62, %v2147_v61  ;;  %v1326_v39 = vpop.f32.mrb[5].mxu0 }
 0x166   : > { %v2681_v3 = vadd.f32 %v1326_v39, %v758_v63 }
 0x167   : > { %v2150_v37 = vpop.f32.mrb[6].mxu1 }
 0x168   : > { %v2326_v5 = vpop.f32.mrb[6].mxu0  ;;  %v768_v57 = vpop.f32.mrb[7].mxu1 }
 0x169   : > { %v2683_v7 = vadd.f32 %v2326_v5, %v2150_v37  ;;  %v1336_v43 = vpop.f32.mrb[7].mxu0 }
 0x16a   : > { %v2685_v8 = vadd.f32 %v1336_v43, %v768_v57 }
 0x17b   : > { %v2367_v42 = vpop.f32.mrb[8].mxu1 }
 0x17c   : > { %v2361_v55 = vpop.f32.mrb[0].mxu0  ;;  %v2680_v9 = vadd.f32 %v2679_v1, %v2367_v42  ;;  %v1462_v10 = vpop.f32.mrb[9].mxu1 }
 0x17d   : > { %v2675_v12 = vadd.f32 %v2361_v55, %v2141_v21  ;;  %v1442_v59 = vpop.f32.mrb[1].mxu0  ;;  %v2682_v13 = vadd.f32 %v2681_v3, %v1462_v10 }
 0x17e   : > { %1494 = vst [vmem:[%s177_s18 + $0x28] sm:$0xff] %v2680_v9  ;;  %v2676_v18 = vadd.f32 %v1442_v59, %v738_v53  ;;  %v1516_v45 = vmul.f32 %v2680_v9, %v2680_v9 }
 0x17f   : > { %1490 = vst [vmem:[%s177_s18 + $0x8] sm:$0xff] %v2675_v12  ;;  %v1512_v15 = vmul.f32 %v2675_v12, %v2675_v12  ;;  %1493 = vst [vmem:[%s177_s18 + $0x20] sm:$0xff] %v2682_v13  ;;  %v2370_v17 = vpop.f32.mrb[10].mxu1  ;;  %v1515_v40 = vmul.f32 %v2682_v13, %v2682_v13 }
 0x180   : > { %1489 = vst [vmem:[%s177_s18] sm:$0xff] %v2676_v18  ;;  %v1497_v20 = vadd.f32 %v2676_v18, %v2675_v12  ;;  %v1511_v38 = vmul.f32 %v2676_v18, %v2676_v18  ;;  %v2364_v23 = vpop.f32.mrb[2].mxu0  ;;  %v2684_v22 = vadd.f32 %v2683_v7, %v2370_v17  ;;  %v1472_v11 = vpop.f32.mrb[11].mxu1 }
 0x181   : > { %v2677_v25 = vadd.f32 %v2364_v23, %v2144_v54  ;;  %v1452_v27 = vpop.f32.mrb[3].mxu0  ;;  %v2686_v19 = vadd.f32 %v2685_v8, %v1472_v11 }
 0x182   : > { %v1519_v29 = vadd.f32 %v1512_v15, %v1511_v38  ;;  %1496 = vst [vmem:[%s177_s18 + $0x38] sm:$0xff] %v2684_v22  ;;  %v2678_v30 = vadd.f32 %v1452_v27, %v748_v58  ;;  %v1518_v4 = vmul.f32 %v2684_v22, %v2684_v22 }
 0x183   : > { %1492 = vst [vmem:[%s177_s18 + $0x18] sm:$0xff] %v2677_v25  ;;  %1495 = vst [vmem:[%s177_s18 + $0x30] sm:$0xff] %v2686_v19  ;;  %v1514_v33 = vmul.f32 %v2677_v25, %v2677_v25  ;;  %v1517_v56 = vmul.f32 %v2686_v19, %v2686_v19 }
 0x184   : > { %1491 = vst [vmem:[%s177_s18 + $0x10] sm:$0xff] %v2678_v30  ;;  %v1498_v60 = vadd.f32 %v2678_v30, %v1497_v20  ;;  %v1513_v32 = vmul.f32 %v2678_v30, %v2678_v30 }
 0x186   : > { %v1499_v34 = vadd.f32 %v2677_v25, %v1498_v60  ;;  %v1520_v35 = vadd.f32 %v1519_v29, %v1513_v32 }
 0x188   : > { %v1521_v41 = vadd.f32 %v1520_v35, %v1514_v33  ;;  %v1500_v44 = vadd.f32 %v2682_v13, %v1499_v34 }
 0x18a   : > { %v1501_v46 = vadd.f32 %v2680_v9, %v1500_v44  ;;  %v1522_v47 = vadd.f32 %v1521_v41, %v1515_v40 }
 0x18c   : > { %v1502_v49 = vadd.f32 %v2686_v19, %v1501_v46  ;;  %v1523_v50 = vadd.f32 %v1522_v47, %v1516_v45 }
 0x18e   : > { %v1503_v6 = vadd.f32 %v2684_v22, %v1502_v49  ;;  %v1524_v0 = vadd.f32 %v1523_v50, %v1517_v56 }
 0x190   : > { %v1504_v14 = vrot.slane %v1503_v6, 4  ;;  %v1525_v16 = vadd.f32 %v1524_v0, %v1518_v4 }
 0x192   : > { %v1505_v2 = vadd.f32 %v1504_v14, %v1503_v6  ;;  %v1526_v24 = vrot.slane %v1525_v16, 4 }
 0x194   : > { %v1506_v26 = vrot.slane %v1505_v2, 2  ;;  %v1527_v28 = vadd.f32 %v1526_v24, %v1525_v16 }
 0x196   : > { %v1507_v31 = vadd.f32 %v1506_v26, %v1505_v2  ;;  %v1528_v48 = vrot.slane %v1527_v28, 2 }
 0x198   : > { %v1508_v52 = vrot.slane %v1507_v31, 1  ;;  %v1529_v51 = vadd.f32 %v1528_v48, %v1527_v28 }
 0x19a   : > { %v1509_v36 = vadd.f32 %v1508_v52, %v1507_v31  ;;  %v1530_v21 = vrot.slane %v1529_v51, 1 }
 0x19c   : > { %1510 = vst [vmem:[%s181_s22] sm:$0x1] %v1509_v36  ;;  %v1531_v53 = vadd.f32 %v1530_v21, %v1529_v51 }
 0x19e   : > { %1532 = vst [vmem:[%s181_s22 + $0x1] sm:$0x1] %v1531_v53 }
 0x19f PF: > { %s14_s12 = sadd.s32 1, %s2754_s12  }
 0x1a0   : > { %p11_p4 = scmp.ge.s32.totalorder %s14_s12, 4  }
 0x1a2   :  { %13 = sbr.rel (!%p11_p4) target bundleno = 1 (0x1), region = 78 }

// kernel: bottleneck_block.9
= control target key start
LH: loop header
LB: loop body
LE: loop exit
PB: predicated region body
PF: predicated region fallthrough
CT: control target
= control target key end

     0   :  { %s702_s1 = inlined_call_operand.vmem [shape: f32[128,128], index: 1, kind: input, shape index: {}]   ;;  %s703_s0 = inlined_call_operand.vmem [shape: f32[128,128], index: 0, kind: input, shape index: {}]   ;;  %s704_s2 = inlined_call_operand.vmem [shape: f32[1,128], index: 2, kind: input, shape index: {}]   ;;  %s705_s3 = inlined_call_operand.vmem [shape: f32[1,128], index: 3, kind: input, shape index: {}]   ;;  %s706_s4 = inlined_call_operand.vmem [shape: f32[128,128], index: 4, kind: output, shape index: {0}]   ;;  %s707_s5 = inlined_call_operand.vmem [shape: f32[1,2,128], index: 5, kind: output, shape index: {1}]  }
   0x1   :  { %v97_v0 = vld [vmem:[%s702_s1] sm:$0xff]  ;;  %v98_v1 = vld [vmem:[%s702_s1 + $0x8] sm:$0xff]  ;;  %v99_v2 = vld [vmem:[%s702_s1 + $0x10] sm:$0xff] }
   0x2   :  { %v432_v3 = vpack.c.bf16 %v98_v1, %v97_v0  ;;  %v100_v4 = vld [vmem:[%s702_s1 + $0x18] sm:$0xff]  ;;  %v101_v6 = vld [vmem:[%s702_s1 + $0x20] sm:$0xff]  ;;  %v102_v7 = vld [vmem:[%s702_s1 + $0x28] sm:$0xff] }
   0x3   :  { %v436_v5 = vpack.c.bf16 %v100_v4, %v99_v2  ;;  %v440_v8 = vpack.c.bf16 %v102_v7, %v101_v6  ;;  %v19_v9 = vld [vmem:[%s703_s0] sm:$0xff]  ;;  %v103_v11 = vld [vmem:[%s702_s1 + $0x30] sm:$0xff]  ;;  %v104_v12 = vld [vmem:[%s702_s1 + $0x38] sm:$0xff] }
   0x4   :  { %433 = vmatprep.subr.bf16.mxu0 %v432_v3  ;;  %464 = vmatprep.subr.bf16.mxu1 %v432_v3  ;;  %v534_v10 = vld [vmem:[%s704_s2] ss:$0 sm:$0xff]  ;;  %v444_v16 = vpack.c.bf16 %v104_v12, %v103_v11  ;;  %v106_v19 = vld [vmem:[%s702_s1 + $0x48] sm:$0xff]  ;;  %v107_v23 = vld [vmem:[%s702_s1 + $0x50] sm:$0xff] }
   0x5   :  { %435 = vmatpush3.bf16.msra.mxu0 %v432_v3  ;;  %472 = vmatpush3.bf16.msra.mxu1 %v432_v3  ;;  %v42_v13 = vmul.f32 %v534_v10, %v19_v9  ;;  %v546_v14 = vld [vmem:[%s705_s3] ss:$0 sm:$0xff]  ;;  %v108_v24 = vld [vmem:[%s702_s1 + $0x58] sm:$0xff]  ;;  %v110_v29 = vld [vmem:[%s702_s1 + $0x68] sm:$0xff] }
   0x6   :  { %437 = vmatprep.subr.bf16.mxu0 %v436_v5  ;;  %465 = vmatprep.subr.bf16.mxu1 %v436_v5  ;;  %v27_v17 = vld [vmem:[%s703_s0 + $0x40] sm:$0xff]  ;;  %v452_v27 = vpack.c.bf16 %v108_v24, %v107_v23  ;;  %v20_v30 = vld [vmem:[%s703_s0 + $0x8] sm:$0xff]  ;;  %v21_v33 = vld [vmem:[%s703_s0 + $0x10] sm:$0xff] }
   0x7   :  { %v65_v15 = vadd.f32 %v546_v14, %v42_v13  ;;  %v105_v18 = vld [vmem:[%s702_s1 + $0x40] sm:$0xff]  ;;  %v50_v21 = vmul.f32 %v534_v10, %v27_v17  ;;  %v28_v31 = vld [vmem:[%s703_s0 + $0x48] sm:$0xff]  ;;  %v29_v34 = vld [vmem:[%s703_s0 + $0x50] sm:$0xff]  ;;  %v43_v37 = vmul.f32 %v534_v10, %v20_v30  ;;  %v44_v41 = vmul.f32 %v534_v10, %v21_v33 }
   0x8   :  { %v448_v22 = vpack.c.bf16 %v106_v19, %v105_v18  ;;  %v109_v28 = vld [vmem:[%s702_s1 + $0x60] sm:$0xff]  ;;  %v111_v35 = vld [vmem:[%s702_s1 + $0x70] sm:$0xff]  ;;  %v112_v36 = vld [vmem:[%s702_s1 + $0x78] sm:$0xff]  ;;  %v51_v40 = vmul.f32 %v534_v10, %v28_v31  ;;  %v52_v42 = vmul.f32 %v534_v10, %v29_v34 }
   0x9   :  { %439 = vmatpush3.bf16.msra.mxu0 %v436_v5  ;;  %473 = vmatpush3.bf16.msra.mxu1 %v436_v5  ;;  %v81_v20 = vmax.f32 %v65_v15, 0.0  ;;  %v73_v25 = vadd.f32 %v546_v14, %v50_v21  ;;  %v456_v32 = vpack.c.bf16 %v110_v29, %v109_v28  ;;  %v22_v38 = vld [vmem:[%s703_s0 + $0x18] sm:$0xff]  ;;  %v23_v39 = vld [vmem:[%s703_s0 + $0x20] sm:$0xff]  ;;  %v460_v44 = vpack.c.bf16 %v112_v36, %v111_v35  ;;  %v24_v49 = vld [vmem:[%s703_s0 + $0x28] sm:$0xff] }
   0xa   :  { %441 = vmatprep.subr.bf16.mxu0 %v440_v8  ;;  %466 = vmatprep.subr.bf16.mxu1 %v440_v8  ;;  %v30_v43 = vld [vmem:[%s703_s0 + $0x58] sm:$0xff]  ;;  %v31_v45 = vld [vmem:[%s703_s0 + $0x60] sm:$0xff]  ;;  %v45_v46 = vmul.f32 %v534_v10, %v22_v38  ;;  %v46_v47 = vmul.f32 %v534_v10, %v23_v39  ;;  %v66_v48 = vadd.f32 %v546_v14, %v43_v37  ;;  %v25_v50 = vld [vmem:[%s703_s0 + $0x30] sm:$0xff] }
   0xb   :  { %408 = vmatprep.mubr.f32.mxu0 %v81_v20  ;;  %v89_v26 = vmax.f32 %v73_v25, 0.0  ;;  %v74_v51 = vadd.f32 %v546_v14, %v51_v40  ;;  %v53_v52 = vmul.f32 %v534_v10, %v30_v43  ;;  %v67_v53 = vadd.f32 %v546_v14, %v44_v41  ;;  %v32_v56 = vld [vmem:[%s703_s0 + $0x68] sm:$0xff]  ;;  %v33_v57 = vld [vmem:[%s703_s0 + $0x70] sm:$0xff]  ;;  %v26_v63 = vld [vmem:[%s703_s0 + $0x38] sm:$0xff] }
   0xc   :  { %v75_v54 = vadd.f32 %v546_v14, %v52_v42  ;;  %v54_v55 = vmul.f32 %v534_v10, %v31_v45  ;;  %v68_v58 = vadd.f32 %v546_v14, %v45_v46  ;;  %v69_v59 = vadd.f32 %v546_v14, %v46_v47  ;;  %v34_v7 = vld [vmem:[%s703_s0 + $0x78] sm:$0xff] }
   0xd   :  { %443 = vmatpush3.bf16.msra.mxu0 %v440_v8  ;;  %474 = vmatpush3.bf16.msra.mxu1 %v440_v8  ;;  %v47_v60 = vmul.f32 %v534_v10, %v24_v49  ;;  %v48_v61 = vmul.f32 %v534_v10, %v25_v50  ;;  %v82_v62 = vmax.f32 %v66_v48, 0.0  ;;  %v90_v0 = vmax.f32 %v74_v51, 0.0 }
   0xe   :  { %445 = vmatprep.subr.bf16.mxu0 %v444_v16  ;;  %467 = vmatprep.subr.bf16.mxu1 %v444_v16  ;;  %v76_v1 = vadd.f32 %v546_v14, %v53_v52  ;;  %v55_v2 = vmul.f32 %v534_v10, %v32_v56  ;;  %v83_v3 = vmax.f32 %v67_v53, 0.0  ;;  %v91_v4 = vmax.f32 %v75_v54, 0.0 }
   0xf   :  { %420 = vmatprep.mubr.f32.mxu1 %v89_v26  ;;  %v77_v5 = vadd.f32 %v546_v14, %v54_v55  ;;  %v56_v6 = vmul.f32 %v534_v10, %v33_v57  ;;  %v70_v8 = vadd.f32 %v546_v14, %v47_v60  ;;  %v49_v9 = vmul.f32 %v534_v10, %v26_v63 }
  0x10   :  { %v84_v11 = vmax.f32 %v68_v58, 0.0  ;;  %v92_v12 = vmax.f32 %v76_v1, 0.0  ;;  %v78_v13 = vadd.f32 %v546_v14, %v55_v2  ;;  %v57_v15 = vmul.f32 %v534_v10, %v34_v7 }
  0x11   :  { %447 = vmatpush3.bf16.msra.mxu0 %v444_v16  ;;  %475 = vmatpush3.bf16.msra.mxu1 %v444_v16  ;;  %v85_v16 = vmax.f32 %v69_v59, 0.0  ;;  %v71_v17 = vadd.f32 %v546_v14, %v48_v61  ;;  %v93_v18 = vmax.f32 %v77_v5, 0.0  ;;  %v79_v19 = vadd.f32 %v546_v14, %v56_v6 }
  0x12   :  { %449 = vmatprep.subr.bf16.mxu0 %v448_v22  ;;  %468 = vmatprep.subr.bf16.mxu1 %v448_v22  ;;  %v86_v20 = vmax.f32 %v70_v8, 0.0  ;;  %v72_v21 = vadd.f32 %v546_v14, %v49_v9  ;;  %v80_v23 = vadd.f32 %v546_v14, %v57_v15 }
  0x13   :  { %v87_v24 = vmax.f32 %v71_v17, 0.0  ;;  %v95_v10 = vmax.f32 %v79_v19, 0.0 }
  0x14   :  { %v88_v25 = vmax.f32 %v72_v21, 0.0  ;;  %v96_v26 = vmax.f32 %v80_v23, 0.0 }
  0x15   :  { %451 = vmatpush3.bf16.msra.mxu0 %v448_v22  ;;  %476 = vmatpush3.bf16.msra.mxu1 %v448_v22  ;;  %v94_v22 = vmax.f32 %v78_v13, 0.0 }
  0x16   :  { %453 = vmatprep.subr.bf16.mxu0 %v452_v27  ;;  %469 = vmatprep.subr.bf16.mxu1 %v452_v27 }
  0x19   :  { %455 = vmatpush3.bf16.msra.mxu0 %v452_v27  ;;  %477 = vmatpush3.bf16.msra.mxu1 %v452_v27 }
  0x1a   :  { %457 = vmatprep.subr.bf16.mxu0 %v456_v32  ;;  %470 = vmatprep.subr.bf16.mxu1 %v456_v32 }
  0x1d   :  { %459 = vmatpush3.bf16.msra.mxu0 %v456_v32  ;;  %478 = vmatpush3.bf16.msra.mxu1 %v456_v32 }
  0x1e   :  { %461 = vmatprep.subr.bf16.mxu0 %v460_v44  ;;  %471 = vmatprep.subr.bf16.mxu1 %v460_v44 }
  0x21   :  { %463 = vmatpush3.bf16.msra.mxu0 %v460_v44  ;;  %479 = vmatpush3.bf16.msra.mxu1 %v460_v44 }
  0x24   :  { %409 = vmatmul.mubr.f32.vlgmr.msra.gmra.mrb[0].mxu0 %v82_v62  ;;  %421 = vmatmul.mubr.f32.vlgmr.msra.gmra.mrb[0].mxu1 %v90_v0 }
  0x25   :  { %411 = vmatprep.mubr.f32.mxu0 %v83_v3  ;;  %423 = vmatprep.mubr.f32.mxu1 %v91_v4 }
  0x28   :  { %412 = vmatmul.mubr.f32.gmra.mrb[2].mxu0 %v84_v11  ;;  %424 = vmatmul.mubr.f32.gmra.mrb[2].mxu1 %v92_v12 }
  0x29   :  { %414 = vmatprep.mubr.f32.mxu0 %v85_v16  ;;  %426 = vmatprep.mubr.f32.mxu1 %v93_v18 }
  0x2c   :  { %415 = vmatmul.mubr.f32.gmra.mrb[4].mxu0 %v86_v20  ;;  %427 = vmatmul.mubr.f32.gmra.mrb[4].mxu1 %v94_v22 }
  0x2d   :  { %417 = vmatprep.mubr.f32.mxu0 %v87_v24  ;;  %429 = vmatprep.mubr.f32.mxu1 %v95_v10 }
  0x30   :  { %418 = vmatmul.mubr.f32.gmra.mrb[6].mxu0 %v88_v25  ;;  %430 = vmatmul.mubr.f32.gmra.mrb[6].mxu1 %v96_v26 }
  0xf7   :  { %v410_v27 = vpop.f32.mrb[0].mxu0  ;;  %v422_v28 = vpop.f32.mrb[0].mxu1 }
  0xf8   :  { %259 = vst [vmem:[%s706_s4 + $0x8] sm:$0xff] %v410_v27  ;;  %v297_v29 = vmul.f32 %v410_v27, %v410_v27  ;;  %v179_v14 = vpop.f32.mrb[1].mxu0  ;;  %267 = vst [vmem:[%s706_s4 + $0x48] sm:$0xff] %v422_v28  ;;  %v219_v30 = vpop.f32.mrb[1].mxu1  ;;  %v305_v2 = vmul.f32 %v422_v28, %v422_v28 }
  0xf9   :  { %258 = vst [vmem:[%s706_s4] sm:$0xff] %v179_v14  ;;  %v274_v31 = vadd.f32 %v410_v27, %v179_v14  ;;  %v296_v32 = vmul.f32 %v179_v14, %v179_v14  ;;  %266 = vst [vmem:[%s706_s4 + $0x40] sm:$0xff] %v219_v30  ;;  %v304_v63 = vmul.f32 %v219_v30, %v219_v30 }
  0xfb   :  { %v312_v33 = vadd.f32 %v297_v29, %v296_v32  ;;  %v413_v34 = vpop.f32.mrb[2].mxu0  ;;  %v425_v35 = vpop.f32.mrb[2].mxu1 }
  0xfc   :  { %261 = vst [vmem:[%s706_s4 + $0x18] sm:$0xff] %v413_v34  ;;  %v189_v36 = vpop.f32.mrb[3].mxu0  ;;  %269 = vst [vmem:[%s706_s4 + $0x58] sm:$0xff] %v425_v35  ;;  %v229_v37 = vpop.f32.mrb[3].mxu1  ;;  %v299_v40 = vmul.f32 %v413_v34, %v413_v34  ;;  %v307_v8 = vmul.f32 %v425_v35, %v425_v35 }
  0xfd   :  { %260 = vst [vmem:[%s706_s4 + $0x10] sm:$0xff] %v189_v36  ;;  %v275_v38 = vadd.f32 %v274_v31, %v189_v36  ;;  %v298_v39 = vmul.f32 %v189_v36, %v189_v36  ;;  %268 = vst [vmem:[%s706_s4 + $0x50] sm:$0xff] %v229_v37  ;;  %v306_v5 = vmul.f32 %v229_v37, %v229_v37 }
  0xff   :  { %v313_v41 = vadd.f32 %v312_v33, %v298_v39  ;;  %v416_v42 = vpop.f32.mrb[4].mxu0  ;;  %v276_v43 = vadd.f32 %v413_v34, %v275_v38  ;;  %v428_v44 = vpop.f32.mrb[4].mxu1 }
 0x100   :  { %263 = vst [vmem:[%s706_s4 + $0x28] sm:$0xff] %v416_v42  ;;  %v199_v45 = vpop.f32.mrb[5].mxu0  ;;  %271 = vst [vmem:[%s706_s4 + $0x68] sm:$0xff] %v428_v44  ;;  %v239_v46 = vpop.f32.mrb[5].mxu1  ;;  %v301_v50 = vmul.f32 %v416_v42, %v416_v42  ;;  %v309_v16 = vmul.f32 %v428_v44, %v428_v44 }
 0x101   :  { %262 = vst [vmem:[%s706_s4 + $0x20] sm:$0xff] %v199_v45  ;;  %v277_v47 = vadd.f32 %v276_v43, %v199_v45  ;;  %v300_v48 = vmul.f32 %v199_v45, %v199_v45  ;;  %v314_v49 = vadd.f32 %v313_v41, %v299_v40  ;;  %270 = vst [vmem:[%s706_s4 + $0x60] sm:$0xff] %v239_v46 }
 0x102   :  { %v308_v12 = vmul.f32 %v239_v46, %v239_v46 }
 0x103   :  { %v315_v51 = vadd.f32 %v314_v49, %v300_v48  ;;  %v419_v52 = vpop.f32.mrb[6].mxu0  ;;  %v278_v53 = vadd.f32 %v416_v42, %v277_v47  ;;  %v431_v54 = vpop.f32.mrb[6].mxu1 }
 0x104   :  { %265 = vst [vmem:[%s706_s4 + $0x38] sm:$0xff] %v419_v52  ;;  %v209_v55 = vpop.f32.mrb[7].mxu0  ;;  %273 = vst [vmem:[%s706_s4 + $0x78] sm:$0xff] %v431_v54  ;;  %v249_v56 = vpop.f32.mrb[7].mxu1  ;;  %v303_v60 = vmul.f32 %v419_v52, %v419_v52  ;;  %v311_v22 = vmul.f32 %v431_v54, %v431_v54 }
 0x105   :  { %264 = vst [vmem:[%s706_s4 + $0x30] sm:$0xff] %v209_v55  ;;  %v279_v57 = vadd.f32 %v278_v53, %v209_v55  ;;  %v302_v58 = vmul.f32 %v209_v55, %v209_v55  ;;  %v316_v59 = vadd.f32 %v315_v51, %v301_v50  ;;  %272 = vst [vmem:[%s706_s4 + $0x70] sm:$0xff] %v249_v56 }
 0x106   :  { %v310_v19 = vmul.f32 %v249_v56, %v249_v56 }
 0x107   :  { %v280_v61 = vadd.f32 %v419_v52, %v279_v57  ;;  %v317_v62 = vadd.f32 %v316_v59, %v302_v58 }
 0x109   :  { %v318_v0 = vadd.f32 %v317_v62, %v303_v60  ;;  %v281_v1 = vadd.f32 %v280_v61, %v219_v30 }
 0x10b   :  { %v319_v3 = vadd.f32 %v318_v0, %v304_v63  ;;  %v282_v4 = vadd.f32 %v422_v28, %v281_v1 }
 0x10d   :  { %v283_v6 = vadd.f32 %v282_v4, %v229_v37  ;;  %v320_v7 = vadd.f32 %v319_v3, %v305_v2 }
 0x10f   :  { %v321_v9 = vadd.f32 %v320_v7, %v306_v5  ;;  %v284_v11 = vadd.f32 %v425_v35, %v283_v6 }
 0x111   :  { %v285_v13 = vadd.f32 %v284_v11, %v239_v46  ;;  %v322_v15 = vadd.f32 %v321_v9, %v307_v8 }
 0x113   :  { %v323_v17 = vadd.f32 %v322_v15, %v308_v12  ;;  %v286_v18 = vadd.f32 %v428_v44, %v285_v13 }
 0x115   :  { %v287_v20 = vadd.f32 %v286_v18, %v249_v56  ;;  %v324_v21 = vadd.f32 %v323_v17, %v309_v16 }
 0x117   :  { %v288_v23 = vadd.f32 %v431_v54, %v287_v20  ;;  %v325_v24 = vadd.f32 %v324_v21, %v310_v19 }
 0x119   :  { %v289_v10 = vrot.slane %v288_v23, 4  ;;  %v326_v25 = vadd.f32 %v325_v24, %v311_v22 }
 0x11b   :  { %v290_v26 = vadd.f32 %v289_v10, %v288_v23  ;;  %v327_v27 = vrot.slane %v326_v25, 4 }
 0x11d   :  { %v291_v28 = vrot.slane %v290_v26, 2  ;;  %v328_v29 = vadd.f32 %v327_v27, %v326_v25 }
 0x11f   :  { %v292_v14 = vadd.f32 %v291_v28, %v290_v26  ;;  %v329_v30 = vrot.slane %v328_v29, 2 }
 0x121   :  { %v293_v31 = vrot.slane %v292_v14, 1  ;;  %v330_v32 = vadd.f32 %v329_v30, %v328_v29 }
 0x123   :  { %v294_v33 = vadd.f32 %v293_v31, %v292_v14  ;;  %v331_v34 = vrot.slane %v330_v32, 1 }
 0x125   :  { %295 = vst [vmem:[%s707_s5] sm:$0x1] %v294_v33  ;;  %v332_v35 = vadd.f32 %v331_v34, %v330_v32 }
 0x127   :  { %333 = vst [vmem:[%s707_s5 + $0x1] sm:$0x1] %v332_v35 }

// kernel: bottleneck_block.10
= control target key start
LH: loop header
LB: loop body
LE: loop exit
PB: predicated region body
PF: predicated region fallthrough
CT: control target
= control target key end

     0   :  { %s596_s1 = inlined_call_operand.vmem [shape: f32[128,128], index: 1, kind: input, shape index: {}]   ;;  %s597_s2 = inlined_call_operand.vmem [shape: f32[1,128], index: 2, kind: input, shape index: {}]   ;;  %s598_s3 = inlined_call_operand.vmem [shape: f32[1,128], index: 3, kind: input, shape index: {}]   ;;  %s599_s0 = inlined_call_operand.vmem [shape: f32[128,128], index: 0, kind: input, shape index: {}]   ;;  %s600_s4 = inlined_call_operand.vmem [shape: f32[128,128], index: 4, kind: output, shape index: {0}]   ;;  %s601_s5 = inlined_call_operand.vmem [shape: f32[1,2,128], index: 5, kind: output, shape index: {1}]  }
   0x1   :  { %v35_v0 = vld [vmem:[%s596_s1] sm:$0xff]  ;;  %v36_v1 = vld [vmem:[%s596_s1 + $0x8] sm:$0xff]  ;;  %v37_v2 = vld [vmem:[%s596_s1 + $0x10] sm:$0xff] }
   0x2   :  { %v368_v3 = vpack.c.bf16 %v36_v1, %v35_v0  ;;  %v38_v4 = vld [vmem:[%s596_s1 + $0x18] sm:$0xff]  ;;  %v39_v6 = vld [vmem:[%s596_s1 + $0x20] sm:$0xff]  ;;  %v40_v7 = vld [vmem:[%s596_s1 + $0x28] sm:$0xff] }
   0x3   :  { %v372_v5 = vpack.c.bf16 %v38_v4, %v37_v2  ;;  %v376_v8 = vpack.c.bf16 %v40_v7, %v39_v6  ;;  %v19_v9 = vld [vmem:[%s599_s0] sm:$0xff]  ;;  %v41_v10 = vld [vmem:[%s596_s1 + $0x30] sm:$0xff]  ;;  %v42_v11 = vld [vmem:[%s596_s1 + $0x38] sm:$0xff] }
   0x4   :  { %369 = vmatprep.subr.bf16.mxu0 %v368_v3  ;;  %400 = vmatprep.subr.bf16.mxu1 %v368_v3  ;;  %v27_v12 = vld [vmem:[%s599_s0 + $0x40] sm:$0xff]  ;;  %v380_v13 = vpack.c.bf16 %v42_v11, %v41_v10  ;;  %v44_v15 = vld [vmem:[%s596_s1 + $0x48] sm:$0xff]  ;;  %v45_v17 = vld [vmem:[%s596_s1 + $0x50] sm:$0xff] }
   0x5   :  { %371 = vmatpush3.bf16.msra.mxu0 %v368_v3  ;;  %408 = vmatpush3.bf16.msra.mxu1 %v368_v3  ;;  %v43_v14 = vld [vmem:[%s596_s1 + $0x40] sm:$0xff]  ;;  %v46_v18 = vld [vmem:[%s596_s1 + $0x58] sm:$0xff]  ;;  %v48_v21 = vld [vmem:[%s596_s1 + $0x68] sm:$0xff] }
   0x6   :  { %373 = vmatprep.subr.bf16.mxu0 %v372_v5  ;;  %401 = vmatprep.subr.bf16.mxu1 %v372_v5  ;;  %v384_v16 = vpack.c.bf16 %v44_v15, %v43_v14  ;;  %v388_v19 = vpack.c.bf16 %v46_v18, %v45_v17  ;;  %v47_v20 = vld [vmem:[%s596_s1 + $0x60] sm:$0xff]  ;;  %v49_v23 = vld [vmem:[%s596_s1 + $0x70] sm:$0xff]  ;;  %v50_v24 = vld [vmem:[%s596_s1 + $0x78] sm:$0xff] }
   0x7   :  { %344 = vmatprep.mubr.f32.mxu0 %v19_v9  ;;  %356 = vmatprep.mubr.f32.mxu1 %v27_v12  ;;  %v392_v22 = vpack.c.bf16 %v48_v21, %v47_v20  ;;  %v396_v25 = vpack.c.bf16 %v50_v24, %v49_v23  ;;  %v20_v26 = vld [vmem:[%s599_s0 + $0x8] sm:$0xff]  ;;  %v21_v28 = vld [vmem:[%s599_s0 + $0x10] sm:$0xff]  ;;  %v22_v30 = vld [vmem:[%s599_s0 + $0x18] sm:$0xff] }
   0x8   :  { %v28_v27 = vld [vmem:[%s599_s0 + $0x48] sm:$0xff]  ;;  %v29_v29 = vld [vmem:[%s599_s0 + $0x50] sm:$0xff]  ;;  %v30_v31 = vld [vmem:[%s599_s0 + $0x58] sm:$0xff] }
   0x9   :  { %375 = vmatpush3.bf16.msra.mxu0 %v372_v5  ;;  %409 = vmatpush3.bf16.msra.mxu1 %v372_v5  ;;  %v23_v32 = vld [vmem:[%s599_s0 + $0x20] sm:$0xff]  ;;  %v24_v34 = vld [vmem:[%s599_s0 + $0x28] sm:$0xff]  ;;  %v25_v36 = vld [vmem:[%s599_s0 + $0x30] sm:$0xff] }
   0xa   :  { %377 = vmatprep.subr.bf16.mxu0 %v376_v8  ;;  %402 = vmatprep.subr.bf16.mxu1 %v376_v8  ;;  %v31_v33 = vld [vmem:[%s599_s0 + $0x60] sm:$0xff]  ;;  %v32_v35 = vld [vmem:[%s599_s0 + $0x68] sm:$0xff]  ;;  %v33_v37 = vld [vmem:[%s599_s0 + $0x70] sm:$0xff] }
   0xb   :  { %v26_v38 = vld [vmem:[%s599_s0 + $0x38] sm:$0xff] }
   0xc   :  { %v34_v39 = vld [vmem:[%s599_s0 + $0x78] sm:$0xff] }
   0xd   :  { %379 = vmatpush3.bf16.msra.mxu0 %v376_v8  ;;  %410 = vmatpush3.bf16.msra.mxu1 %v376_v8 }
   0xe   :  { %381 = vmatprep.subr.bf16.mxu0 %v380_v13  ;;  %403 = vmatprep.subr.bf16.mxu1 %v380_v13 }
  0x11   :  { %383 = vmatpush3.bf16.msra.mxu0 %v380_v13  ;;  %411 = vmatpush3.bf16.msra.mxu1 %v380_v13 }
  0x12   :  { %385 = vmatprep.subr.bf16.mxu0 %v384_v16  ;;  %404 = vmatprep.subr.bf16.mxu1 %v384_v16 }
  0x15   :  { %387 = vmatpush3.bf16.msra.mxu0 %v384_v16  ;;  %412 = vmatpush3.bf16.msra.mxu1 %v384_v16 }
  0x16   :  { %389 = vmatprep.subr.bf16.mxu0 %v388_v19  ;;  %405 = vmatprep.subr.bf16.mxu1 %v388_v19 }
  0x19   :  { %391 = vmatpush3.bf16.msra.mxu0 %v388_v19  ;;  %413 = vmatpush3.bf16.msra.mxu1 %v388_v19 }
  0x1a   :  { %393 = vmatprep.subr.bf16.mxu0 %v392_v22  ;;  %406 = vmatprep.subr.bf16.mxu1 %v392_v22 }
  0x1d   :  { %395 = vmatpush3.bf16.msra.mxu0 %v392_v22  ;;  %414 = vmatpush3.bf16.msra.mxu1 %v392_v22 }
  0x1e   :  { %397 = vmatprep.subr.bf16.mxu0 %v396_v25  ;;  %407 = vmatprep.subr.bf16.mxu1 %v396_v25 }
  0x21   :  { %399 = vmatpush3.bf16.msra.mxu0 %v396_v25  ;;  %415 = vmatpush3.bf16.msra.mxu1 %v396_v25 }
  0x24   :  { %345 = vmatmul.mubr.f32.vlgmr.msra.gmra.mrb[0].mxu0 %v20_v26  ;;  %357 = vmatmul.mubr.f32.vlgmr.msra.gmra.mrb[0].mxu1 %v28_v27 }
  0x25   :  { %347 = vmatprep.mubr.f32.mxu0 %v21_v28  ;;  %359 = vmatprep.mubr.f32.mxu1 %v29_v29 }
  0x28   :  { %348 = vmatmul.mubr.f32.gmra.mrb[2].mxu0 %v22_v30  ;;  %360 = vmatmul.mubr.f32.gmra.mrb[2].mxu1 %v30_v31 }
  0x29   :  { %350 = vmatprep.mubr.f32.mxu0 %v23_v32  ;;  %362 = vmatprep.mubr.f32.mxu1 %v31_v33 }
  0x2c   :  { %351 = vmatmul.mubr.f32.gmra.mrb[4].mxu0 %v24_v34  ;;  %363 = vmatmul.mubr.f32.gmra.mrb[4].mxu1 %v32_v35 }
  0x2d   :  { %353 = vmatprep.mubr.f32.mxu0 %v25_v36  ;;  %365 = vmatprep.mubr.f32.mxu1 %v33_v37 }
  0x30   :  { %354 = vmatmul.mubr.f32.gmra.mrb[6].mxu0 %v26_v38  ;;  %366 = vmatmul.mubr.f32.gmra.mrb[6].mxu1 %v34_v39 }
  0xf7   :  { %v346_v40 = vpop.f32.mrb[0].mxu0  ;;  %v358_v41 = vpop.f32.mrb[0].mxu1 }
  0xf8   :  { %197 = vst [vmem:[%s600_s4 + $0x8] sm:$0xff] %v346_v40  ;;  %v235_v42 = vmul.f32 %v346_v40, %v346_v40  ;;  %v117_v43 = vpop.f32.mrb[1].mxu0  ;;  %205 = vst [vmem:[%s600_s4 + $0x48] sm:$0xff] %v358_v41  ;;  %v157_v44 = vpop.f32.mrb[1].mxu1  ;;  %v243_v16 = vmul.f32 %v358_v41, %v358_v41 }
  0xf9   :  { %196 = vst [vmem:[%s600_s4] sm:$0xff] %v117_v43  ;;  %v212_v45 = vadd.f32 %v346_v40, %v117_v43  ;;  %v234_v46 = vmul.f32 %v117_v43, %v117_v43  ;;  %204 = vst [vmem:[%s600_s4 + $0x40] sm:$0xff] %v157_v44  ;;  %v242_v13 = vmul.f32 %v157_v44, %v157_v44 }
  0xfb   :  { %v250_v47 = vadd.f32 %v235_v42, %v234_v46  ;;  %v349_v48 = vpop.f32.mrb[2].mxu0  ;;  %v361_v49 = vpop.f32.mrb[2].mxu1 }
  0xfc   :  { %199 = vst [vmem:[%s600_s4 + $0x18] sm:$0xff] %v349_v48  ;;  %v127_v50 = vpop.f32.mrb[3].mxu0  ;;  %207 = vst [vmem:[%s600_s4 + $0x58] sm:$0xff] %v361_v49  ;;  %v167_v51 = vpop.f32.mrb[3].mxu1  ;;  %v237_v54 = vmul.f32 %v349_v48, %v349_v48  ;;  %v245_v22 = vmul.f32 %v361_v49, %v361_v49 }
  0xfd   :  { %198 = vst [vmem:[%s600_s4 + $0x10] sm:$0xff] %v127_v50  ;;  %v213_v52 = vadd.f32 %v212_v45, %v127_v50  ;;  %v236_v53 = vmul.f32 %v127_v50, %v127_v50  ;;  %206 = vst [vmem:[%s600_s4 + $0x50] sm:$0xff] %v167_v51  ;;  %v244_v19 = vmul.f32 %v167_v51, %v167_v51 }
  0xff   :  { %v251_v55 = vadd.f32 %v250_v47, %v236_v53  ;;  %v352_v56 = vpop.f32.mrb[4].mxu0  ;;  %v214_v57 = vadd.f32 %v349_v48, %v213_v52  ;;  %v364_v58 = vpop.f32.mrb[4].mxu1 }
 0x100   :  { %201 = vst [vmem:[%s600_s4 + $0x28] sm:$0xff] %v352_v56  ;;  %v137_v59 = vpop.f32.mrb[5].mxu0  ;;  %209 = vst [vmem:[%s600_s4 + $0x68] sm:$0xff] %v364_v58  ;;  %v177_v60 = vpop.f32.mrb[5].mxu1  ;;  %v239_v0 = vmul.f32 %v352_v56, %v352_v56  ;;  %v247_v28 = vmul.f32 %v364_v58, %v364_v58 }
 0x101   :  { %200 = vst [vmem:[%s600_s4 + $0x20] sm:$0xff] %v137_v59  ;;  %v215_v61 = vadd.f32 %v214_v57, %v137_v59  ;;  %v238_v62 = vmul.f32 %v137_v59, %v137_v59  ;;  %v252_v63 = vadd.f32 %v251_v55, %v237_v54  ;;  %208 = vst [vmem:[%s600_s4 + $0x60] sm:$0xff] %v177_v60 }
 0x102   :  { %v246_v25 = vmul.f32 %v177_v60, %v177_v60 }
 0x103   :  { %v253_v1 = vadd.f32 %v252_v63, %v238_v62  ;;  %v355_v2 = vpop.f32.mrb[6].mxu0  ;;  %v216_v3 = vadd.f32 %v352_v56, %v215_v61  ;;  %v367_v4 = vpop.f32.mrb[6].mxu1 }
 0x104   :  { %203 = vst [vmem:[%s600_s4 + $0x38] sm:$0xff] %v355_v2  ;;  %v147_v5 = vpop.f32.mrb[7].mxu0  ;;  %211 = vst [vmem:[%s600_s4 + $0x78] sm:$0xff] %v367_v4  ;;  %v187_v6 = vpop.f32.mrb[7].mxu1  ;;  %v241_v10 = vmul.f32 %v355_v2, %v355_v2  ;;  %v249_v34 = vmul.f32 %v367_v4, %v367_v4 }
 0x105   :  { %202 = vst [vmem:[%s600_s4 + $0x30] sm:$0xff] %v147_v5  ;;  %v217_v7 = vadd.f32 %v216_v3, %v147_v5  ;;  %v240_v8 = vmul.f32 %v147_v5, %v147_v5  ;;  %v254_v9 = vadd.f32 %v253_v1, %v239_v0  ;;  %210 = vst [vmem:[%s600_s4 + $0x70] sm:$0xff] %v187_v6 }
 0x106   :  { %v248_v31 = vmul.f32 %v187_v6, %v187_v6 }
 0x107   :  { %v218_v11 = vadd.f32 %v355_v2, %v217_v7  ;;  %v255_v12 = vadd.f32 %v254_v9, %v240_v8 }
 0x109   :  { %v256_v14 = vadd.f32 %v255_v12, %v241_v10  ;;  %v219_v15 = vadd.f32 %v218_v11, %v157_v44 }
 0x10b   :  { %v257_v17 = vadd.f32 %v256_v14, %v242_v13  ;;  %v220_v18 = vadd.f32 %v358_v41, %v219_v15 }
 0x10d   :  { %v221_v20 = vadd.f32 %v220_v18, %v167_v51  ;;  %v258_v21 = vadd.f32 %v257_v17, %v243_v16 }
 0x10f   :  { %v259_v23 = vadd.f32 %v258_v21, %v244_v19  ;;  %v222_v24 = vadd.f32 %v361_v49, %v221_v20 }
 0x111   :  { %v223_v26 = vadd.f32 %v222_v24, %v177_v60  ;;  %v260_v27 = vadd.f32 %v259_v23, %v245_v22 }
 0x113   :  { %v261_v29 = vadd.f32 %v260_v27, %v246_v25  ;;  %v224_v30 = vadd.f32 %v364_v58, %v223_v26 }
 0x115   :  { %v225_v32 = vadd.f32 %v224_v30, %v187_v6  ;;  %v262_v33 = vadd.f32 %v261_v29, %v247_v28 }
 0x117   :  { %v226_v35 = vadd.f32 %v367_v4, %v225_v32  ;;  %v263_v36 = vadd.f32 %v262_v33, %v248_v31 }
 0x119   :  { %v227_v37 = vrot.slane %v226_v35, 4  ;;  %v264_v38 = vadd.f32 %v263_v36, %v249_v34 }
 0x11b   :  { %v228_v39 = vadd.f32 %v227_v37, %v226_v35  ;;  %v265_v40 = vrot.slane %v264_v38, 4 }
 0x11d   :  { %v229_v41 = vrot.slane %v228_v39, 2  ;;  %v266_v42 = vadd.f32 %v265_v40, %v264_v38 }
 0x11f   :  { %v230_v43 = vadd.f32 %v229_v41, %v228_v39  ;;  %v267_v44 = vrot.slane %v266_v42, 2 }
 0x121   :  { %v231_v45 = vrot.slane %v230_v43, 1  ;;  %v268_v46 = vadd.f32 %v267_v44, %v266_v42 }
 0x123   :  { %v232_v47 = vadd.f32 %v231_v45, %v230_v43  ;;  %v269_v48 = vrot.slane %v268_v46, 1 }
 0x125   :  { %233 = vst [vmem:[%s601_s5] sm:$0x1] %v232_v47  ;;  %v270_v49 = vadd.f32 %v269_v48, %v268_v46 }
 0x127   :  { %271 = vst [vmem:[%s601_s5 + $0x1] sm:$0x1] %v270_v49 }

// kernel: bottleneck_block.11
= control target key start
LH: loop header
LB: loop body
LE: loop exit
PB: predicated region body
PF: predicated region fallthrough
CT: control target
= control target key end

     0   :  { %s466_s0 = inlined_call_operand.vmem [shape: f32[128,128], index: 0, kind: input, shape index: {}]   ;;  %s467_s1 = inlined_call_operand.vmem [shape: f32[128,128], index: 1, kind: input, shape index: {}]   ;;  %s468_s2 = inlined_call_operand.vmem [shape: f32[1,128], index: 2, kind: input, shape index: {}]   ;;  %s469_s3 = inlined_call_operand.vmem [shape: f32[1,128], index: 3, kind: input, shape index: {}]   ;;  %s470_s4 = inlined_call_operand.vmem [shape: f32[1,128], index: 4, kind: input, shape index: {}]   ;;  %s471_s5 = inlined_call_operand.vmem [shape: f32[1,128], index: 5, kind: input, shape index: {}]   ;;  %s472_s6 = inlined_call_operand.vmem [shape: f32[128,128], index: 6, kind: output, shape index: {}]  }
   0x1   :  { %v23_v0 = vld [vmem:[%s466_s0] sm:$0xff]  ;;  %v24_v8 = vld [vmem:[%s466_s0 + $0x8] sm:$0xff]  ;;  %v25_v10 = vld [vmem:[%s466_s0 + $0x10] sm:$0xff] }
   0x2   :  { %v244_v1 = vld [vmem:[%s468_s2] ss:$0 sm:$0xff]  ;;  %v86_v9 = vld [vmem:[%s467_s1 + $0x8] sm:$0xff]  ;;  %v87_v15 = vld [vmem:[%s467_s1 + $0x10] sm:$0xff] }
   0x3   :  { %v249_v2 = vld [vmem:[%s469_s3] ss:$0 sm:$0xff]  ;;  %v46_v3 = vmul.f32 %v244_v1, %v23_v0  ;;  %v47_v12 = vmul.f32 %v244_v1, %v24_v8  ;;  %v48_v14 = vmul.f32 %v244_v1, %v25_v10  ;;  %v26_v16 = vld [vmem:[%s466_s0 + $0x18] sm:$0xff]  ;;  %v28_v24 = vld [vmem:[%s466_s0 + $0x28] sm:$0xff] }
   0x4   :  { %v85_v4 = vld [vmem:[%s467_s1] sm:$0xff]  ;;  %v88_v17 = vld [vmem:[%s467_s1 + $0x18] sm:$0xff]  ;;  %v49_v20 = vmul.f32 %v244_v1, %v26_v16  ;;  %v90_v29 = vld [vmem:[%s467_s1 + $0x28] sm:$0xff]  ;;  %v51_v38 = vmul.f32 %v244_v1, %v28_v24 }
   0x5   :  { %v258_v5 = vld [vmem:[%s470_s4] ss:$0 sm:$0xff]  ;;  %v69_v11 = vadd.f32 %v249_v2, %v46_v3  ;;  %v70_v25 = vadd.f32 %v249_v2, %v47_v12  ;;  %v71_v27 = vadd.f32 %v249_v2, %v48_v14  ;;  %v29_v34 = vld [vmem:[%s466_s0 + $0x30] sm:$0xff]  ;;  %v30_v44 = vld [vmem:[%s466_s0 + $0x38] sm:$0xff] }
   0x6   :  { %v263_v6 = vld [vmem:[%s471_s5] ss:$0 sm:$0xff]  ;;  %v108_v7 = vmul.f32 %v258_v5, %v85_v4  ;;  %v109_v13 = vmul.f32 %v258_v5, %v86_v9  ;;  %v110_v19 = vmul.f32 %v258_v5, %v87_v15  ;;  %v111_v21 = vmul.f32 %v258_v5, %v88_v17  ;;  %v91_v39 = vld [vmem:[%s467_s1 + $0x30] sm:$0xff]  ;;  %v92_v45 = vld [vmem:[%s467_s1 + $0x38] sm:$0xff] }
   0x7   :  { %v27_v22 = vld [vmem:[%s466_s0 + $0x20] sm:$0xff]  ;;  %v72_v32 = vadd.f32 %v249_v2, %v49_v20  ;;  %v113_v43 = vmul.f32 %v258_v5, %v90_v29  ;;  %v74_v48 = vadd.f32 %v249_v2, %v51_v38  ;;  %v52_v49 = vmul.f32 %v244_v1, %v29_v34  ;;  %v32_v56 = vld [vmem:[%s466_s0 + $0x48] sm:$0xff]  ;;  %v33_v4 = vld [vmem:[%s466_s0 + $0x50] sm:$0xff] }
   0x8   :  { %v131_v18 = vadd.f32 %v263_v6, %v108_v7  ;;  %v89_v23 = vld [vmem:[%s467_s1 + $0x20] sm:$0xff]  ;;  %v132_v26 = vadd.f32 %v263_v6, %v109_v13  ;;  %v50_v28 = vmul.f32 %v244_v1, %v27_v22  ;;  %v133_v31 = vadd.f32 %v263_v6, %v110_v19  ;;  %v94_v3 = vld [vmem:[%s467_s1 + $0x48] sm:$0xff]  ;;  %v34_v12 = vld [vmem:[%s466_s0 + $0x58] sm:$0xff] }
   0x9   :  { %v134_v33 = vadd.f32 %v263_v6, %v111_v21  ;;  %v112_v37 = vmul.f32 %v258_v5, %v89_v23  ;;  %v31_v50 = vld [vmem:[%s466_s0 + $0x40] sm:$0xff]  ;;  %v136_v54 = vadd.f32 %v263_v6, %v113_v43  ;;  %v114_v55 = vmul.f32 %v258_v5, %v91_v39  ;;  %v96_v17 = vld [vmem:[%s467_s1 + $0x58] sm:$0xff]  ;;  %v37_v34 = vld [vmem:[%s466_s0 + $0x70] sm:$0xff] }
   0xa   :  { %v147_v30 = vadd.f32 %v131_v18, %v69_v11  ;;  %v148_v35 = vadd.f32 %v132_v26, %v70_v25  ;;  %v73_v36 = vadd.f32 %v249_v2, %v50_v28  ;;  %v149_v41 = vadd.f32 %v133_v31, %v71_v27  ;;  %v93_v51 = vld [vmem:[%s467_s1 + $0x40] sm:$0xff]  ;;  %v95_v11 = vld [vmem:[%s467_s1 + $0x50] sm:$0xff]  ;;  %v36_v28 = vld [vmem:[%s466_s0 + $0x68] sm:$0xff] }
   0xb   :  { %v150_v42 = vadd.f32 %v134_v33, %v72_v32  ;;  %v135_v47 = vadd.f32 %v263_v6, %v112_v37  ;;  %v75_v58 = vadd.f32 %v249_v2, %v52_v49  ;;  %v53_v59 = vmul.f32 %v244_v1, %v30_v44  ;;  %v35_v22 = vld [vmem:[%s466_s0 + $0x60] sm:$0xff]  ;;  %v98_v33 = vld [vmem:[%s467_s1 + $0x68] sm:$0xff]  ;;  %v99_v43 = vld [vmem:[%s467_s1 + $0x70] sm:$0xff] }
   0xc   :  { %v163_v40 = vmax.f32 %v147_v30, 0.0  ;;  %v164_v46 = vmax.f32 %v148_v35, 0.0  ;;  %v165_v52 = vmax.f32 %v149_v41, 0.0  ;;  %v115_v60 = vmul.f32 %v258_v5, %v92_v45  ;;  %v97_v27 = vld [vmem:[%s467_s1 + $0x60] sm:$0xff]  ;;  %v100_v49 = vld [vmem:[%s467_s1 + $0x78] sm:$0xff] }
   0xd   :  { %v166_v53 = vmax.f32 %v150_v42, 0.0  ;;  %v151_v57 = vadd.f32 %v135_v47, %v73_v36  ;;  %v152_v61 = vadd.f32 %v136_v54, %v74_v48  ;;  %v137_v62 = vadd.f32 %v263_v6, %v114_v55  ;;  %v38_v48 = vld [vmem:[%s466_s0 + $0x78] sm:$0xff] }
   0xe   :  { %179 = vst [vmem:[%s472_s6] sm:$0xff] %v163_v40  ;;  %180 = vst [vmem:[%s472_s6 + $0x8] sm:$0xff] %v164_v46  ;;  %v54_v63 = vmul.f32 %v244_v1, %v31_v50  ;;  %v116_v0 = vmul.f32 %v258_v5, %v93_v51  ;;  %v76_v8 = vadd.f32 %v249_v2, %v53_v59 }
   0xf   :  { %181 = vst [vmem:[%s472_s6 + $0x10] sm:$0xff] %v165_v52  ;;  %182 = vst [vmem:[%s472_s6 + $0x18] sm:$0xff] %v166_v53  ;;  %v167_v7 = vmax.f32 %v151_v57, 0.0  ;;  %v138_v9 = vadd.f32 %v263_v6, %v115_v60  ;;  %v55_v10 = vmul.f32 %v244_v1, %v32_v56  ;;  %v168_v13 = vmax.f32 %v152_v61, 0.0 }
  0x10   :  { %v153_v14 = vadd.f32 %v137_v62, %v75_v58  ;;  %v77_v15 = vadd.f32 %v249_v2, %v54_v63  ;;  %v139_v16 = vadd.f32 %v263_v6, %v116_v0  ;;  %v117_v20 = vmul.f32 %v258_v5, %v94_v3 }
  0x11   :  { %183 = vst [vmem:[%s472_s6 + $0x20] sm:$0xff] %v167_v7  ;;  %v154_v18 = vadd.f32 %v138_v9, %v76_v8  ;;  %v78_v19 = vadd.f32 %v249_v2, %v55_v10  ;;  %v56_v21 = vmul.f32 %v244_v1, %v33_v4  ;;  %184 = vst [vmem:[%s472_s6 + $0x28] sm:$0xff] %v168_v13 }
  0x12   :  { %v169_v23 = vmax.f32 %v153_v14, 0.0  ;;  %v155_v24 = vadd.f32 %v139_v16, %v77_v15  ;;  %v118_v25 = vmul.f32 %v258_v5, %v95_v11  ;;  %v57_v26 = vmul.f32 %v244_v1, %v34_v12 }
  0x13   :  { %v170_v29 = vmax.f32 %v154_v18, 0.0  ;;  %v140_v30 = vadd.f32 %v263_v6, %v117_v20  ;;  %v79_v31 = vadd.f32 %v249_v2, %v56_v21  ;;  %v119_v32 = vmul.f32 %v258_v5, %v96_v17 }
  0x14   :  { %185 = vst [vmem:[%s472_s6 + $0x30] sm:$0xff] %v169_v23  ;;  %v171_v35 = vmax.f32 %v155_v24, 0.0  ;;  %v141_v36 = vadd.f32 %v263_v6, %v118_v25  ;;  %v80_v37 = vadd.f32 %v249_v2, %v57_v26  ;;  %v58_v38 = vmul.f32 %v244_v1, %v35_v22 }
  0x15   :  { %186 = vst [vmem:[%s472_s6 + $0x38] sm:$0xff] %v170_v29  ;;  %v156_v39 = vadd.f32 %v140_v30, %v78_v19  ;;  %v142_v40 = vadd.f32 %v263_v6, %v119_v32  ;;  %v120_v41 = vmul.f32 %v258_v5, %v97_v27  ;;  %v59_v42 = vmul.f32 %v244_v1, %v36_v28 }
  0x16   :  { %187 = vst [vmem:[%s472_s6 + $0x40] sm:$0xff] %v171_v35  ;;  %v157_v44 = vadd.f32 %v141_v36, %v79_v31  ;;  %v81_v45 = vadd.f32 %v249_v2, %v58_v38  ;;  %v121_v46 = vmul.f32 %v258_v5, %v98_v33  ;;  %v60_v47 = vmul.f32 %v244_v1, %v37_v34 }
  0x17   :  { %v172_v50 = vmax.f32 %v156_v39, 0.0  ;;  %v158_v51 = vadd.f32 %v142_v40, %v80_v37  ;;  %v143_v52 = vadd.f32 %v263_v6, %v120_v41  ;;  %v82_v53 = vadd.f32 %v249_v2, %v59_v42 }
  0x18   :  { %v173_v54 = vmax.f32 %v157_v44, 0.0  ;;  %v144_v55 = vadd.f32 %v263_v6, %v121_v46  ;;  %v83_v56 = vadd.f32 %v249_v2, %v60_v47  ;;  %v122_v57 = vmul.f32 %v258_v5, %v99_v43 }
  0x19   :  { %188 = vst [vmem:[%s472_s6 + $0x48] sm:$0xff] %v172_v50  ;;  %v174_v58 = vmax.f32 %v158_v51, 0.0  ;;  %v159_v59 = vadd.f32 %v143_v52, %v81_v45  ;;  %v61_v60 = vmul.f32 %v244_v1, %v38_v48  ;;  %v123_v61 = vmul.f32 %v258_v5, %v100_v49 }
  0x1a   :  { %189 = vst [vmem:[%s472_s6 + $0x50] sm:$0xff] %v173_v54  ;;  %v160_v62 = vadd.f32 %v144_v55, %v82_v53  ;;  %v145_v63 = vadd.f32 %v263_v6, %v122_v57 }
  0x1b   :  { %190 = vst [vmem:[%s472_s6 + $0x58] sm:$0xff] %v174_v58  ;;  %v175_v0 = vmax.f32 %v159_v59, 0.0  ;;  %v84_v3 = vadd.f32 %v249_v2, %v61_v60  ;;  %v146_v4 = vadd.f32 %v263_v6, %v123_v61 }
  0x1c   :  { %v176_v7 = vmax.f32 %v160_v62, 0.0  ;;  %v161_v1 = vadd.f32 %v145_v63, %v83_v56 }
  0x1d   :  { %191 = vst [vmem:[%s472_s6 + $0x60] sm:$0xff] %v175_v0  ;;  %v162_v5 = vadd.f32 %v146_v4, %v84_v3 }
  0x1e   :  { %192 = vst [vmem:[%s472_s6 + $0x68] sm:$0xff] %v176_v7  ;;  %v177_v8 = vmax.f32 %v161_v1, 0.0 }
  0x1f   :  { %v178_v9 = vmax.f32 %v162_v5, 0.0 }
  0x20   :  { %193 = vst [vmem:[%s472_s6 + $0x70] sm:$0xff] %v177_v8 }
  0x21   :  { %194 = vst [vmem:[%s472_s6 + $0x78] sm:$0xff] %v178_v9 }

</bundles_post_ra>
